<compile_context>
chip_gen: v7x
topology: tpu7x:2x2x1
jax: 0.10.0
libtpu: 0.0.40
codegen_flags: <defaults>
</compile_context>

<pallas_src>
import functools
import math

import numpy as np
import jax
import jax.numpy as jnp
from jax import lax
from jax.experimental import pallas as pl
from jax.experimental.pallas import tpu as pltpu


def _round_up(x, m):
    return ((x + m - 1) // m) * m


def build_position_encoding(embedding_size: int, token_seq_len: int) -> jnp.ndarray:
    """Exact host-side port of TokenPositionEncoder (done once at init)."""
    assert embedding_size % 2 == 0, "TokenPositionEncoder requires an even embedding size"
    pe = np.zeros((token_seq_len, embedding_size), dtype=np.float32)
    for position in range(token_seq_len):
        for i in range(0, embedding_size, 2):
            pe[position, i] = math.sin(position / 10000 ** (2 * i / embedding_size))
            pe[position, i + 1] = math.cos(position / 10000 ** (2 * (i + 1) / embedding_size))
    return jnp.asarray(pe)


def prepare_kg_embedder_params(emb_table, pe_table, *,
                               table_dtype=jnp.bfloat16, k_chunk=128):
    """One-time parameter prep (hoisted off the per-call critical path).

    Builds ONE fused table: rows [0, V) are the vocab embedding, rows
    [v_off, v_off + L) are the sinusoidal position encodings, with PE row 0
    zeroed so that gathering position 0 contributes nothing (this replaces the
    torch `if pos != 0` guard).  Embedding dim padded to a 128-lane multiple,
    rows padded to a multiple of k_chunk; stored in bf16 by default (native
    MXU dtype on v6e/v7x; the 0/1 two-hot selection is exact w.r.t. it)."""
    V, E = emb_table.shape
    L, E2 = pe_table.shape
    assert E == E2, "embedding dims of vocab table and position encoding must match"
    assert k_chunk % 128 == 0
    E_pad = _round_up(E, 128)
    v_off = _round_up(V, 128)              # PE region start (disjoint 128-row chunks)
    K_pad = _round_up(v_off + L, k_chunk)

    tbl = jnp.zeros((K_pad, E_pad), jnp.float32)
    tbl = tbl.at[:V, :E].set(emb_table.astype(jnp.float32))
    tbl = tbl.at[v_off:v_off + L, :E].set(pe_table.astype(jnp.float32))
    tbl = tbl.at[v_off, :].set(0.0)        # bake in the `pos != 0` guard
    tbl = tbl.astype(table_dtype)
    return {"table": tbl, "V": V, "L": L, "E": E, "E_pad": E_pad,
            "v_off": v_off, "k_chunk": k_chunk}


def _kg_embed_kernel(idx_ref, tbl_ref, out_ref, *, k_chunk, n_chunks, v_off):
    # idx_ref: (TILE_M, 2) int32   [:, 0] = association token id, [:, 1] = position
    # tbl_ref: (K_pad, E_pad)      fused [vocab ; PE] table (VMEM resident, bf16)
    # out_ref: (TILE_M, E_pad) f32 lane-dense output tile (used as the accumulator)
    tile_m = out_ref.shape[0]
    ids = idx_ref[:, 0:1]                    # (TILE_M, 1)
    pos = idx_ref[:, 1:2] + v_off            # shifted into the PE region of the table

    col = lax.broadcasted_iota(jnp.int32, (tile_m, k_chunk), 1)

    dot_kwargs = dict(preferred_element_type=jnp.float32)
    if tbl_ref.dtype == jnp.float32:
        # Guarantee exact f32 row selection if an f32 table is used.
        dot_kwargs["precision"] = lax.Precision.HIGHEST

    out_ref[...] = jnp.zeros_like(out_ref)
    # K-chunked "two-hot" matmul: per chunk the LHS has at most two 1.0 entries
    # per row (the vocab row and the position-encoding row), so one matmul
    # yields embedding + position encoding.  Static unroll; n_chunks is small.
    for k in range(n_chunks):
        base = k * k_chunk
        rows = col + base
        twohot = jnp.logical_or(rows == ids, rows == pos).astype(tbl_ref.dtype)
        out_ref[...] += jnp.dot(twohot, tbl_ref[pl.ds(base, k_chunk), :], **dot_kwargs)


def kg_embedder_forward(associations, association_attention_mask,
                        association_positions, prepared, *, tile_m=256):
    """associations / association_positions: (B, S) integer arrays.

    tile_m: tokens per grid step (multiple of 128).  256 fills the 256-wide
    v6e/v7x MXU; 128 is fine on v5e."""
    B, S = associations.shape
    E, E_pad = prepared["E"], prepared["E_pad"]
    tbl = prepared["table"]
    K_pad = tbl.shape[0]
    k_chunk = prepared["k_chunk"]
    v_off = prepared["v_off"]
    n_chunks = K_pad // k_chunk

    M = B * S
    tile_m = min(tile_m, _round_up(M, 128))
    M_pad = _round_up(M, tile_m)

    # Pack ids + positions into one (M_pad, 2) int32 input -> a single tiny
    # per-step DMA instead of two.
    idx = jnp.stack([associations.astype(jnp.int32).reshape(M),
                     association_positions.astype(jnp.int32).reshape(M)], axis=-1)
    if M_pad != M:
        idx = jnp.pad(idx, ((0, M_pad - M), (0, 0)))

    kernel = functools.partial(_kg_embed_kernel, k_chunk=k_chunk,
                               n_chunks=n_chunks, v_off=v_off)

    # VMEM budget: resident table (single-buffered) + pipelined idx/out blocks.
    table_bytes = K_pad * E_pad * tbl.dtype.itemsize
    block_bytes = 2 * (tile_m * 2 * 4) + 2 * (tile_m * E_pad * 4)
    vmem_limit = int(min(max(2 * (table_bytes + block_bytes) + (4 << 20), 16 << 20),
                         48 << 20))

    def build(single_buffer_table):
        # A constant-index resident block does not need double-buffering.
        tbl_kwargs = {"pipeline_mode": pl.Buffered(1)} if single_buffer_table else {}
        return pl.pallas_call(
            kernel,
            out_shape=jax.ShapeDtypeStruct((M_pad, E_pad), jnp.float32),
            grid_spec=pltpu.PrefetchScalarGridSpec(
                num_scalar_prefetch=0,
                grid=(M_pad // tile_m,),
                in_specs=[
                    pl.BlockSpec((tile_m, 2), lambda t: (t, 0)),          # packed ids/pos
                    pl.BlockSpec((K_pad, E_pad), lambda t: (0, 0),        # fused table
                                 **tbl_kwargs),
                ],
                out_specs=pl.BlockSpec((tile_m, E_pad), lambda t: (t, 0)),
            ),
            compiler_params=pltpu.CompilerParams(
                dimension_semantics=("parallel",),
                vmem_limit_bytes=vmem_limit),
        )

    try:
        out = build(True)(idx, tbl)
    except Exception:
        # Fallback if this jax build rejects buffer_count=1 on the resident block.
        out = build(False)(idx, tbl)

    if M_pad != M or E_pad != E:
        out = out[:M, :E]                  # only pays an extra copy when padding exists
    embeddings = out.reshape(B, S, E)
    return embeddings, association_attention_mask


if __name__ == "__main__":
    # Small-but-faithful config: toy vocab (500, padded to a 512-row region),
    # seq len 64, embedding size 128 (lane-dense, no post-kernel slice),
    # B*S = 512 tokens -> 2 parallel 256-token tiles.
    B, S = 8, 64          # batch, association sequence length
    E = 128               # embedding_size
    V = 500               # toy vocab size
    L = S                 # token_seq_len for the position encoder

    key = jax.random.PRNGKey(0)
    k_emb, k_ids, k_pos = jax.random.split(key, 3)

    emb_table = jax.random.normal(k_emb, (V, E), jnp.float32) * 0.02
    pe_table = build_position_encoding(E, L)

    associations = jax.random.randint(k_ids, (B, S), 0, V, dtype=jnp.int32)
    association_positions = jax.random.randint(k_pos, (B, S), 0, L, dtype=jnp.int32)
    association_attention_mask = (associations % 7 != 0).astype(jnp.int32)

    prepared = prepare_kg_embedder_params(emb_table, pe_table)  # bf16 fused table

    embeddings, mask_out = kg_embedder_forward(
        associations, association_attention_mask, association_positions,
        prepared, tile_m=256)
    embeddings = jax.block_until_ready(embeddings)

    # Reference uses the same bf16-quantized tables as the kernel, so the
    # two-hot selection + f32 accumulation must match exactly (tight tol).
    emb_q = emb_table.astype(jnp.bfloat16).astype(jnp.float32)
    pe_q = pe_table.astype(jnp.bfloat16).astype(jnp.float32)
    ref = emb_q[associations] + jnp.where(
        (association_positions != 0)[..., None], pe_q[association_positions], 0.0)

    assert embeddings.shape == (B, S, E), embeddings.shape
    assert jnp.allclose(embeddings, ref, atol=1e-5, rtol=1e-5), "mismatch vs reference"
    assert jnp.array_equal(mask_out, association_attention_mask), "mask not passed through"

    # TODO(synk): KnowledgeGraph/BertTokenizer vocab construction is host-side
    # preprocessing and is not part of the device forward pass.
    print("KERNEL_OK")
</pallas_src>

<mosaic_0001>
module attributes {stable_mosaic.version = 11 : i64} {
  func.func @_kg_embed_kernel(%arg0: i32, %arg1: memref<256x2xi32, #tpu.memory_space<vmem>>, %arg2: memref<640x128xbf16, #tpu.memory_space<vmem>>, %arg3: memref<256x128xf32, #tpu.memory_space<vmem>>) attributes {dimension_semantics = [#tpu.dimension_semantics<parallel>], iteration_bounds = array<i64: 2>, scalar_prefetch = 0 : i64, scratch_operands = 0 : i64, tpu.core_type = #tpu.core_type<tc>, window_params = [{transform_indices = @transform_0, window_bounds = array<i64: 256, 2>}, {pipeline_mode = #tpu.pipeline_mode<synchronous>, transform_indices = @transform_1, window_bounds = array<i64: 640, 128>}, {transform_indices = @transform_2, window_bounds = array<i64: 256, 128>}]} {
    %c0 = arith.constant 0 : index
    %c0_0 = arith.constant 0 : index
    %0 = vector.load %arg1[%c0, %c0_0] : memref<256x2xi32, #tpu.memory_space<vmem>>, vector<256x1xi32>
    %c0_1 = arith.constant 0 : index
    %c1 = arith.constant 1 : index
    %1 = vector.load %arg1[%c0_1, %c1] : memref<256x2xi32, #tpu.memory_space<vmem>>, vector<256x1xi32>
    %c512_i32 = arith.constant 512 : i32
    %2 = vector.broadcast %c512_i32 : i32 to vector<256x1xi32>
    %3 = arith.addi %1, %2 : vector<256x1xi32>
    %4 = tpu.iota {dimensions = array<i32: 1>} : vector<256x128xi32>
    %cst = arith.constant 0.000000e+00 : f32
    %5 = vector.broadcast %cst : f32 to vector<256x128xf32>
    %c0_2 = arith.constant 0 : index
    %c0_3 = arith.constant 0 : index
    %6 = vector.load %arg3[%c0_2, %c0_3] : memref<256x128xf32, #tpu.memory_space<vmem>>, vector<256x128xf32>
    tpu.vector_store %arg3[%c0_2, %c0_3], %5 {strides = array<i32>} : memref<256x128xf32, #tpu.memory_space<vmem>>, vector<256x128xf32>,
    %c0_i32 = arith.constant 0 : i32
    %7 = vector.broadcast %c0_i32 : i32 to vector<256x128xi32>
    %8 = arith.addi %4, %7 : vector<256x128xi32>
    %9 = vector.broadcast %0 : vector<256x1xi32> to vector<256x128xi32>
    %10 = arith.cmpi eq, %8, %9 : vector<256x128xi32>
    %11 = vector.broadcast %3 : vector<256x1xi32> to vector<256x128xi32>
    %12 = arith.cmpi eq, %8, %11 : vector<256x128xi32>
    %13 = arith.ori %10, %12 : vector<256x128xi1>
    %14 = arith.extui %13 : vector<256x128xi1> to vector<256x128xi32>
    %15 = arith.sitofp %14 : vector<256x128xi32> to vector<256x128xf32>
    %16 = arith.truncf %15 : vector<256x128xf32> to vector<256x128xbf16>
    %c0_4 = arith.constant 0 : index
    %c0_5 = arith.constant 0 : index
    %17 = vector.load %arg3[%c0_4, %c0_5] : memref<256x128xf32, #tpu.memory_space<vmem>>, vector<256x128xf32>
    %c0_6 = arith.constant 0 : index
    %c0_7 = arith.constant 0 : index
    %18 = vector.load %arg2[%c0_6, %c0_7] : memref<640x128xbf16, #tpu.memory_space<vmem>>, vector<128x128xbf16>
    %cst_8 = arith.constant dense<0.000000e+00> : vector<256x128xf32>
    %19 = tpu.matmul %16, %18, %cst_8 {dimension_numbers = #tpu.dot_dimension_numbers<[1], [0], [0], [1], [0, 0, 1, 1], [], []>} : vector<256x128xbf16>, vector<128x128xbf16>, vector<256x128xf32> -> vector<256x128xf32>
    %20 = arith.addf %17, %19 : vector<256x128xf32>
    %c0_9 = arith.constant 0 : index
    %c0_10 = arith.constant 0 : index
    %21 = vector.load %arg3[%c0_9, %c0_10] : memref<256x128xf32, #tpu.memory_space<vmem>>, vector<256x128xf32>
    tpu.vector_store %arg3[%c0_9, %c0_10], %20 {strides = array<i32>} : memref<256x128xf32, #tpu.memory_space<vmem>>, vector<256x128xf32>,
    %c128_i32 = arith.constant 128 : i32
    %22 = vector.broadcast %c128_i32 : i32 to vector<256x128xi32>
    %23 = arith.addi %4, %22 : vector<256x128xi32>
    %24 = vector.broadcast %0 : vector<256x1xi32> to vector<256x128xi32>
    %25 = arith.cmpi eq, %23, %24 : vector<256x128xi32>
    %26 = vector.broadcast %3 : vector<256x1xi32> to vector<256x128xi32>
    %27 = arith.cmpi eq, %23, %26 : vector<256x128xi32>
    %28 = arith.ori %25, %27 : vector<256x128xi1>
    %29 = arith.extui %28 : vector<256x128xi1> to vector<256x128xi32>
    %30 = arith.sitofp %29 : vector<256x128xi32> to vector<256x128xf32>
    %31 = arith.truncf %30 : vector<256x128xf32> to vector<256x128xbf16>
    %c0_11 = arith.constant 0 : index
    %c0_12 = arith.constant 0 : index
    %32 = vector.load %arg3[%c0_11, %c0_12] : memref<256x128xf32, #tpu.memory_space<vmem>>, vector<256x128xf32>
    %c128 = arith.constant 128 : index
    %c0_13 = arith.constant 0 : index
    %33 = vector.load %arg2[%c128, %c0_13] : memref<640x128xbf16, #tpu.memory_space<vmem>>, vector<128x128xbf16>
    %cst_14 = arith.constant dense<0.000000e+00> : vector<256x128xf32>
    %34 = tpu.matmul %31, %33, %cst_14 {dimension_numbers = #tpu.dot_dimension_numbers<[1], [0], [0], [1], [0, 0, 1, 1], [], []>} : vector<256x128xbf16>, vector<128x128xbf16>, vector<256x128xf32> -> vector<256x128xf32>
    %35 = arith.addf %32, %34 : vector<256x128xf32>
    %c0_15 = arith.constant 0 : index
    %c0_16 = arith.constant 0 : index
    %36 = vector.load %arg3[%c0_15, %c0_16] : memref<256x128xf32, #tpu.memory_space<vmem>>, vector<256x128xf32>
    tpu.vector_store %arg3[%c0_15, %c0_16], %35 {strides = array<i32>} : memref<256x128xf32, #tpu.memory_space<vmem>>, vector<256x128xf32>,
    %c256_i32 = arith.constant 256 : i32
    %37 = vector.broadcast %c256_i32 : i32 to vector<256x128xi32>
    %38 = arith.addi %4, %37 : vector<256x128xi32>
    %39 = vector.broadcast %0 : vector<256x1xi32> to vector<256x128xi32>
    %40 = arith.cmpi eq, %38, %39 : vector<256x128xi32>
    %41 = vector.broadcast %3 : vector<256x1xi32> to vector<256x128xi32>
    %42 = arith.cmpi eq, %38, %41 : vector<256x128xi32>
    %43 = arith.ori %40, %42 : vector<256x128xi1>
    %44 = arith.extui %43 : vector<256x128xi1> to vector<256x128xi32>
    %45 = arith.sitofp %44 : vector<256x128xi32> to vector<256x128xf32>
    %46 = arith.truncf %45 : vector<256x128xf32> to vector<256x128xbf16>
    %c0_17 = arith.constant 0 : index
    %c0_18 = arith.constant 0 : index
    %47 = vector.load %arg3[%c0_17, %c0_18] : memref<256x128xf32, #tpu.memory_space<vmem>>, vector<256x128xf32>
    %c256 = arith.constant 256 : index
    %c0_19 = arith.constant 0 : index
    %48 = vector.load %arg2[%c256, %c0_19] : memref<640x128xbf16, #tpu.memory_space<vmem>>, vector<128x128xbf16>
    %cst_20 = arith.constant dense<0.000000e+00> : vector<256x128xf32>
    %49 = tpu.matmul %46, %48, %cst_20 {dimension_numbers = #tpu.dot_dimension_numbers<[1], [0], [0], [1], [0, 0, 1, 1], [], []>} : vector<256x128xbf16>, vector<128x128xbf16>, vector<256x128xf32> -> vector<256x128xf32>
    %50 = arith.addf %47, %49 : vector<256x128xf32>
    %c0_21 = arith.constant 0 : index
    %c0_22 = arith.constant 0 : index
    %51 = vector.load %arg3[%c0_21, %c0_22] : memref<256x128xf32, #tpu.memory_space<vmem>>, vector<256x128xf32>
    tpu.vector_store %arg3[%c0_21, %c0_22], %50 {strides = array<i32>} : memref<256x128xf32, #tpu.memory_space<vmem>>, vector<256x128xf32>,
    %c384_i32 = arith.constant 384 : i32
    %52 = vector.broadcast %c384_i32 : i32 to vector<256x128xi32>
    %53 = arith.addi %4, %52 : vector<256x128xi32>
    %54 = vector.broadcast %0 : vector<256x1xi32> to vector<256x128xi32>
    %55 = arith.cmpi eq, %53, %54 : vector<256x128xi32>
    %56 = vector.broadcast %3 : vector<256x1xi32> to vector<256x128xi32>
    %57 = arith.cmpi eq, %53, %56 : vector<256x128xi32>
    %58 = arith.ori %55, %57 : vector<256x128xi1>
    %59 = arith.extui %58 : vector<256x128xi1> to vector<256x128xi32>
    %60 = arith.sitofp %59 : vector<256x128xi32> to vector<256x128xf32>
    %61 = arith.truncf %60 : vector<256x128xf32> to vector<256x128xbf16>
    %c0_23 = arith.constant 0 : index
    %c0_24 = arith.constant 0 : index
    %62 = vector.load %arg3[%c0_23, %c0_24] : memref<256x128xf32, #tpu.memory_space<vmem>>, vector<256x128xf32>
    %c384 = arith.constant 384 : index
    %c0_25 = arith.constant 0 : index
    %63 = vector.load %arg2[%c384, %c0_25] : memref<640x128xbf16, #tpu.memory_space<vmem>>, vector<128x128xbf16>
    %cst_26 = arith.constant dense<0.000000e+00> : vector<256x128xf32>
    %64 = tpu.matmul %61, %63, %cst_26 {dimension_numbers = #tpu.dot_dimension_numbers<[1], [0], [0], [1], [0, 0, 1, 1], [], []>} : vector<256x128xbf16>, vector<128x128xbf16>, vector<256x128xf32> -> vector<256x128xf32>
    %65 = arith.addf %62, %64 : vector<256x128xf32>
    %c0_27 = arith.constant 0 : index
    %c0_28 = arith.constant 0 : index
    %66 = vector.load %arg3[%c0_27, %c0_28] : memref<256x128xf32, #tpu.memory_space<vmem>>, vector<256x128xf32>
    tpu.vector_store %arg3[%c0_27, %c0_28], %65 {strides = array<i32>} : memref<256x128xf32, #tpu.memory_space<vmem>>, vector<256x128xf32>,
    %c512_i32_29 = arith.constant 512 : i32
    %67 = vector.broadcast %c512_i32_29 : i32 to vector<256x128xi32>
    %68 = arith.addi %4, %67 : vector<256x128xi32>
    %69 = vector.broadcast %0 : vector<256x1xi32> to vector<256x128xi32>
    %70 = arith.cmpi eq, %68, %69 : vector<256x128xi32>
    %71 = vector.broadcast %3 : vector<256x1xi32> to vector<256x128xi32>
    %72 = arith.cmpi eq, %68, %71 : vector<256x128xi32>
    %73 = arith.ori %70, %72 : vector<256x128xi1>
    %74 = arith.extui %73 : vector<256x128xi1> to vector<256x128xi32>
    %75 = arith.sitofp %74 : vector<256x128xi32> to vector<256x128xf32>
    %76 = arith.truncf %75 : vector<256x128xf32> to vector<256x128xbf16>
    %c0_30 = arith.constant 0 : index
    %c0_31 = arith.constant 0 : index
    %77 = vector.load %arg3[%c0_30, %c0_31] : memref<256x128xf32, #tpu.memory_space<vmem>>, vector<256x128xf32>
    %c512 = arith.constant 512 : index
    %c0_32 = arith.constant 0 : index
    %78 = vector.load %arg2[%c512, %c0_32] : memref<640x128xbf16, #tpu.memory_space<vmem>>, vector<128x128xbf16>
    %cst_33 = arith.constant dense<0.000000e+00> : vector<256x128xf32>
    %79 = tpu.matmul %76, %78, %cst_33 {dimension_numbers = #tpu.dot_dimension_numbers<[1], [0], [0], [1], [0, 0, 1, 1], [], []>} : vector<256x128xbf16>, vector<128x128xbf16>, vector<256x128xf32> -> vector<256x128xf32>
    %80 = arith.addf %77, %79 : vector<256x128xf32>
    %c0_34 = arith.constant 0 : index
    %c0_35 = arith.constant 0 : index
    %81 = vector.load %arg3[%c0_34, %c0_35] : memref<256x128xf32, #tpu.memory_space<vmem>>, vector<256x128xf32>
    tpu.vector_store %arg3[%c0_34, %c0_35], %80 {strides = array<i32>} : memref<256x128xf32, #tpu.memory_space<vmem>>, vector<256x128xf32>,
    return
  }
  func.func @transform_0(%arg0: i32) -> (i32, i32) {
    %c0_i32 = arith.constant 0 : i32
    %c0_i32_0 = arith.constant 0 : i32
    return %arg0, %c0_i32 : i32, i32
  }
  func.func @transform_1(%arg0: i32) -> (i32, i32) {
    %c0_i32 = arith.constant 0 : i32
    %c0_i32_0 = arith.constant 0 : i32
    %c0_i32_1 = arith.constant 0 : i32
    return %c0_i32, %c0_i32_0 : i32, i32
  }
  func.func @transform_2(%arg0: i32) -> (i32, i32) {
    %c0_i32 = arith.constant 0 : i32
    %c0_i32_0 = arith.constant 0 : i32
    return %arg0, %c0_i32 : i32, i32
  }
}

module attributes {stable_mosaic.version = 11 : i64} {
  func.func @_kg_embed_kernel(%arg0: i32, %arg1: memref<256x2xi32, #tpu.memory_space<vmem>>, %arg2: memref<640x128xbf16, #tpu.memory_space<vmem>>, %arg3: memref<256x128xf32, #tpu.memory_space<vmem>>) attributes {dimension_semantics = [#tpu.dimension_semantics<parallel>], iteration_bounds = array<i64: 2>, scalar_prefetch = 0 : i64, scratch_operands = 0 : i64, tpu.core_type = #tpu.core_type<tc>, window_params = [{transform_indices = @transform_0, window_bounds = array<i64: 256, 2>}, {pipeline_mode = #tpu.pipeline_mode<synchronous>, transform_indices = @transform_1, window_bounds = array<i64: 640, 128>}, {transform_indices = @transform_2, window_bounds = array<i64: 256, 128>}]} {
    %c0 = arith.constant 0 : index
    %c0_0 = arith.constant 0 : index
    %0 = vector.load %arg1[%c0, %c0_0] : memref<256x2xi32, #tpu.memory_space<vmem>>, vector<256x1xi32>
    %c0_1 = arith.constant 0 : index
    %c1 = arith.constant 1 : index
    %1 = vector.load %arg1[%c0_1, %c1] : memref<256x2xi32, #tpu.memory_space<vmem>>, vector<256x1xi32>
    %c512_i32 = arith.constant 512 : i32
    %2 = vector.broadcast %c512_i32 : i32 to vector<256x1xi32>
    %3 = arith.addi %1, %2 : vector<256x1xi32>
    %4 = tpu.iota {dimensions = array<i32: 1>} : vector<256x128xi32>
    %cst = arith.constant 0.000000e+00 : f32
    %5 = vector.broadcast %cst : f32 to vector<256x128xf32>
    %c0_2 = arith.constant 0 : index
    %c0_3 = arith.constant 0 : index
    %6 = vector.load %arg3[%c0_2, %c0_3] : memref<256x128xf32, #tpu.memory_space<vmem>>, vector<256x128xf32>
    tpu.vector_store %arg3[%c0_2, %c0_3], %5 {strides = array<i32>} : memref<256x128xf32, #tpu.memory_space<vmem>>, vector<256x128xf32>,
    %c0_i32 = arith.constant 0 : i32
    %7 = vector.broadcast %c0_i32 : i32 to vector<256x128xi32>
    %8 = arith.addi %4, %7 : vector<256x128xi32>
    %9 = vector.broadcast %0 : vector<256x1xi32> to vector<256x128xi32>
    %10 = arith.cmpi eq, %8, %9 : vector<256x128xi32>
    %11 = vector.broadcast %3 : vector<256x1xi32> to vector<256x128xi32>
    %12 = arith.cmpi eq, %8, %11 : vector<256x128xi32>
    %13 = arith.ori %10, %12 : vector<256x128xi1>
    %14 = arith.extui %13 : vector<256x128xi1> to vector<256x128xi32>
    %15 = arith.sitofp %14 : vector<256x128xi32> to vector<256x128xf32>
    %16 = arith.truncf %15 : vector<256x128xf32> to vector<256x128xbf16>
    %c0_4 = arith.constant 0 : index
    %c0_5 = arith.constant 0 : index
    %17 = vector.load %arg3[%c0_4, %c0_5] : memref<256x128xf32, #tpu.memory_space<vmem>>, vector<256x128xf32>
    %c0_6 = arith.constant 0 : index
    %c0_7 = arith.constant 0 : index
    %18 = vector.load %arg2[%c0_6, %c0_7] : memref<640x128xbf16, #tpu.memory_space<vmem>>, vector<128x128xbf16>
    %cst_8 = arith.constant dense<0.000000e+00> : vector<256x128xf32>
    %19 = tpu.matmul %16, %18, %cst_8 {dimension_numbers = #tpu.dot_dimension_numbers<[1], [0], [0], [1], [0, 0, 1, 1], [], []>} : vector<256x128xbf16>, vector<128x128xbf16>, vector<256x128xf32> -> vector<256x128xf32>
    %20 = arith.addf %17, %19 : vector<256x128xf32>
    %c0_9 = arith.constant 0 : index
    %c0_10 = arith.constant 0 : index
    %21 = vector.load %arg3[%c0_9, %c0_10] : memref<256x128xf32, #tpu.memory_space<vmem>>, vector<256x128xf32>
    tpu.vector_store %arg3[%c0_9, %c0_10], %20 {strides = array<i32>} : memref<256x128xf32, #tpu.memory_space<vmem>>, vector<256x128xf32>,
    %c128_i32 = arith.constant 128 : i32
    %22 = vector.broadcast %c128_i32 : i32 to vector<256x128xi32>
    %23 = arith.addi %4, %22 : vector<256x128xi32>
    %24 = vector.broadcast %0 : vector<256x1xi32> to vector<256x128xi32>
    %25 = arith.cmpi eq, %23, %24 : vector<256x128xi32>
    %26 = vector.broadcast %3 : vector<256x1xi32> to vector<256x128xi32>
    %27 = arith.cmpi eq, %23, %26 : vector<256x128xi32>
    %28 = arith.ori %25, %27 : vector<256x128xi1>
    %29 = arith.extui %28 : vector<256x128xi1> to vector<256x128xi32>
    %30 = arith.sitofp %29 : vector<256x128xi32> to vector<256x128xf32>
    %31 = arith.truncf %30 : vector<256x128xf32> to vector<256x128xbf16>
    %c0_11 = arith.constant 0 : index
    %c0_12 = arith.constant 0 : index
    %32 = vector.load %arg3[%c0_11, %c0_12] : memref<256x128xf32, #tpu.memory_space<vmem>>, vector<256x128xf32>
    %c128 = arith.constant 128 : index
    %c0_13 = arith.constant 0 : index
    %33 = vector.load %arg2[%c128, %c0_13] : memref<640x128xbf16, #tpu.memory_space<vmem>>, vector<128x128xbf16>
    %cst_14 = arith.constant dense<0.000000e+00> : vector<256x128xf32>
    %34 = tpu.matmul %31, %33, %cst_14 {dimension_numbers = #tpu.dot_dimension_numbers<[1], [0], [0], [1], [0, 0, 1, 1], [], []>} : vector<256x128xbf16>, vector<128x128xbf16>, vector<256x128xf32> -> vector<256x128xf32>
    %35 = arith.addf %32, %34 : vector<256x128xf32>
    %c0_15 = arith.constant 0 : index
    %c0_16 = arith.constant 0 : index
    %36 = vector.load %arg3[%c0_15, %c0_16] : memref<256x128xf32, #tpu.memory_space<vmem>>, vector<256x128xf32>
    tpu.vector_store %arg3[%c0_15, %c0_16], %35 {strides = array<i32>} : memref<256x128xf32, #tpu.memory_space<vmem>>, vector<256x128xf32>,
    %c256_i32 = arith.constant 256 : i32
    %37 = vector.broadcast %c256_i32 : i32 to vector<256x128xi32>
    %38 = arith.addi %4, %37 : vector<256x128xi32>
    %39 = vector.broadcast %0 : vector<256x1xi32> to vector<256x128xi32>
    %40 = arith.cmpi eq, %38, %39 : vector<256x128xi32>
    %41 = vector.broadcast %3 : vector<256x1xi32> to vector<256x128xi32>
    %42 = arith.cmpi eq, %38, %41 : vector<256x128xi32>
    %43 = arith.ori %40, %42 : vector<256x128xi1>
    %44 = arith.extui %43 : vector<256x128xi1> to vector<256x128xi32>
    %45 = arith.sitofp %44 : vector<256x128xi32> to vector<256x128xf32>
    %46 = arith.truncf %45 : vector<256x128xf32> to vector<256x128xbf16>
    %c0_17 = arith.constant 0 : index
    %c0_18 = arith.constant 0 : index
    %47 = vector.load %arg3[%c0_17, %c0_18] : memref<256x128xf32, #tpu.memory_space<vmem>>, vector<256x128xf32>
    %c256 = arith.constant 256 : index
    %c0_19 = arith.constant 0 : index
    %48 = vector.load %arg2[%c256, %c0_19] : memref<640x128xbf16, #tpu.memory_space<vmem>>, vector<128x128xbf16>
    %cst_20 = arith.constant dense<0.000000e+00> : vector<256x128xf32>
    %49 = tpu.matmul %46, %48, %cst_20 {dimension_numbers = #tpu.dot_dimension_numbers<[1], [0], [0], [1], [0, 0, 1, 1], [], []>} : vector<256x128xbf16>, vector<128x128xbf16>, vector<256x128xf32> -> vector<256x128xf32>
    %50 = arith.addf %47, %49 : vector<256x128xf32>
    %c0_21 = arith.constant 0 : index
    %c0_22 = arith.constant 0 : index
    %51 = vector.load %arg3[%c0_21, %c0_22] : memref<256x128xf32, #tpu.memory_space<vmem>>, vector<256x128xf32>
    tpu.vector_store %arg3[%c0_21, %c0_22], %50 {strides = array<i32>} : memref<256x128xf32, #tpu.memory_space<vmem>>, vector<256x128xf32>,
    %c384_i32 = arith.constant 384 : i32
    %52 = vector.broadcast %c384_i32 : i32 to vector<256x128xi32>
    %53 = arith.addi %4, %52 : vector<256x128xi32>
    %54 = vector.broadcast %0 : vector<256x1xi32> to vector<256x128xi32>
    %55 = arith.cmpi eq, %53, %54 : vector<256x128xi32>
    %56 = vector.broadcast %3 : vector<256x1xi32> to vector<256x128xi32>
    %57 = arith.cmpi eq, %53, %56 : vector<256x128xi32>
    %58 = arith.ori %55, %57 : vector<256x128xi1>
    %59 = arith.extui %58 : vector<256x128xi1> to vector<256x128xi32>
    %60 = arith.sitofp %59 : vector<256x128xi32> to vector<256x128xf32>
    %61 = arith.truncf %60 : vector<256x128xf32> to vector<256x128xbf16>
    %c0_23 = arith.constant 0 : index
    %c0_24 = arith.constant 0 : index
    %62 = vector.load %arg3[%c0_23, %c0_24] : memref<256x128xf32, #tpu.memory_space<vmem>>, vector<256x128xf32>
    %c384 = arith.constant 384 : index
    %c0_25 = arith.constant 0 : index
    %63 = vector.load %arg2[%c384, %c0_25] : memref<640x128xbf16, #tpu.memory_space<vmem>>, vector<128x128xbf16>
    %cst_26 = arith.constant dense<0.000000e+00> : vector<256x128xf32>
    %64 = tpu.matmul %61, %63, %cst_26 {dimension_numbers = #tpu.dot_dimension_numbers<[1], [0], [0], [1], [0, 0, 1, 1], [], []>} : vector<256x128xbf16>, vector<128x128xbf16>, vector<256x128xf32> -> vector<256x128xf32>
    %65 = arith.addf %62, %64 : vector<256x128xf32>
    %c0_27 = arith.constant 0 : index
    %c0_28 = arith.constant 0 : index
    %66 = vector.load %arg3[%c0_27, %c0_28] : memref<256x128xf32, #tpu.memory_space<vmem>>, vector<256x128xf32>
    tpu.vector_store %arg3[%c0_27, %c0_28], %65 {strides = array<i32>} : memref<256x128xf32, #tpu.memory_space<vmem>>, vector<256x128xf32>,
    %c512_i32_29 = arith.constant 512 : i32
    %67 = vector.broadcast %c512_i32_29 : i32 to vector<256x128xi32>
    %68 = arith.addi %4, %67 : vector<256x128xi32>
    %69 = vector.broadcast %0 : vector<256x1xi32> to vector<256x128xi32>
    %70 = arith.cmpi eq, %68, %69 : vector<256x128xi32>
    %71 = vector.broadcast %3 : vector<256x1xi32> to vector<256x128xi32>
    %72 = arith.cmpi eq, %68, %71 : vector<256x128xi32>
    %73 = arith.ori %70, %72 : vector<256x128xi1>
    %74 = arith.extui %73 : vector<256x128xi1> to vector<256x128xi32>
    %75 = arith.sitofp %74 : vector<256x128xi32> to vector<256x128xf32>
    %76 = arith.truncf %75 : vector<256x128xf32> to vector<256x128xbf16>
    %c0_30 = arith.constant 0 : index
    %c0_31 = arith.constant 0 : index
    %77 = vector.load %arg3[%c0_30, %c0_31] : memref<256x128xf32, #tpu.memory_space<vmem>>, vector<256x128xf32>
    %c512 = arith.constant 512 : index
    %c0_32 = arith.constant 0 : index
    %78 = vector.load %arg2[%c512, %c0_32] : memref<640x128xbf16, #tpu.memory_space<vmem>>, vector<128x128xbf16>
    %cst_33 = arith.constant dense<0.000000e+00> : vector<256x128xf32>
    %79 = tpu.matmul %76, %78, %cst_33 {dimension_numbers = #tpu.dot_dimension_numbers<[1], [0], [0], [1], [0, 0, 1, 1], [], []>} : vector<256x128xbf16>, vector<128x128xbf16>, vector<256x128xf32> -> vector<256x128xf32>
    %80 = arith.addf %77, %79 : vector<256x128xf32>
    %c0_34 = arith.constant 0 : index
    %c0_35 = arith.constant 0 : index
    %81 = vector.load %arg3[%c0_34, %c0_35] : memref<256x128xf32, #tpu.memory_space<vmem>>, vector<256x128xf32>
    tpu.vector_store %arg3[%c0_34, %c0_35], %80 {strides = array<i32>} : memref<256x128xf32, #tpu.memory_space<vmem>>, vector<256x128xf32>,
    return
  }
  func.func @transform_0(%arg0: i32) -> (i32, i32) {
    %c0_i32 = arith.constant 0 : i32
    %c0_i32_0 = arith.constant 0 : i32
    return %arg0, %c0_i32 : i32, i32
  }
  func.func @transform_1(%arg0: i32) -> (i32, i32) {
    %c0_i32 = arith.constant 0 : i32
    %c0_i32_0 = arith.constant 0 : i32
    %c0_i32_1 = arith.constant 0 : i32
    return %c0_i32, %c0_i32_0 : i32, i32
  }
  func.func @transform_2(%arg0: i32) -> (i32, i32) {
    %c0_i32 = arith.constant 0 : i32
    %c0_i32_0 = arith.constant 0 : i32
    return %arg0, %c0_i32 : i32, i32
  }
}

</mosaic_0001>

<bundles_post_ra>
// kernel: tpu_custom_call.1
= control target key start
LH: loop header
LB: loop body
LE: loop exit
PB: predicated region body
PF: predicated region fallthrough
CT: control target
= control target key end

     0   :  { %7 = vsyncpa [#allocation3], 0  ;;  %s6499_s0 = inlined_call_operand.vmem [shape: s32[512,2], index: 0, kind: input, shape index: {}]   ;;  %s6500_s1 = inlined_call_operand.vmem [shape: bf16[640,128], index: 1, kind: input, shape index: {}]   ;;  %s6501_s2 = inlined_call_operand.hbm [shape: f32[512,128], index: 2, kind: output, shape index: {}]  }
   0x1   :  { %9 = vsyncpa [#allocation3 + $0x1], 0  ;;  %s4249_s9 = smov 0   ;;  %s4251_s10 = smov 0  }
   0x2   :  { %s4253_s11 = smov 0   ;;  %s4255_s12 = smov 0  }
   0x3 LB: > { %s4270_s13 = sadd.s32 4294967295, %s4226_s12   ;;  %s3001_s14 = sadd.s32 4294967294, %s4226_s12   ;;  %s4226_s12 = sphi %s4255_s12, %s6982_s12   ;;  %s4222_s11 = sphi %s4253_s11, %s6981_s11   ;;  %s4218_s10 = sphi %s4251_s10, %s6980_s10   ;;  %s4214_s9 = sphi %s4249_s9, %s6979_s9  }
   0x4   : > { %s4274_s15 = sadd.s32 1, %s4226_s12   ;;  %s69_s16 = sadd.s32 1, %s4222_s11 }
   0x5   : > { %s66_s17 = ssub.s32 %s4226_s12, %s4274_s15  ;;  %p79_p0 = scmp.ne.s32.totalorder %s4222_s11, %s4218_s10 }
   0x6   : > { %p67_p1 = scmp.eq.s32.totalorder %s66_s17, 0  ;;  %p80_p2 = scmp.eq.s32.totalorder %s4270_s13, 1 }
   0x7   : > { %p85_p3 = scmp.ne.s32.totalorder %s4218_s10, %s4214_s9  ;;  %p86_p4 = scmp.eq.s32.totalorder %s3001_s14, 1 }
   0x8   : > { %s4285_s18 = scalar_select %p67_p1, %s4222_s11, %s69_s16  }
   0x9   : > { %p4287_p5 = por %p80_p2, %p79_p0  ;;  %p4291_p6 = por %p86_p4, %p85_p3 }
   0xa   : > { %p3004_p7 = scmp.ge.s32.totalorder %s4226_s12, 1  ;;  %p116_p8 = scmp.lt.s32.totalorder %s4226_s12, 3 }
   0xc   : > { %p117_p9 = pnand %p3004_p7, %p116_p8 }
   0xe   : > { %120 = sbr.rel (%p117_p9) target bundleno = 679 (0x2a7), region = 28 }
  0x15   : > { %s3006_s21 = sshll.u32 %s4270_s13, 5  ;;  %v4228_v0 = vmov 0   ;;  %v4229_v1 = vmov 1   ;;  %v4116_v14 = vld [vmem:[%s6500_s1] sm:$0xff]   ;;  %v4118_v21 = vld [vmem:[%s6500_s1 + $0x8] sm:$0xff]   ;;  %v4120_v26 = vld [vmem:[%s6500_s1 + $0x10] sm:$0xff]  }
  0x16   : > { %4083 = vset.pattern.permute.xlu1 %v4228_v0  ;;  %p139_p10 = scmp.lt.s32.totalorder %s3006_s21, 63  ;;  %4085 = vset.pattern.permute.xlu0 %v4229_v1  ;;  %v4336_v15 = vld [vmem:[%s6500_s1 + $0x80] sm:$0xff]   ;;  %v4119_v22 = vld [vmem:[%s6500_s1 + $0x88] sm:$0xff]   ;;  %v4121_v27 = vld [vmem:[%s6500_s1 + $0x90] sm:$0xff]   ;;  %s135_s29 = sand.u32 1, %s4218_s10  }
  0x17   : > { %3494 = vmatprep.subr.bf16.mxu1 %v4116_v14  ;;  %3590 = vmatprep.subr.bf16.mxu0 %v4336_v15  ;;  %v4122_v31 = vld [vmem:[%s6500_s1 + $0x18] sm:$0xff]   ;;  %v4124_v34 = vld [vmem:[%s6500_s1 + $0x20] sm:$0xff]   ;;  %v4126_v37 = vld [vmem:[%s6500_s1 + $0x28] sm:$0xff]   ;;  %s3005_s30 = sshll.u32 %s135_s29, 8  ;;  %s4231_s14 = smov [#allocation2]  }
  0x18   : > { %s6984_s21 = smov (!%p139_p10, %s3006_s21), 63  ;;  %3495 = vmatpush3.bf16.msra.mxu1 %v4116_v14  ;;  %3591 = vmatpush3.bf16.msra.mxu0 %v4336_v15  ;;  %v4123_v32 = vld [vmem:[%s6500_s1 + $0x98] sm:$0xff]   ;;  %v4125_v35 = vld [vmem:[%s6500_s1 + $0xa0] sm:$0xff]   ;;  %v4127_v38 = vld [vmem:[%s6500_s1 + $0xa8] sm:$0xff]   ;;  %v210_v14 = vlaneseq  ;;  %s6413_s3 = scalar_lea.vmem [#allocation2], %s3005_s30 }
  0x19   : > { %s3007_s22 = sshll.u32 %s6984_s21, 3  ;;  %3496 = vmatprep.subr.bf16.mxu1 %v4118_v21  ;;  %3592 = vmatprep.subr.bf16.mxu0 %v4119_v22  ;;  %v4128_v39 = vld [vmem:[%s6500_s1 + $0x30] sm:$0xff]   ;;  %v4130_v42 = vld [vmem:[%s6500_s1 + $0x38] sm:$0xff]   ;;  %v4423_v53 = vld [vmem:[%s6500_s1 + $0xc0] sm:$0xff]   ;;  %s2939_s4 = sshll.u32 %s6413_s3, 4  ;;  %s6451_s4 = int_to_ptr.vmem [resolvable:$true] %s2939_s4 }
  0x1a   : > { %s4303_s25 = scalar_lea.vmem %s6499_s0, %s3007_s22  ;;  %v4129_v40 = vld [vmem:[%s6500_s1 + $0xb0] sm:$0xff]   ;;  %v4131_v43 = vld [vmem:[%s6500_s1 + $0xb8] sm:$0xff]   ;;  %s4164_s8 = scalar_lea.vmem %s6451_s4, 4096 }
  0x1b   : > { %v149_v2 = vld [vmem:[%s4303_s25 + $0x18] sm:$0xff]  ;;  %v4307_v3 = vld [vmem:[%s4303_s25 + $0x10] sm:$0xff]  ;;  %v4310_v4 = vld [vmem:[%s4303_s25] sm:$0xff]  ;;  %p4165_p11 = scmp.ne.s32.totalorder %s6451_s4, %s4164_s8  ;;  %s4168_s16 = sshll.u32 %s4231_s14, 4  ;;  %s4169_s16 = int_to_ptr.vmem [resolvable:$false] %s4168_s16 }
  0x1c   : > { %254 = vperm.xlu1 %4083, %v149_v2   ;;  %v180_v5 = vadd.s32 512, %v4307_v3  ;;  %v4314_v6 = vld [vmem:[%s4303_s25 + $0x30] sm:$0xff]  ;;  %v178_v7 = vadd.s32 512, %v4310_v4  ;;  %v4319_v9 = vld [vmem:[%s4303_s25 + $0x8] sm:$0xff]  ;;  %v181_v16 = vadd.s32 512, %v149_v2  ;;  %v150_v23 = vld [vmem:[%s4303_s25 + $0x20] sm:$0xff]  ;;  %3497 = vmatpush3.bf16.msra.mxu1 %v4118_v21  ;;  %p4171_p0 = scmp.lt.s32.totalorder %s6451_s4, %s4169_s16 }
  0x1d   : > { %v184_v8 = vadd.s32 512, %v4314_v6  ;;  %v4322_v10 = vld [vmem:[%s4303_s25 + $0x50] sm:$0xff]  ;;  %v179_v11 = vadd.s32 512, %v4319_v9  ;;  %3593 = vmatpush3.bf16.msra.mxu0 %v4119_v22  ;;  %v151_v28 = vld [vmem:[%s4303_s25 + $0x28] sm:$0xff]  ;;  %v182_v29 = vadd.s32 512, %v150_v23  ;;  %3498 = vmatprep.subr.bf16.mxu1 %v4120_v26  ;;  %v153_v36 = vld [vmem:[%s4303_s25 + $0x38] sm:$0xff]  ;;  %p4166_p12 = pnand %p4165_p11, %p4287_p5 }
  0x1e   : > { %379 = vperm.xlu0 %4085, %v180_v5   ;;  %v188_v12 = vadd.s32 512, %v4322_v10  ;;  %v4328_v13 = vld [vmem:[%s4303_s25 + $0x70] sm:$0xff]  ;;  %3594 = vmatprep.subr.bf16.mxu0 %v4121_v27  ;;  %v183_v33 = vadd.s32 512, %v151_v28  ;;  %v185_v41 = vadd.s32 512, %v153_v36  ;;  %v154_v44 = vld [vmem:[%s4303_s25 + $0x40] sm:$0xff]  ;;  %v155_v46 = vld [vmem:[%s4303_s25 + $0x48] sm:$0xff] }
  0x1f   : > { %v4339_v17 = vld [vmem:[%s4303_s25 + $0x90] sm:$0xff]  ;;  %v192_v18 = vadd.s32 512, %v4328_v13  ;;  %v186_v45 = vadd.s32 512, %v154_v44  ;;  %v187_v47 = vadd.s32 512, %v155_v46  ;;  %v157_v48 = vld [vmem:[%s4303_s25 + $0x58] sm:$0xff]  ;;  %v159_v49 = vld [vmem:[%s4303_s25 + $0x68] sm:$0xff]  ;;  %p4167_p13 = pneg %p4166_p12 }
  0x20   : > { %4084 = vset.pattern.permute.xlu1 %v4229_v1  ;;  %v4343_v19 = vld [vmem:[%s4303_s25 + $0xb0] sm:$0xff]  ;;  %v196_v20 = vadd.s32 512, %v4339_v17  ;;  %3499 = vmatpush3.bf16.msra.mxu1 %v4120_v26  ;;  %v189_v50 = vadd.s32 512, %v157_v48  ;;  %v158_v51 = vld [vmem:[%s4303_s25 + $0x60] sm:$0xff]  ;;  %v163_v52 = vld [vmem:[%s4303_s25 + $0x88] sm:$0xff]  ;;  %v191_v55 = vadd.s32 512, %v159_v49 }
  0x21   : > { %373 = vperm.xlu1 %4084, %v178_v7   ;;  %v4356_v24 = vld [vmem:[%s4303_s25 + $0xd0] sm:$0xff]  ;;  %v200_v25 = vadd.s32 512, %v4343_v19  ;;  %3595 = vmatpush3.bf16.msra.mxu0 %v4121_v27  ;;  %v190_v54 = vadd.s32 512, %v158_v51  ;;  %v167_v56 = vld [vmem:[%s4303_s25 + $0xa8] sm:$0xff]  ;;  %v161_v57 = vld [vmem:[%s4303_s25 + $0x78] sm:$0xff]  ;;  %v195_v2 = vadd.s32 512, %v163_v52 }
  0x22   : > { %391 = vperm.xlu0 %4085, %v184_v8   ;;  %v204_v30 = vadd.s32 512, %v4356_v24  ;;  %3500 = vmatprep.subr.bf16.mxu1 %v4122_v31  ;;  %v171_v58 = vld [vmem:[%s4303_s25 + $0xc8] sm:$0xff]  ;;  %v193_v59 = vadd.s32 512, %v161_v57  ;;  %v162_v60 = vld [vmem:[%s4303_s25 + $0x80] sm:$0xff]  ;;  %v176_v63 = vld [vmem:[%s4303_s25 + $0xf0] sm:$0xff]  ;;  %v199_v8 = vadd.s32 512, %v167_v56 }
  0x23   : > { %3596 = vmatprep.subr.bf16.mxu0 %v4123_v32  ;;  %v4437_v61 = vld [vmem:[%s4303_s25 + $0xe8] sm:$0xff]  ;;  %v194_v62 = vadd.s32 512, %v162_v60  ;;  %s4170_s17 = scalar_lea.vmem %s4169_s16, 8192 }
  0x24   : > { %3501 = vmatpush3.bf16.msra.mxu1 %v4122_v31  ;;  %p4172_p1 = scmp.lt.s32.totalorder %s4170_s17, %s4164_s8 }
  0x25   : > { %376 = vperm.xlu1 %4084, %v179_v11   ;;  %3597 = vmatpush3.bf16.msra.mxu0 %v4123_v32  ;;  %v6594_v32 = vmov 0 }
  0x26   : > { %403 = vperm.xlu0 %4085, %v188_v12   ;;  %3502 = vmatprep.subr.bf16.mxu1 %v4124_v34  ;;  %p4173_p2 = por %p4172_p1, %p4171_p0 }
  0x27   : > { %3598 = vmatprep.subr.bf16.mxu0 %v4125_v35 }
  0x28   : > { %3503 = vmatpush3.bf16.msra.mxu1 %v4124_v34  ;;  %p4174_p3 = pnand %p4173_p2, %p4167_p13 }
  0x29   : > { %382 = vperm.xlu1 %4084, %v181_v16   ;;  %3599 = vmatpush3.bf16.msra.mxu0 %v4125_v35  ;;  %v173_v35 = vld [vmem:[%s4303_s25 + $0xd8] sm:$0xff] }
  0x2a   : > { %415 = vperm.xlu0 %4085, %v192_v18   ;;  %3504 = vmatprep.subr.bf16.mxu1 %v4126_v37  ;;  %v4467_v18 = vand.u32 127, %v210_v14  ;;  %v4144_v14 = vld [vmem:[%s6500_s1 + $0x60] sm:$0xff]  }
  0x2b   : > { %3600 = vmatprep.subr.bf16.mxu0 %v4127_v38 }
  0x2c   : > { %3505 = vmatpush3.bf16.msra.mxu1 %v4126_v37  ;;  %v4476_v22 = vadd.s32 384, %v4467_v18  ;;  %v4482_v26 = vadd.s32 512, %v4467_v18  ;;  %v205_v37 = vadd.s32 512, %v173_v35 }
  0x2d   : > { %4086 = vset.pattern.permute.xlu1 %v4228_v0  ;;  %3601 = vmatpush3.bf16.msra.mxu0 %v4127_v38 }
  0x2e   : > { %427 = vperm.xlu0 %4085, %v196_v20   ;;  %257 = vperm.xlu1 %4086, %v150_v23  }
  0x2f   : > { %3506 = vmatprep.subr.bf16.mxu1 %v4128_v39  ;;  %3602 = vmatprep.subr.bf16.mxu0 %v4129_v40 }
  0x30   : > { %3507 = vmatpush3.bf16.msra.mxu1 %v4128_v39 }
  0x31   : > { %3603 = vmatpush3.bf16.msra.mxu0 %v4129_v40  ;;  %3508 = vmatprep.subr.bf16.mxu1 %v4130_v42  ;;  %v6599_v40 = vmov 0 }
  0x32   : > { %439 = vperm.xlu0 %4085, %v200_v25   ;;  %4087 = vset.pattern.permute.xlu1 %v4229_v1 }
  0x33   : > { %385 = vperm.xlu1 %4087, %v182_v29   ;;  %3604 = vmatprep.subr.bf16.mxu0 %v4131_v43  ;;  %v6591_v29 = vmov 0 }
  0x34   : > { %3509 = vmatpush3.bf16.msra.mxu1 %v4130_v42  ;;  %v6603_v42 = vmov 0 }
  0x35   : > { %3605 = vmatpush3.bf16.msra.mxu0 %v4131_v43  ;;  %v4543_v43 = vadd.s32 256, %v4467_v18 }
  0x36   : > { %451 = vperm.xlu0 %4085, %v204_v30   ;;  %3638 = vmatprep.subr.bf16.mxu0 %v4423_v53 }
  0x37   : > { %388 = vperm.xlu1 %4087, %v183_v33   ;;  %v6596_v33 = vmov 0  ;;  %6605 = vst [vmem:[#allocation7_spill] sm:$0xff] %v4543_v43 }
  0x3a   : > { %4109 = vset.pattern.permute.xlu0 %v4228_v0 }
  0x3b   : > { %245 = vperm.xlu0 %4109, %v4310_v4   ;;  %4088 = vset.pattern.permute.xlu1 %v4228_v0  ;;  %v165_v4 = vld [vmem:[%s4303_s25 + $0x98] sm:$0xff] }
  0x3c   : > { %266 = vperm.xlu1 %4088, %v153_v36   ;;  %v197_v5 = vadd.s32 512, %v165_v4 }
  0x3f   : > { %248 = vperm.xlu0 %4109, %v4319_v9   ;;  %v169_v9 = vld [vmem:[%s4303_s25 + $0xb8] sm:$0xff] }
  0x40   : > { %4089 = vset.pattern.permute.xlu1 %v4229_v1  ;;  %v201_v12 = vadd.s32 512, %v169_v9 }
  0x41   : > { %394 = vperm.xlu1 %4089, %v185_v41   ;;  %v6601_v41 = vmov 0 }
  0x43   : > { %251 = vperm.xlu0 %4109, %v4307_v3   ;;  %v208_v3 = vadd.s32 512, %v176_v63 }
  0x45   : > { %4090 = vset.pattern.permute.xlu1 %v4228_v0 }
  0x46   : > { %269 = vperm.xlu1 %4090, %v154_v44  }
  0x47   : > { %260 = vperm.xlu0 %4109, %v151_v28   ;;  %v203_v28 = vadd.s32 512, %v171_v58 }
  0x4a   : > { %4091 = vset.pattern.permute.xlu1 %v4229_v1 }
  0x4b   : > { %263 = vperm.xlu0 %4109, %v4314_v6   ;;  %397 = vperm.xlu1 %4091, %v186_v45   ;;  %v166_v6 = vld [vmem:[%s4303_s25 + $0xa0] sm:$0xff] }
  0x4c   : > { %v198_v7 = vadd.s32 512, %v166_v6 }
  0x4f   : > { %272 = vperm.xlu0 %4109, %v155_v46   ;;  %400 = vperm.xlu1 %4091, %v187_v47   ;;  %v174_v46 = vld [vmem:[%s4303_s25 + $0xe0] sm:$0xff] }
  0x53   : > { %275 = vperm.xlu0 %4109, %v4322_v10   ;;  %4092 = vset.pattern.permute.xlu1 %v4228_v0  ;;  %v4454_v10 = vld [vmem:[%s6500_s1 + $0x40] sm:$0xff]  }
  0x54   : > { %278 = vperm.xlu1 %4092, %v157_v48   ;;  %3542 = vmatprep.subr.bf16.mxu1 %v4454_v10  ;;  %v4139_v48 = vld [vmem:[%s6500_s1 + $0xf8] sm:$0xff]  }
  0x57   : > { %284 = vperm.xlu0 %4109, %v159_v49  }
  0x58   : > { %4093 = vset.pattern.permute.xlu1 %v4229_v1 }
  0x59   : > { %406 = vperm.xlu1 %4093, %v189_v50   ;;  %v206_v50 = vadd.s32 512, %v174_v46 }
  0x5b   : > { %287 = vperm.xlu0 %4109, %v4328_v13  }
  0x5d   : > { %4094 = vset.pattern.permute.xlu1 %v4228_v0 }
  0x5e   : > { %281 = vperm.xlu1 %4094, %v158_v51  }
  0x5f   : > { %296 = vperm.xlu0 %4109, %v163_v52  }
  0x62   : > { %4095 = vset.pattern.permute.xlu1 %v4229_v1 }
  0x63   : > { %299 = vperm.xlu0 %4109, %v4339_v17   ;;  %409 = vperm.xlu1 %4095, %v190_v54   ;;  %v6616_v54 = vmov 0 }
  0x67   : > { %308 = vperm.xlu0 %4109, %v167_v56   ;;  %412 = vperm.xlu1 %4095, %v191_v55   ;;  %v4153_v56 = vld [vmem:[%s6500_s1 + $0x78] sm:$0xff]  }
  0x6b   : > { %311 = vperm.xlu0 %4109, %v4343_v19   ;;  %4096 = vset.pattern.permute.xlu1 %v4228_v0  ;;  %v170_v19 = vld [vmem:[%s4303_s25 + $0xc0] sm:$0xff] }
  0x6c   : > { %290 = vperm.xlu1 %4096, %v161_v57   ;;  %v202_v23 = vadd.s32 512, %v170_v19 }
  0x6f   : > { %320 = vperm.xlu0 %4109, %v171_v58   ;;  %v6513_v58 = vmov 1.0|1.0  }
  0x70   : > { %4097 = vset.pattern.permute.xlu1 %v4229_v1 }
  0x71   : > { %418 = vperm.xlu1 %4097, %v193_v59  }
  0x73   : > { %323 = vperm.xlu0 %4109, %v4356_v24   ;;  %v4479_v24 = vadd.s32 128, %v4467_v18 }
  0x75   : > { %4098 = vset.pattern.permute.xlu1 %v4228_v0 }
  0x76   : > { %293 = vperm.xlu1 %4098, %v162_v60   ;;  %v207_v60 = vadd.s32 512, %v4437_v61 }
  0x77   : > { %332 = vperm.xlu0 %4109, %v4437_v61   ;;  %v4141_v61 = vld [vmem:[%s6500_s1 + $0x48] sm:$0xff]  }
  0x7a   : > { %4099 = vset.pattern.permute.xlu1 %v4229_v1 }
  0x7b   : > { %421 = vperm.xlu1 %4099, %v194_v62   ;;  %335 = vperm.xlu0 %4109, %v176_v63  }
  0x7f   : > { %424 = vperm.xlu1 %4099, %v195_v2   ;;  %4114 = vset.pattern.permute.xlu0 %v4229_v1  ;;  %v4133_v2 = vld [vmem:[%s6500_s1 + $0xc8] sm:$0xff]  }
  0x80   : > { %463 = vperm.xlu0 %4114, %v208_v3   ;;  %v177_v3 = vld [vmem:[%s4303_s25 + $0xf8] sm:$0xff]  ;;  %s3373_s25 = sshll.u32 %s4270_s13, 12  ;;  %s6458_s13 = scalar_lea.sflag [#allocation3], %s135_s29 }
  0x81   : > { %s6449_s7 = scalar_lea.hbm %s6501_s2, %s3373_s25 }
  0x83   : > { %4100 = vset.pattern.permute.xlu1 %v4228_v0 }
  0x84   : > { %302 = vperm.xlu1 %4100, %v165_v4  }
  0x88   : > { %4101 = vset.pattern.permute.xlu1 %v4229_v1 }
  0x89   : > { %430 = vperm.xlu1 %4101, %v197_v5  }
  0x8d   : > { %4102 = vset.pattern.permute.xlu1 %v4228_v0 }
  0x8e   : > { %305 = vperm.xlu1 %4102, %v166_v6   ;;  %v4134_v6 = vld [vmem:[%s6500_s1 + $0xd0] sm:$0xff]  }
  0x92   : > { %4103 = vset.pattern.permute.xlu1 %v4229_v1 }
  0x93   : > { %433 = vperm.xlu1 %4103, %v198_v7   ;;  %v4142_v7 = vld [vmem:[%s6500_s1 + $0x50] sm:$0xff]  }
  0x97   : > { %436 = vperm.xlu1 %4103, %v199_v8  }
  0x9b   : > { %v4456_v11 = vpop.permute.xlu1 %254  ;;  %4104 = vset.pattern.permute.xlu1 %v4228_v0 }
  0x9c   : > { %314 = vperm.xlu1 %4104, %v169_v9   ;;  %vm1933_vm2 = vcmp.eq.s32.totalorder %v4476_v22, %v4456_v11  ;;  %vm937_vm4 = vcmp.eq.s32.totalorder %v4479_v24, %v4456_v11  ;;  %vm2431_vm6 = vcmp.eq.s32.totalorder %v4482_v26, %v4456_v11  ;;  %v4135_v9 = vld [vmem:[%s6500_s1 + $0xd8] sm:$0xff]  }
  0x9d   : > { %v4459_v13 = vpop.permute.xlu0 %379 }
  0xa0   : > { %4105 = vset.pattern.permute.xlu1 %v4229_v1  ;;  %v4463_v16 = vpop.permute.xlu1 %373 }
  0xa1   : > { %442 = vperm.xlu1 %4105, %v201_v12   ;;  %v4465_v17 = vpop.permute.xlu0 %391 }
  0xa4   : > { %v4470_v20 = vpop.permute.xlu1 %376 }
  0xa5   : > { %4106 = vset.pattern.permute.xlu1 %v4228_v0  ;;  %v4473_v21 = vpop.permute.xlu0 %403 }
  0xa6   : > { %317 = vperm.xlu1 %4106, %v170_v19  }
  0xa8   : > { %v383_v25 = vpop.permute.xlu1 %382 }
  0xa9   : > { %vm1965_vm0 = vcmp.eq.s32.totalorder %v4476_v22, %v383_v25  ;;  %v4485_v27 = vpop.permute.xlu0 %415  ;;  %vm969_vm1 = vcmp.eq.s32.totalorder %v4479_v24, %v383_v25  ;;  %vm2463_vm3 = vcmp.eq.s32.totalorder %v4482_v26, %v383_v25 }
  0xaa   : > { %4107 = vset.pattern.permute.xlu1 %v4229_v1  ;;  %vm4494_vm5 = vmor %vm1933_vm2, %vm1965_vm0  ;;  %vm471_vm2 = vcmp.eq.s32.totalorder %v4467_v18, %v383_v25 }
  0xab   : > { %445 = vperm.xlu1 %4107, %v202_v23   ;;  %v6592_v29 = vsel %vm4494_vm5, 4294967295, %v6591_v29  ;;  %vm4504_vm7 = vmor %vm937_vm4, %vm969_vm1  ;;  %vm1435_vm4 = vcmp.eq.s32.totalorder %v4543_v43, %v4456_v11  ;;  %vm1465_vm5 = vcmp.eq.s32.totalorder %v4543_v43, %v4470_v20  ;;  %v4137_v23 = vld [vmem:[%s6500_s1 + $0xe8] sm:$0xff]  }
  0xac   : > { %v6595_v32 = vsel %vm4504_vm7, 4294967295, %v6594_v32  ;;  %vm4508_vm8 = vmor %vm2431_vm6, %vm2463_vm3  ;;  %vm343_vm6 = vcmp.eq.s32.totalorder %v4467_v18, %v4456_v11 }
  0xad   : > { %v4500_v30 = vpop.permute.xlu1 %257  ;;  %v4502_v31 = vpop.permute.xlu0 %427  ;;  %v6597_v33 = vsel %vm4508_vm8, 4294967295, %v6596_v33 }
  0xae   : > { %6593 = vst [vmem:[#allocation5_spill] sm:$0xff] %v4502_v31  ;;  %vm1934_vm11 = vcmp.eq.s32.totalorder %v4476_v22, %v4500_v30  ;;  %vm938_vm14 = vcmp.eq.s32.totalorder %v4479_v24, %v4500_v30  ;;  %vm2432_vm0 = vcmp.eq.s32.totalorder %v4482_v26, %v4500_v30  ;;  %vm344_vm8 = vcmp.eq.s32.totalorder %v4467_v18, %v4500_v30 }
  0xaf   : > { %448 = vperm.xlu1 %4107, %v203_v28  }
  0xb1   : > { %v4512_v34 = vpop.permute.xlu0 %439 }
  0xb2   : > { %v386_v36 = vpop.permute.xlu1 %385 }
  0xb3   : > { %4108 = vset.pattern.permute.xlu1 %v4228_v0  ;;  %vm1966_vm9 = vcmp.eq.s32.totalorder %v4476_v22, %v386_v36  ;;  %vm970_vm10 = vcmp.eq.s32.totalorder %v4479_v24, %v386_v36  ;;  %vm2464_vm12 = vcmp.eq.s32.totalorder %v4482_v26, %v386_v36  ;;  %vm6618_vm7 = vcmp.eq.s32.totalorder %v4467_v18, %v386_v36 }
  0xb4   : > { %326 = vperm.xlu1 %4108, %v173_v35   ;;  %vm4525_vm13 = vmor %vm1934_vm11, %vm1966_vm9  ;;  %vm1467_vm9 = vcmp.eq.s32.totalorder %v4543_v43, %v383_v25  ;;  %v4146_v35 = vld [vmem:[%s6500_s1 + $0x108] sm:$0xff]  }
  0xb5   : > { %v4518_v38 = vpop.permute.xlu0 %451  ;;  %v6600_v40 = vsel %vm4525_vm13, 4294967295, %v6599_v40  ;;  %vm4531_vm15 = vmor %vm938_vm14, %vm970_vm10  ;;  %vm468_vm10 = vcmp.eq.s32.totalorder %v4467_v18, %v4463_v16 }
  0xb6   : > { %6598 = vst [vmem:[#allocation6_spill] sm:$0xff] %v4518_v38  ;;  %v4523_v39 = vpop.permute.xlu1 %388  ;;  %v6602_v41 = vsel %vm4531_vm15, 4294967295, %v6601_v41  ;;  %vm4538_vm1 = vmor %vm2432_vm0, %vm2464_vm12  ;;  %vm1464_vm0 = vcmp.eq.s32.totalorder %v4543_v43, %v4463_v16 }
  0xb7   : > { %v6604_v42 = vsel %vm4538_vm1, 4294967295, %v6603_v42  ;;  %vm4560_vm11 = vmor %vm343_vm6, %vm471_vm2  ;;  %vm469_vm6 = vcmp.eq.s32.totalorder %v4467_v18, %v4470_v20  ;;  %vm966_vm2 = vcmp.eq.s32.totalorder %v4479_v24, %v4463_v16 }
  0xb8   : > { %4110 = vset.pattern.permute.xlu1 %v4229_v1  ;;  %vm4587_vm12 = vmor %vm1435_vm4, %vm1467_vm9 }
  0xb9   : > { %454 = vperm.xlu1 %4110, %v205_v37   ;;  %vm4611_vm13 = vmor %vm344_vm8, %vm6618_vm7  ;;  %v4138_v37 = vld [vmem:[%s6500_s1 + $0xf0] sm:$0xff]  }
  0xba   : > { %v4546_v44 = vpop.permute.xlu0 %245 }
  0xbb   : > { %v4548_v45 = vpop.permute.xlu1 %266  ;;  %vm340_vm3 = vcmp.eq.s32.totalorder %v4467_v18, %v4546_v44  ;;  %vm6615_vm4 = vcmp.eq.s32.totalorder %v4479_v24, %v4546_v44 }
  0xbc   : > { %vm4567_vm14 = vmor %vm340_vm3, %vm468_vm10  ;;  %vm6610_vm3 = vcmp.eq.s32.totalorder %v4543_v43, %v4546_v44 }
  0xbd   : > { %4111 = vset.pattern.permute.xlu1 %v4228_v0  ;;  %vm4583_vm10 = vmor %vm6610_vm3, %vm1464_vm0  ;;  %vm1468_vm0 = vcmp.eq.s32.totalorder %v4543_v43, %v386_v36 }
  0xbe   : > { %v4576_v49 = vpop.permute.xlu0 %248  ;;  %329 = vperm.xlu1 %4111, %v174_v46   ;;  %vm4603_vm9 = vmor %vm6615_vm4, %vm966_vm2  ;;  %vm470_vm2 = vcmp.eq.s32.totalorder %v4467_v18, %v4459_v13  ;;  %vm1436_vm4 = vcmp.eq.s32.totalorder %v4543_v43, %v4500_v30  ;;  %v4147_v30 = vld [vmem:[%s6500_s1 + $0x68] sm:$0xff]   ;;  %v4150_v46 = vld [vmem:[%s6500_s1 + $0x70] sm:$0xff]  }
  0xbf   : > { %vm341_vm1 = vcmp.eq.s32.totalorder %v4467_v18, %v4576_v49  ;;  %v6617_v54 = vsel %vm4603_vm9, 4294967295, %v6616_v54  ;;  %vm6621_vm7 = vcmp.eq.s32.totalorder %v4543_v43, %v4576_v49  ;;  %vm1968_vm9 = vcmp.eq.s32.totalorder %v4476_v22, %v4465_v17 }
  0xc0   : > { %v4607_v55 = vpop.permute.xlu1 %394  ;;  %vm501_vm3 = vmor %vm341_vm1, %vm469_vm6 }
  0xc1   : > { %vm3048_vm15 = vmpackc.low %vm501_vm3, %vm4567_vm14 }
  0xc2   : > { %v4623_v57 = vpop.permute.xlu0 %251  ;;  %4112 = vset.pattern.permute.xlu1 %v4229_v1  ;;  %3510 = vmatprep.mubr.msk.bf16.mxu1 %vm3048_vm15, %v6513_v58  ;;  %vm1497_vm8 = vmor %vm6621_vm7, %vm1465_vm5  ;;  %vm1466_vm15 = vcmp.eq.s32.totalorder %v4543_v43, %v4459_v13 }
  0xc3   : > { %vm4630_vm1 = vmor %vm1436_vm4, %vm1468_vm0  ;;  %457 = vperm.xlu1 %4112, %v206_v50   ;;  %vm342_vm6 = vcmp.eq.s32.totalorder %v4467_v18, %v4623_v57  ;;  %vm1434_vm5 = vcmp.eq.s32.totalorder %v4543_v43, %v4623_v57 }
  0xc4   : > { %vm3192_vm14 = vmpackc.low %vm1497_vm8, %vm4583_vm10 }
  0xc5   : > { %3606 = vmatprep.mubr.msk.bf16.mxu0 %vm3192_vm14, %v6513_v58  ;;  %vm502_vm3 = vmor %vm342_vm6, %vm470_vm2  ;;  %v4647_v62 = vpop.permute.xlu1 %269  ;;  %vm474_vm6 = vcmp.eq.s32.totalorder %v4467_v18, %v4465_v17 }
  0xc6   : > { %vm3050_vm10 = vmpackc.low %vm4560_vm11, %vm502_vm3  ;;  %v4651_v63 = vpop.permute.xlu0 %260  ;;  %vm473_vm11 = vcmp.eq.s32.totalorder %v4467_v18, %v4523_v39  ;;  %vm475_vm3 = vcmp.eq.s32.totalorder %v4467_v18, %v4607_v55 }
  0xc7   : > { %3511 = vmatmul.mubr.msk.bf16.vlgmr.msra.gmra.mrb[0].mxu1 %vm3050_vm10, %v6513_v58  ;;  %vm1498_vm0 = vmor %vm1434_vm5, %vm1466_vm15  ;;  %460 = vperm.xlu1 %4112, %v207_v60   ;;  %vm345_vm4 = vcmp.eq.s32.totalorder %v4467_v18, %v4651_v63  ;;  %vm1437_vm7 = vcmp.eq.s32.totalorder %v4543_v43, %v4651_v63  ;;  %vm347_vm10 = vcmp.eq.s32.totalorder %v4467_v18, %v4548_v45  ;;  %v6632_v60 = vmov 0 }
  0xc8   : > { %vm3194_vm2 = vmpackc.low %vm4587_vm12, %vm1498_vm0  ;;  %3543 = vmatpush3.bf16.msra.mxu1 %v4454_v10  ;;  %vm1469_vm12 = vcmp.eq.s32.totalorder %v4543_v43, %v4523_v39  ;;  %v4143_v10 = vld [vmem:[%s6500_s1 + $0x58] sm:$0xff]  }
  0xc9   : > { %3607 = vmatmul.mubr.msk.bf16.vlgmr.msra.gmra.mrb[0].mxu0 %vm3194_vm2, %v6513_v58  ;;  %vm505_vm8 = vmor %vm345_vm4, %vm473_vm11  ;;  %3544 = vmatprep.subr.bf16.mxu1 %v4141_v61  ;;  %vm1471_vm11 = vcmp.eq.s32.totalorder %v4543_v43, %v4607_v55 }
  0xca   : > { %vm3052_vm14 = vmpackc.low %vm505_vm8, %vm4611_vm13  ;;  %3639 = vmatpush3.bf16.msra.mxu0 %v4423_v53  ;;  %v4675_v4 = vpop.permute.xlu0 %263  ;;  %v4678_v5 = vpop.permute.xlu1 %397  ;;  %vm1439_vm8 = vcmp.eq.s32.totalorder %v4543_v43, %v4548_v45 }
  0xcb   : > { %3514 = vmatprep.mubr.msk.bf16.mxu1 %vm3052_vm14, %v6513_v58  ;;  %vm1501_vm15 = vmor %vm1437_vm7, %vm1469_vm12  ;;  %3640 = vmatprep.subr.bf16.mxu0 %v4133_v2  ;;  %vm346_vm5 = vcmp.eq.s32.totalorder %v4467_v18, %v4675_v4  ;;  %vm1438_vm2 = vcmp.eq.s32.totalorder %v4543_v43, %v4675_v4  ;;  %vm476_vm12 = vcmp.eq.s32.totalorder %v4467_v18, %v4678_v5 }
  0xcc   : > { %vm3196_vm13 = vmpackc.low %vm1501_vm15, %vm4630_vm1  ;;  %4113 = vset.pattern.permute.xlu1 %v4228_v0  ;;  %vm1470_vm1 = vcmp.eq.s32.totalorder %v4543_v43, %v4465_v17  ;;  %v209_v0 = vadd.s32 512, %v177_v3  ;;  %3545 = vmatpush3.bf16.msra.mxu1 %v4141_v61  ;;  %v4845_v61 = vld [vmem:[%s6500_s1 + $0x100] sm:$0xff]  }
  0xcd   : > { %3610 = vmatprep.mubr.msk.bf16.mxu0 %vm3196_vm13, %v6513_v58  ;;  %338 = vperm.xlu1 %4113, %v177_v3   ;;  %vm506_vm0 = vmor %vm346_vm5, %vm474_vm6  ;;  %vm348_vm5 = vcmp.eq.s32.totalorder %v4467_v18, %v4647_v62 }
  0xce   : > { %vm507_vm4 = vmor %vm347_vm10, %vm475_vm3  ;;  %3641 = vmatpush3.bf16.msra.mxu0 %v4133_v2  ;;  %v4705_v53 = vpop.permute.xlu0 %272  ;;  %v4707_v8 = vpop.permute.xlu1 %400  ;;  %3546 = vmatprep.subr.bf16.mxu1 %v4142_v7 }
  0xcf   : > { %vm3054_vm7 = vmpackc.low %vm507_vm4, %vm506_vm0  ;;  %3642 = vmatprep.subr.bf16.mxu0 %v4134_v6  ;;  %vm349_vm15 = vcmp.eq.s32.totalorder %v4467_v18, %v4705_v53  ;;  %vm477_vm3 = vcmp.eq.s32.totalorder %v4467_v18, %v4707_v8  ;;  %vm1472_vm0 = vcmp.eq.s32.totalorder %v4543_v43, %v4678_v5  ;;  %vm1473_vm4 = vcmp.eq.s32.totalorder %v4543_v43, %v4707_v8 }
  0xd0   : > { %3515 = vmatmul.mubr.msk.bf16.gmra.mrb[4].mxu1 %vm3054_vm7, %v6513_v58  ;;  %vm1502_vm14 = vmor %vm1438_vm2, %vm1470_vm1  ;;  %vm1441_vm1 = vcmp.eq.s32.totalorder %v4543_v43, %v4705_v53  ;;  %vm1440_vm7 = vcmp.eq.s32.totalorder %v4543_v43, %v4647_v62 }
  0xd1   : > { %vm1503_vm6 = vmor %vm1439_vm8, %vm1471_vm11  ;;  %4115 = vset.pattern.permute.xlu1 %v4229_v1  ;;  %v4136_v1 = vld [vmem:[%s6500_s1 + $0xe0] sm:$0xff]   ;;  %3547 = vmatpush3.bf16.msra.mxu1 %v4142_v7 }
  0xd2   : > { %vm3198_vm13 = vmpackc.low %vm1503_vm6, %vm1502_vm14  ;;  %466 = vperm.xlu1 %4115, %v209_v0   ;;  %3643 = vmatpush3.bf16.msra.mxu0 %v4134_v6  ;;  %v4731_v11 = vpop.permute.xlu0 %275 }
  0xd3   : > { %3611 = vmatmul.mubr.msk.bf16.gmra.mrb[4].mxu0 %vm3198_vm13, %v6513_v58  ;;  %vm508_vm10 = vmor %vm348_vm5, %vm476_vm12  ;;  %3644 = vmatprep.subr.bf16.mxu0 %v4135_v9  ;;  %v4742_v12 = vpop.permute.xlu1 %278  ;;  %vm350_vm14 = vcmp.eq.s32.totalorder %v4467_v18, %v4731_v11  ;;  %vm478_vm12 = vcmp.eq.s32.totalorder %v4467_v18, %v4473_v21 }
  0xd4   : > { %vm509_vm2 = vmor %vm349_vm15, %vm477_vm3  ;;  %3548 = vmatprep.subr.bf16.mxu1 %v4143_v10  ;;  %vm1442_vm15 = vcmp.eq.s32.totalorder %v4543_v43, %v4731_v11  ;;  %vm1474_vm3 = vcmp.eq.s32.totalorder %v4543_v43, %v4473_v21 }
  0xd5   : > { %vm3056_vm11 = vmpackc.low %vm509_vm2, %vm508_vm10  ;;  %3549 = vmatpush3.bf16.msra.mxu1 %v4143_v10  ;;  %vm351_vm10 = vcmp.eq.s32.totalorder %v4467_v18, %v4742_v12 }
  0xd6   : > { %3518 = vmatprep.mubr.msk.bf16.mxu1 %vm3056_vm11, %v6513_v58  ;;  %vm1504_vm8 = vmor %vm1440_vm7, %vm1472_vm0  ;;  %3645 = vmatpush3.bf16.msra.mxu0 %v4135_v9  ;;  %v4754_v19 = vpop.permute.xlu0 %284  ;;  %vm1443_vm7 = vcmp.eq.s32.totalorder %v4543_v43, %v4742_v12 }
  0xd7   : > { %vm1505_vm6 = vmor %vm1441_vm1, %vm1473_vm4  ;;  %3646 = vmatprep.subr.bf16.mxu0 %v4136_v1  ;;  %3550 = vmatprep.subr.bf16.mxu1 %v4144_v14 }
  0xd8   : > { %vm3200_vm13 = vmpackc.low %vm1505_vm6, %vm1504_vm8  ;;  %v4764_v25 = vpop.permute.xlu1 %406  ;;  %vm1931_vm6 = vcmp.eq.s32.totalorder %v4476_v22, %v4576_v49 }
  0xd9   : > { %3614 = vmatprep.mubr.msk.bf16.mxu0 %vm3200_vm13, %v6513_v58  ;;  %vm4766_vm5 = vmor %vm350_vm14, %vm478_vm12  ;;  %vm479_vm0 = vcmp.eq.s32.totalorder %v4467_v18, %v4764_v25  ;;  %vm1475_vm2 = vcmp.eq.s32.totalorder %v4543_v43, %v4764_v25  ;;  %3551 = vmatpush3.bf16.msra.mxu1 %v4144_v14  ;;  %vm1930_vm14 = vcmp.eq.s32.totalorder %v4476_v22, %v4546_v44 }
  0xda   : > { %vm4779_vm1 = vmor %vm1442_vm15, %vm1474_vm3  ;;  %3647 = vmatpush3.bf16.msra.mxu0 %v4136_v1  ;;  %v4783_v36 = vpop.permute.xlu0 %287  ;;  %3552 = vmatprep.subr.bf16.mxu1 %v4147_v30  ;;  %vm1962_vm15 = vcmp.eq.s32.totalorder %v4476_v22, %v4463_v16  ;;  %vm1964_vm3 = vcmp.eq.s32.totalorder %v4476_v22, %v4459_v13  ;;  %vm1932_vm13 = vcmp.eq.s32.totalorder %v4476_v22, %v4623_v57 }
  0xdb   : > { %vm511_vm4 = vmor %vm351_vm10, %vm479_vm0  ;;  %3648 = vmatprep.subr.bf16.mxu0 %v4137_v23 }
  0xdc   : > { %vm3058_vm11 = vmpackc.low %vm511_vm4, %vm4766_vm5  ;;  %vm1963_vm5 = vcmp.eq.s32.totalorder %v4476_v22, %v4470_v20 }
  0xdd   : > { %3519 = vmatmul.mubr.msk.bf16.gmra.mrb[8].mxu1 %vm3058_vm11, %v6513_v58  ;;  %vm1507_vm8 = vmor %vm1443_vm7, %vm1475_vm2  ;;  %v4800_v47 = vpop.permute.xlu1 %281  ;;  %vm1969_vm11 = vcmp.eq.s32.totalorder %v4476_v22, %v4607_v55 }
  0xde   : > { %vm3202_vm12 = vmpackc.low %vm1507_vm8, %vm4779_vm1  ;;  %3649 = vmatpush3.bf16.msra.mxu0 %v4137_v23  ;;  %v4814_v50 = vpop.permute.xlu0 %296  ;;  %3553 = vmatpush3.bf16.msra.mxu1 %v4147_v30  ;;  %v4149_v23 = vld [vmem:[%s6500_s1 + $0x118] sm:$0xff]   ;;  %v4151_v30 = vld [vmem:[%s6500_s1 + $0x120] sm:$0xff]  }
  0xdf   : > { %3615 = vmatmul.mubr.msk.bf16.gmra.mrb[8].mxu0 %vm3202_vm12, %v6513_v58  ;;  %3650 = vmatprep.subr.bf16.mxu0 %v4138_v37  ;;  %vm4821_vm10 = vmor %vm1930_vm14, %vm1962_vm15  ;;  %vm352_vm14 = vcmp.eq.s32.totalorder %v4467_v18, %v4800_v47  ;;  %vm353_vm12 = vcmp.eq.s32.totalorder %v4467_v18, %v4754_v19  ;;  %vm1444_vm15 = vcmp.eq.s32.totalorder %v4543_v43, %v4800_v47 }
  0xe0   : > { %vm4825_vm0 = vmor %vm1931_vm6, %vm1963_vm5  ;;  %3554 = vmatprep.subr.bf16.mxu1 %v4150_v46 }
  0xe1   : > { %vm4838_vm1 = vmor %vm1932_vm13, %vm1964_vm3  ;;  %vm1445_vm13 = vcmp.eq.s32.totalorder %v4543_v43, %v4754_v19 }
  0xe2   : > { %3651 = vmatpush3.bf16.msra.mxu0 %v4138_v37  ;;  %v4836_v59 = vpop.permute.xlu1 %409  ;;  %v6633_v60 = vsel %vm4838_vm1, 4294967295, %v6632_v60  ;;  %3555 = vmatpush3.bf16.msra.mxu1 %v4150_v46  ;;  %v4855_v2 = vpop.permute.xlu0 %299 }
  0xe3   : > { %3652 = vmatprep.subr.bf16.mxu0 %v4139_v48  ;;  %vm480_vm4 = vcmp.eq.s32.totalorder %v4467_v18, %v4836_v59  ;;  %vm1476_vm8 = vcmp.eq.s32.totalorder %v4543_v43, %v4836_v59  ;;  %3556 = vmatprep.subr.bf16.mxu1 %v4153_v56 }
  0xe4   : > { %vm512_vm6 = vmor %vm352_vm14, %vm480_vm4  ;;  %vm1936_vm14 = vcmp.eq.s32.totalorder %v4476_v22, %v4675_v4 }
  0xe5   : > { %vm1508_vm7 = vmor %vm1444_vm15, %vm1476_vm8  ;;  %vm482_vm15 = vcmp.eq.s32.totalorder %v4467_v18, %v4485_v27 }
  0xe6   : > { %3653 = vmatpush3.bf16.msra.mxu0 %v4139_v48  ;;  %v4861_v3 = vpop.permute.xlu1 %412  ;;  %3557 = vmatpush3.bf16.msra.mxu1 %v4153_v56  ;;  %v4880_v6 = vpop.permute.xlu0 %308  ;;  %v6678_v48 = vmov 0 }
  0xe7   : > { %3686 = vmatprep.subr.bf16.mxu0 %v4845_v61  ;;  %vm481_vm3 = vcmp.eq.s32.totalorder %v4467_v18, %v4861_v3  ;;  %vm1477_vm5 = vcmp.eq.s32.totalorder %v4543_v43, %v4861_v3  ;;  %3734 = vmatprep.subr.bf16.mxu1 %v4336_v15  ;;  %v6635_v15 = vmov 0 }
  0xe8   : > { %vm513_vm2 = vmor %vm353_vm12, %vm481_vm3 }
  0xe9   : > { %vm3060_vm4 = vmpackc.low %vm513_vm2, %vm512_vm6  ;;  %vm1937_vm2 = vcmp.eq.s32.totalorder %v4476_v22, %v4548_v45  ;;  %vm354_vm6 = vcmp.eq.s32.totalorder %v4467_v18, %v4783_v36 }
  0xea   : > { %3522 = vmatprep.mubr.msk.bf16.mxu1 %vm3060_vm4, %v6513_v58  ;;  %vm1509_vm1 = vmor %vm1445_vm13, %vm1477_vm5  ;;  %v4909_v10 = vpop.permute.xlu0 %311 }
  0xeb   : > { %vm3204_vm8 = vmpackc.low %vm1509_vm1, %vm1508_vm7  ;;  %v4882_v7 = vpop.permute.xlu1 %290  ;;  %vm1446_vm1 = vcmp.eq.s32.totalorder %v4543_v43, %v4783_v36  ;;  %vm1478_vm7 = vcmp.eq.s32.totalorder %v4543_v43, %v4485_v27 }
  0xec   : > { %3618 = vmatprep.mubr.msk.bf16.mxu0 %vm3204_vm8, %v6513_v58  ;;  %vm4887_vm12 = vmor %vm1936_vm14, %vm1968_vm9  ;;  %vm1447_vm9 = vcmp.eq.s32.totalorder %v4543_v43, %v4882_v7 }
  0xed   : > { %v6636_v15 = vsel %vm4887_vm12, 4294967295, %v6635_v15  ;;  %vm4895_vm3 = vmor %vm1937_vm2, %vm1969_vm11  ;;  %vm355_vm11 = vcmp.eq.s32.totalorder %v4467_v18, %v4882_v7  ;;  %vm1935_vm12 = vcmp.eq.s32.totalorder %v4476_v22, %v4651_v63 }
  0xee   : > { %vm514_vm13 = vmor %vm354_vm6, %vm482_vm15  ;;  %v4925_v14 = vpop.permute.xlu0 %320 }
  0xef   : > { %vm1510_vm14 = vmor %vm1446_vm1, %vm1478_vm7  ;;  %vm1967_vm7 = vcmp.eq.s32.totalorder %v4476_v22, %v4523_v39 }
  0xf0   : > { %v4907_v9 = vpop.permute.xlu1 %418  ;;  %vm6640_vm1 = vmpackc.low %vm4825_vm0, %vm4821_vm10  ;;  %vm1940_vm0 = vcmp.eq.s32.totalorder %v4476_v22, %v4731_v11 }
  0xf1   : > { %vm483_vm5 = vcmp.eq.s32.totalorder %v4467_v18, %v4907_v9  ;;  %vm1479_vm4 = vcmp.eq.s32.totalorder %v4543_v43, %v4907_v9 }
  0xf2   : > { %vm515_vm8 = vmor %vm355_vm11, %vm483_vm5  ;;  %vm1970_vm5 = vcmp.eq.s32.totalorder %v4476_v22, %v4678_v5  ;;  %v4966_v37 = vpop.permute.xlu0 %323 }
  0xf3   : > { %vm3062_vm2 = vmpackc.low %vm515_vm8, %vm514_vm13  ;;  %vm1971_vm13 = vcmp.eq.s32.totalorder %v4476_v22, %v4707_v8 }
  0xf4   : > { %3523 = vmatmul.mubr.msk.bf16.gmra.mrb[12].mxu1 %vm3062_vm2, %v6513_v58  ;;  %vm1511_vm6 = vmor %vm1447_vm9, %vm1479_vm4  ;;  %vm1939_vm9 = vcmp.eq.s32.totalorder %v4476_v22, %v4705_v53  ;;  %vm1972_vm4 = vcmp.eq.s32.totalorder %v4476_v22, %v4473_v21  ;;  %vm1938_vm2 = vcmp.eq.s32.totalorder %v4476_v22, %v4647_v62 }
  0xf5   : > { %vm3206_vm15 = vmpackc.low %vm1511_vm6, %vm1510_vm14  ;;  %v4920_v1 = vpop.permute.xlu1 %293  ;;  %vm357_vm6 = vcmp.eq.s32.totalorder %v4467_v18, %v4814_v50 }
  0xf6   : > { %6639 = vst [vmem:[#allocation8_spill] sm:$0xff] %v4920_v1  ;;  %3619 = vmatmul.mubr.msk.bf16.gmra.mrb[12].mxu0 %vm3206_vm15, %v6513_v58  ;;  %vm4939_vm11 = vmor %vm1935_vm12, %vm1967_vm7  ;;  %vm6645_vm12 = vnez %v6600_v40  ;;  %vm6649_vm7 = vnez %v6633_v60  ;;  %v5005_v51 = vpop.permute.xlu0 %332  ;;  %v4152_v60 = vld [vmem:[%s6500_s1 + $0x128] sm:$0xff]   ;;  %v6709_v40 = vmov 0 }
  0xf7   : > { %3654 = vmatprep.mubr.msk.bf16.mxu0 %vm6640_vm1, %v6513_v58  ;;  %vm4947_vm10 = vmor %vm1939_vm9, %vm1971_vm13  ;;  %vm6648_vm1 = vnez %v6592_v29  ;;  %vm356_vm13 = vcmp.eq.s32.totalorder %v4467_v18, %v4920_v1  ;;  %v4148_v29 = vld [vmem:[%s6500_s1 + $0x110] sm:$0xff]  }
  0xf8   : > { %vm3268_vm14 = vmpackc.low %vm4939_vm11, %vm6645_vm12 }
  0xf9   : > { %vm4970_vm15 = vmor %vm1938_vm2, %vm1970_vm5 }
  0xfa   : > { %v4943_v28 = vpop.permute.xlu1 %421  ;;  %vm6650_vm9 = vmpackc.low %vm6648_vm1, %vm6649_vm7  ;;  %vm1973_vm1 = vcmp.eq.s32.totalorder %v4476_v22, %v4764_v25 }
  0xfb   : > { %vm484_vm8 = vcmp.eq.s32.totalorder %v4467_v18, %v4943_v28  ;;  %vm3272_vm11 = vmpackc.low %vm4947_vm10, %vm4970_vm15 }
  0xfc   : > { %vm4988_vm5 = vmor %vm1940_vm0, %vm1972_vm4  ;;  %vm486_vm0 = vcmp.eq.s32.totalorder %v4467_v18, %v4502_v31 }
  0xfd   : > { %vm516_vm2 = vmor %vm356_vm13, %vm484_vm8  ;;  %vm1943_vm8 = vcmp.eq.s32.totalorder %v4476_v22, %v4754_v19 }
  0xfe   : > { %3655 = vmatmul.mubr.msk.bf16.vlgmr.msra.gmra.mrb[0].mxu0 %vm6650_vm9, %v6513_v58  ;;  %v4980_v46 = vpop.permute.xlu1 %424  ;;  %vm358_vm9 = vcmp.eq.s32.totalorder %v4467_v18, %v4855_v2 }
  0xff   : > { %3658 = vmatprep.mubr.msk.bf16.mxu0 %vm3268_vm14, %v6513_v58  ;;  %vm485_vm12 = vcmp.eq.s32.totalorder %v4467_v18, %v4980_v46  ;;  %3687 = vmatpush3.bf16.msra.mxu0 %v4845_v61  ;;  %vm1941_vm14 = vcmp.eq.s32.totalorder %v4476_v22, %v4742_v12  ;;  %v4154_v61 = vld [vmem:[%s6500_s1 + $0x130] sm:$0xff]  }
 0x100   : > { %vm517_vm7 = vmor %vm357_vm6, %vm485_vm12  ;;  %3688 = vmatprep.subr.bf16.mxu0 %v4146_v35  ;;  %vm1975_vm6 = vcmp.eq.s32.totalorder %v4476_v22, %v4861_v3 }
 0x101   : > { %vm3064_vm4 = vmpackc.low %vm517_vm7, %vm516_vm2  ;;  %vm1974_vm2 = vcmp.eq.s32.totalorder %v4476_v22, %v4836_v59 }
 0x102   : > { %3526 = vmatprep.mubr.msk.bf16.mxu1 %vm3064_vm4, %v6513_v58  ;;  %vm5014_vm13 = vmor %vm1941_vm14, %vm1973_vm1  ;;  %vm6660_vm4 = vnez %v6636_v15  ;;  %vm1979_vm1 = vcmp.eq.s32.totalorder %v4476_v22, %v4980_v46  ;;  %v5061_v15 = vpop.permute.xlu0 %335 }
 0x103   : > { %v5018_v56 = vpop.permute.xlu1 %302  ;;  %vm5020_vm12 = vmor %vm358_vm9, %vm486_vm0  ;;  %3689 = vmatpush3.bf16.msra.mxu0 %v4146_v35  ;;  %vm1942_vm9 = vcmp.eq.s32.totalorder %v4476_v22, %v4800_v47  ;;  %vm1977_vm0 = vcmp.eq.s32.totalorder %v4476_v22, %v4907_v9  ;;  %v6662_v35 = vmov 0  ;;  %6664 = vst [vmem:[#allocation10_spill] sm:$0xff] %v5061_v15 }
 0x104   : > { %6655 = vst [vmem:[#allocation9_spill] sm:$0xff] %v5018_v56  ;;  %vm5026_vm7 = vmor %vm1943_vm8, %vm1975_vm6  ;;  %3690 = vmatprep.subr.bf16.mxu0 %v4148_v29  ;;  %vm1947_vm6 = vcmp.eq.s32.totalorder %v4476_v22, %v4814_v50  ;;  %vm359_vm10 = vcmp.eq.s32.totalorder %v4467_v18, %v5018_v56 }
 0x105   : > { %vm6661_vm14 = vmpackc.low %vm4895_vm3, %vm6660_vm4 }
 0x106   : > { %3659 = vmatmul.mubr.msk.bf16.gmra.mrb[4].mxu0 %vm6661_vm14, %v6513_v58  ;;  %vm5047_vm8 = vmor %vm1942_vm9, %vm1974_vm2  ;;  %vm1945_vm2 = vcmp.eq.s32.totalorder %v4476_v22, %v4882_v7 }
 0x107   : > { %v6663_v35 = vsel %vm5047_vm8, 4294967295, %v6662_v35  ;;  %3662 = vmatprep.mubr.msk.bf16.mxu0 %vm3272_vm11, %v6513_v58  ;;  %3691 = vmatpush3.bf16.msra.mxu0 %v4148_v29  ;;  %vm5071_vm9 = vmor %vm1945_vm2, %vm1977_vm0  ;;  %vm1944_vm11 = vcmp.eq.s32.totalorder %v4476_v22, %v4783_v36  ;;  %vm1976_vm0 = vcmp.eq.s32.totalorder %v4476_v22, %v4485_v27  ;;  %vm1978_vm2 = vcmp.eq.s32.totalorder %v4476_v22, %v4943_v28 }
 0x108   : > { %v5069_v0 = vpop.permute.xlu1 %430  ;;  %3692 = vmatprep.subr.bf16.mxu0 %v4149_v23  ;;  %vm5089_vm4 = vmor %vm1947_vm6, %vm1979_vm1  ;;  %vm1946_vm1 = vcmp.eq.s32.totalorder %v4476_v22, %v4920_v1  ;;  %vm1948_vm6 = vcmp.eq.s32.totalorder %v4476_v22, %v4855_v2  ;;  %v6731_v1 = vmov 0 }
 0x109   : > { %vm487_vm15 = vcmp.eq.s32.totalorder %v4467_v18, %v5069_v0  ;;  %vm5098_vm8 = vmor %vm1944_vm11, %vm1976_vm0 }
 0x10a   : > { %vm519_vm14 = vmor %vm359_vm10, %vm487_vm15  ;;  %vm1980_vm10 = vcmp.eq.s32.totalorder %v4476_v22, %v4502_v31  ;;  %vm1981_vm15 = vcmp.eq.s32.totalorder %v4476_v22, %v5069_v0  ;;  %v6674_v31 = vmov 1.0|1.0  }
 0x10b   : > { %vm3066_vm3 = vmpackc.low %vm519_vm14, %vm5020_vm12  ;;  %3693 = vmatpush3.bf16.msra.mxu0 %v4149_v23  ;;  %v5111_v23 = vpop.permute.xlu0 %463  ;;  %vm935_vm14 = vcmp.eq.s32.totalorder %v4479_v24, %v4576_v49  ;;  %vm1949_vm12 = vcmp.eq.s32.totalorder %v4476_v22, %v5018_v56  ;;  %v6701_v56 = vmov 0 }
 0x10c   : > { %3527 = vmatmul.mubr.msk.bf16.gmra.mrb[16].mxu1 %vm3066_vm3, %v6513_v58  ;;  %3694 = vmatprep.subr.bf16.mxu0 %v4151_v30  ;;  %vm5119_vm3 = vmor %vm1946_vm1, %vm1978_vm2  ;;  %vm6676_vm2 = vnez %v6663_v35  ;;  %v6682_v35 = vmov 0 }
 0x10d   : > { %v5113_v58 = vpop.permute.xlu1 %305  ;;  %vm6675_vm11 = vmpackc.low %vm5014_vm13, %vm4988_vm5 }
 0x10e   : > { %6671 = vst [vmem:[#allocation11_spill] sm:$0xff] %v5113_v58  ;;  %3663 = vmatmul.mubr.msk.bf16.gmra.mrb[8].mxu0 %vm6675_vm11, %v6674_v31  ;;  %vm6677_vm1 = vmpackc.low %vm5026_vm7, %vm6676_vm2  ;;  %vm967_vm7 = vcmp.eq.s32.totalorder %v4479_v24, %v4470_v20  ;;  %vm360_vm13 = vcmp.eq.s32.totalorder %v4467_v18, %v5113_v58 }
 0x10f   : > { %3666 = vmatprep.mubr.msk.bf16.mxu0 %vm6677_vm1, %v6674_v31  ;;  %vm5145_vm5 = vmor %vm1948_vm6, %vm1980_vm10  ;;  %3695 = vmatpush3.bf16.msra.mxu0 %v4151_v30  ;;  %vm2428_vm6 = vcmp.eq.s32.totalorder %v4482_v26, %v4546_v44  ;;  %vm2460_vm1 = vcmp.eq.s32.totalorder %v4482_v26, %v4463_v16  ;;  %v6685_v44 = vmov 0  ;;  %v4155_v16 = vld [vmem:[%s6500_s1 + $0x138] sm:$0xff]  }
 0x110   : > { %v6679_v48 = vsel %vm5145_vm5, 4294967295, %v6678_v48  ;;  %vm5151_vm11 = vmor %vm1949_vm12, %vm1981_vm15  ;;  %3696 = vmatprep.subr.bf16.mxu0 %v4152_v60  ;;  %vm1950_vm12 = vcmp.eq.s32.totalorder %v4476_v22, %v5113_v58  ;;  %vm1952_vm5 = vcmp.eq.s32.totalorder %v4476_v22, %v4909_v10 }
 0x111   : > { %vm5164_vm2 = vmor %vm935_vm14, %vm967_vm7  ;;  %vm2429_vm7 = vcmp.eq.s32.totalorder %v4482_v26, %v4576_v49 }
 0x112   : > { %v6683_v35 = vsel %vm5164_vm2, 4294967295, %v6682_v35  ;;  %v5168_v30 = vpop.permute.xlu1 %433  ;;  %vm5184_vm0 = vmor %vm2428_vm6, %vm2460_vm1  ;;  %vm2461_vm1 = vcmp.eq.s32.totalorder %v4482_v26, %v4470_v20  ;;  %vm361_vm6 = vcmp.eq.s32.totalorder %v4467_v18, %v4880_v6  ;;  %v6692_v20 = vmov 0 }
 0x113   : > { %vm488_vm10 = vcmp.eq.s32.totalorder %v4467_v18, %v5168_v30  ;;  %vm1982_vm14 = vcmp.eq.s32.totalorder %v4476_v22, %v5168_v30  ;;  %3697 = vmatpush3.bf16.msra.mxu0 %v4152_v60  ;;  %v6686_v44 = vsel %vm5184_vm0, 4294967295, %v6685_v44  ;;  %vm6691_vm2 = vmpackc.low %vm5071_vm9, %vm5098_vm8 }
 0x114   : > { %vm5188_vm15 = vmor %vm360_vm13, %vm488_vm10  ;;  %3698 = vmatprep.subr.bf16.mxu0 %v4154_v61  ;;  %vm362_vm13 = vcmp.eq.s32.totalorder %v4467_v18, %v4909_v10 }
 0x115   : > { %vm5205_vm10 = vmor %vm1950_vm12, %vm1982_vm14  ;;  %vm1951_vm12 = vcmp.eq.s32.totalorder %v4476_v22, %v4880_v6 }
 0x116   : > { %3667 = vmatmul.mubr.msk.bf16.gmra.mrb[12].mxu0 %vm6691_vm2, %v6674_v31  ;;  %v5217_v58 = vpop.permute.xlu1 %436  ;;  %vm5226_vm14 = vmor %vm2429_vm7, %vm2461_vm1  ;;  %vm1984_vm7 = vcmp.eq.s32.totalorder %v4476_v22, %v4512_v34 }
 0x117   : > { %v6693_v20 = vsel %vm5226_vm14, 4294967295, %v6692_v20  ;;  %vm6694_vm8 = vmpackc.low %vm5089_vm4, %vm5119_vm3  ;;  %vm489_vm9 = vcmp.eq.s32.totalorder %v4467_v18, %v5217_v58  ;;  %vm1983_vm2 = vcmp.eq.s32.totalorder %v4476_v22, %v5217_v58  ;;  %3699 = vmatpush3.bf16.msra.mxu0 %v4154_v61  ;;  %vm936_vm3 = vcmp.eq.s32.totalorder %v4479_v24, %v4623_v57 }
 0x118   : > { %3670 = vmatprep.mubr.msk.bf16.mxu0 %vm6694_vm8, %v6674_v31  ;;  %vm521_vm4 = vmor %vm361_vm6, %vm489_vm9  ;;  %3700 = vmatprep.subr.bf16.mxu0 %v4155_v16  ;;  %vm6695_vm6 = vcmp.eq.s32.totalorder %v4467_v18, %v4512_v34 }
 0x119   : > { %vm3068_vm8 = vmpackc.low %vm521_vm4, %vm5188_vm15  ;;  %vm2462_vm15 = vcmp.eq.s32.totalorder %v4482_v26, %v4459_v13  ;;  %vm2430_vm4 = vcmp.eq.s32.totalorder %v4482_v26, %v4623_v57 }
 0x11a   : > { %3530 = vmatprep.mubr.msk.bf16.mxu1 %vm3068_vm8, %v6674_v31  ;;  %vm2015_vm1 = vmor %vm1951_vm12, %vm1983_vm2  ;;  %vm974_vm8 = vcmp.eq.s32.totalorder %v4479_v24, %v4678_v5 }
 0x11b   : > { %vm5262_vm9 = vmor %vm362_vm13, %vm6695_vm6  ;;  %v5270_v49 = vpop.permute.xlu1 %314  ;;  %3701 = vmatpush3.bf16.msra.mxu0 %v4155_v16  ;;  %vm6700_vm13 = vcmp.eq.s32.totalorder %v4479_v24, %v4459_v13  ;;  %v6706_v13 = vmov 0  ;;  %vm971_vm6 = vcmp.eq.s32.totalorder %v4479_v24, %v4523_v39 }
 0x11c   : > { %vm3284_vm0 = vmpackc.low %vm2015_vm1, %vm5205_vm10  ;;  %vm939_vm10 = vcmp.eq.s32.totalorder %v4479_v24, %v4651_v63 }
 0x11d   : > { %vm5274_vm12 = vmor %vm1952_vm5, %vm1984_vm7  ;;  %vm6704_vm5 = vnez %v6679_v48  ;;  %v6717_v48 = vmov 0 }
 0x11e   : > { %vm5281_vm2 = vmor %vm936_vm3, %vm6700_vm13  ;;  %vm2433_vm13 = vcmp.eq.s32.totalorder %v4482_v26, %v4651_v63  ;;  %v6712_v63 = vmov 0 }
 0x11f   : > { %v6702_v56 = vsel %vm5281_vm2, 4294967295, %v6701_v56  ;;  %vm6705_vm7 = vmpackc.low %vm5151_vm11, %vm6704_vm5  ;;  %vm363_vm11 = vcmp.eq.s32.totalorder %v4467_v18, %v5270_v49 }
 0x120   : > { %3671 = vmatmul.mubr.msk.bf16.gmra.mrb[16].mxu0 %vm6705_vm7, %v6674_v31  ;;  %vm5297_vm1 = vmor %vm2430_vm4, %vm2462_vm15  ;;  %v5308_v57 = vpop.permute.xlu1 %442  ;;  %vm494_vm4 = vcmp.eq.s32.totalorder %v4467_v18, %v4518_v38 }
 0x121   : > { %v6707_v13 = vsel %vm5297_vm1, 4294967295, %v6706_v13  ;;  %3674 = vmatprep.mubr.msk.bf16.mxu0 %vm3284_vm0, %v6674_v31  ;;  %vm5310_vm2 = vmor %vm939_vm10, %vm971_vm6  ;;  %vm491_vm0 = vcmp.eq.s32.totalorder %v4467_v18, %v5308_v57  ;;  %vm1985_vm15 = vcmp.eq.s32.totalorder %v4476_v22, %v5308_v57  ;;  %vm1953_vm10 = vcmp.eq.s32.totalorder %v4476_v22, %v5270_v49 }
 0x122   : > { %v6710_v40 = vsel %vm5310_vm2, 4294967295, %v6709_v40  ;;  %vm523_vm7 = vmor %vm363_vm11, %vm491_vm0  ;;  %vm2465_vm11 = vcmp.eq.s32.totalorder %v4482_v26, %v4523_v39  ;;  %vm972_vm0 = vcmp.eq.s32.totalorder %v4479_v24, %v4465_v17  ;;  %v6715_v39 = vmov 0 }
 0x123   : > { %vm3070_vm6 = vmpackc.low %vm523_vm7, %vm5262_vm9  ;;  %vm940_vm9 = vcmp.eq.s32.totalorder %v4479_v24, %v4675_v4  ;;  %vm1956_vm2 = vcmp.eq.s32.totalorder %v4476_v22, %v4966_v37 }
 0x124   : > { %3531 = vmatmul.mubr.msk.bf16.gmra.mrb[20].mxu1 %vm3070_vm6, %v6674_v31  ;;  %vm2017_vm1 = vmor %vm1953_vm10, %vm1985_vm15  ;;  %vm941_vm6 = vcmp.eq.s32.totalorder %v4479_v24, %v4548_v45 }
 0x125   : > { %vm3286_vm3 = vmpackc.low %vm2017_vm1, %vm5274_vm12  ;;  %v5333_v29 = vpop.permute.xlu1 %317  ;;  %vm973_vm12 = vcmp.eq.s32.totalorder %v4479_v24, %v4607_v55 }
 0x126   : > { %vm5342_vm7 = vmor %vm2433_vm13, %vm2465_vm11  ;;  %vm2466_vm13 = vcmp.eq.s32.totalorder %v4482_v26, %v4465_v17  ;;  %v6719_v17 = vmov 0 }
 0x127   : > { %v6713_v63 = vsel %vm5342_vm7, 4294967295, %v6712_v63  ;;  %vm5354_vm10 = vmor %vm940_vm9, %vm972_vm0  ;;  %vm364_vm0 = vcmp.eq.s32.totalorder %v4467_v18, %v5333_v29  ;;  %vm1954_vm9 = vcmp.eq.s32.totalorder %v4476_v22, %v5333_v29  ;;  %vm1955_vm7 = vcmp.eq.s32.totalorder %v4476_v22, %v4925_v14 }
 0x128   : > { %3675 = vmatmul.mubr.msk.bf16.gmra.mrb[20].mxu0 %vm3286_vm3, %v6674_v31  ;;  %v6716_v39 = vsel %vm5354_vm10, 4294967295, %v6715_v39  ;;  %vm2434_vm3 = vcmp.eq.s32.totalorder %v4482_v26, %v4675_v4  ;;  %vm5362_vm11 = vmor %vm941_vm6, %vm973_vm12  ;;  %vm2467_vm12 = vcmp.eq.s32.totalorder %v4482_v26, %v4607_v55  ;;  %v6725_v55 = vmov 0 }
 0x129   : > { %v6718_v48 = vsel %vm5362_vm11, 4294967295, %v6717_v48  ;;  %vm5380_vm6 = vmor %vm2434_vm3, %vm2466_vm13  ;;  %vm2435_vm11 = vcmp.eq.s32.totalorder %v4482_v26, %v4548_v45  ;;  %v6733_v4 = vmov 0  ;;  %v6747_v45 = vmov 0 }
 0x12a   : > { %v5366_v52 = vpop.permute.xlu1 %445  ;;  %v6720_v17 = vsel %vm5380_vm6, 4294967295, %v6719_v17  ;;  %vm5398_vm3 = vmor %vm2435_vm11, %vm2467_vm12  ;;  %vm976_vm6 = vcmp.eq.s32.totalorder %v4479_v24, %v4473_v21 }
 0x12b   : > { %vm492_vm15 = vcmp.eq.s32.totalorder %v4467_v18, %v5366_v52  ;;  %vm1986_vm5 = vcmp.eq.s32.totalorder %v4476_v22, %v5366_v52  ;;  %v6726_v55 = vsel %vm5398_vm3, 4294967295, %v6725_v55 }
 0x12c   : > { %vm5384_vm1 = vmor %vm364_vm0, %vm492_vm15  ;;  %vm365_vm15 = vcmp.eq.s32.totalorder %v4467_v18, %v4925_v14 }
 0x12d   : > { %vm5390_vm10 = vmor %vm1954_vm9, %vm1986_vm5  ;;  %vm366_vm9 = vcmp.eq.s32.totalorder %v4467_v18, %v4966_v37 }
 0x12e   : > { %v5396_v16 = vpop.permute.xlu1 %448  ;;  %vm5425_vm11 = vmor %vm366_vm9, %vm494_vm4  ;;  %vm942_vm4 = vcmp.eq.s32.totalorder %v4479_v24, %v4647_v62  ;;  %vm2437_vm9 = vcmp.eq.s32.totalorder %v4482_v26, %v4705_v53 }
 0x12f   : > { %vm493_vm13 = vcmp.eq.s32.totalorder %v4467_v18, %v5396_v16  ;;  %vm1987_vm5 = vcmp.eq.s32.totalorder %v4476_v22, %v5396_v16 }
 0x130   : > { %vm525_vm0 = vmor %vm365_vm15, %vm493_vm13  ;;  %vm975_vm15 = vcmp.eq.s32.totalorder %v4479_v24, %v4707_v8 }
 0x131   : > { %vm3072_vm12 = vmpackc.low %vm525_vm0, %vm5384_vm1  ;;  %vm943_vm1 = vcmp.eq.s32.totalorder %v4479_v24, %v4705_v53  ;;  %vm1988_vm0 = vcmp.eq.s32.totalorder %v4476_v22, %v4518_v38  ;;  %v6737_v38 = vmov 0  ;;  %v6740_v53 = vmov 0 }
 0x132   : > { %3534 = vmatprep.mubr.msk.bf16.mxu1 %vm3072_vm12, %v6674_v31  ;;  %vm2019_vm14 = vmor %vm1955_vm7, %vm1987_vm5  ;;  %vm2436_vm12 = vcmp.eq.s32.totalorder %v4482_v26, %v4647_v62 }
 0x133   : > { %vm3288_vm13 = vmpackc.low %vm2019_vm14, %vm5390_vm10  ;;  %v5435_v60 = vpop.permute.xlu1 %326  ;;  %vm2468_vm14 = vcmp.eq.s32.totalorder %v4482_v26, %v4678_v5  ;;  %v6735_v5 = vmov 0 }
 0x134   : > { %3678 = vmatprep.mubr.msk.bf16.mxu0 %vm3288_vm13, %v6674_v31  ;;  %vm5442_vm7 = vmor %vm1956_vm2, %vm1988_vm0  ;;  %vm2469_vm2 = vcmp.eq.s32.totalorder %v4482_v26, %v4707_v8  ;;  %v6742_v8 = vmov 0 }
 0x135   : > { %vm5446_vm5 = vmor %vm942_vm4, %vm974_vm8  ;;  %vm944_vm8 = vcmp.eq.s32.totalorder %v4479_v24, %v4731_v11 }
 0x136   : > { %v6732_v1 = vsel %vm5446_vm5, 4294967295, %v6731_v1  ;;  %vm5452_vm10 = vmor %vm943_vm1, %vm975_vm15  ;;  %vm367_vm15 = vcmp.eq.s32.totalorder %v4467_v18, %v5435_v60  ;;  %vm977_vm5 = vcmp.eq.s32.totalorder %v4479_v24, %v4764_v25 }
 0x137   : > { %v6734_v4 = vsel %vm5452_vm10, 4294967295, %v6733_v4  ;;  %vm5466_vm13 = vmor %vm2436_vm12, %vm2468_vm14  ;;  %vm979_vm14 = vcmp.eq.s32.totalorder %v4479_v24, %v4861_v3  ;;  %vm1992_vm10 = vcmp.eq.s32.totalorder %v4476_v22, %v5111_v23 }
 0x138   : > { %v6736_v5 = vsel %vm5466_vm13, 4294967295, %v6735_v5  ;;  %v5470_v61 = vpop.permute.xlu1 %454  ;;  %vm5472_vm1 = vmor %vm2437_vm9, %vm2469_vm2  ;;  %vm1957_vm2 = vcmp.eq.s32.totalorder %v4476_v22, %v5435_v60  ;;  %vm1959_vm13 = vcmp.eq.s32.totalorder %v4476_v22, %v5005_v51 }
 0x139   : > { %v6738_v38 = vsel %vm5472_vm1, 4294967295, %v6737_v38  ;;  %vm495_vm0 = vcmp.eq.s32.totalorder %v4467_v18, %v5470_v61  ;;  %vm1989_vm4 = vcmp.eq.s32.totalorder %v4476_v22, %v5470_v61  ;;  %vm1960_vm1 = vcmp.eq.s32.totalorder %v4476_v22, %v5061_v15 }
 0x13a   : > { %vm527_vm12 = vmor %vm367_vm15, %vm495_vm0 }
 0x13b   : > { %vm3074_vm9 = vmpackc.low %vm527_vm12, %vm5425_vm11  ;;  %vm945_vm11 = vcmp.eq.s32.totalorder %v4479_v24, %v4742_v12  ;;  %vm2470_vm12 = vcmp.eq.s32.totalorder %v4482_v26, %v4473_v21 }
 0x13c   : > { %3535 = vmatmul.mubr.msk.bf16.gmra.mrb[24].mxu1 %vm3074_vm9, %v6674_v31  ;;  %vm2021_vm3 = vmor %vm1957_vm2, %vm1989_vm4  ;;  %vm2438_vm4 = vcmp.eq.s32.totalorder %v4482_v26, %v4731_v11  ;;  %v6744_v11 = vmov 0 }
 0x13d   : > { %vm3290_vm15 = vmpackc.low %vm2021_vm3, %vm5442_vm7  ;;  %v5499_v62 = vpop.permute.xlu1 %329  ;;  %vm2471_vm3 = vcmp.eq.s32.totalorder %v4482_v26, %v4764_v25  ;;  %vm2439_vm7 = vcmp.eq.s32.totalorder %v4482_v26, %v4742_v12  ;;  %v6875_v25 = vmov 0 }
 0x13e   : > { %6739 = vst [vmem:[#allocation12_spill] sm:$0xff] %v5499_v62  ;;  %3679 = vmatmul.mubr.msk.bf16.gmra.mrb[24].mxu0 %vm3290_vm15, %v6674_v31  ;;  %vm5504_vm0 = vmor %vm944_vm8, %vm976_vm6  ;;  %vm368_vm2 = vcmp.eq.s32.totalorder %v4467_v18, %v5499_v62  ;;  %vm947_vm6 = vcmp.eq.s32.totalorder %v4479_v24, %v4754_v19 }
 0x13f   : > { %v6741_v53 = vsel %vm5504_vm0, 4294967295, %v6740_v53  ;;  %vm5512_vm9 = vmor %vm945_vm11, %vm977_vm5 }
 0x140   : > { %v6743_v8 = vsel %vm5512_vm9, 4294967295, %v6742_v8  ;;  %vm5524_vm8 = vmor %vm2438_vm4, %vm2470_vm12  ;;  %vm978_vm12 = vcmp.eq.s32.totalorder %v4479_v24, %v4836_v59  ;;  %vm946_vm4 = vcmp.eq.s32.totalorder %v4479_v24, %v4800_v47 }
 0x141   : > { %v6745_v11 = vsel %vm5524_vm8, 4294967295, %v6744_v11  ;;  %vm5530_vm5 = vmor %vm2439_vm7, %vm2471_vm3  ;;  %vm1958_vm7 = vcmp.eq.s32.totalorder %v4476_v22, %v5499_v62  ;;  %v6754_v62 = vmov 0 }
 0x142   : > { %v5528_v21 = vpop.permute.xlu1 %457  ;;  %v6748_v45 = vsel %vm5530_vm5, 4294967295, %v6747_v45  ;;  %vm498_vm5 = vcmp.eq.s32.totalorder %v4467_v18, %v5111_v23  ;;  %vm5578_vm9 = vmor %vm947_vm6, %vm979_vm14  ;;  %vm2472_vm6 = vcmp.eq.s32.totalorder %v4482_v26, %v4836_v59  ;;  %v6765_v59 = vmov 0 }
 0x143   : > { %6746 = vst [vmem:[#allocation13_spill] sm:$0xff] %v5528_v21  ;;  %vm496_vm15 = vcmp.eq.s32.totalorder %v4467_v18, %v5528_v21  ;;  %vm1990_vm11 = vcmp.eq.s32.totalorder %v4476_v22, %v5528_v21  ;;  %v6860_v21 = vmov 0 }
 0x144   : > { %vm5546_vm3 = vmor %vm368_vm2, %vm496_vm15  ;;  %vm369_vm2 = vcmp.eq.s32.totalorder %v4467_v18, %v5005_v51 }
 0x145   : > { %vm5556_vm0 = vmor %vm1958_vm7, %vm1990_vm11  ;;  %vm370_vm7 = vcmp.eq.s32.totalorder %v4467_v18, %v5061_v15  ;;  %v6798_v15 = vmov 0 }
 0x146   : > { %v5562_v43 = vpop.permute.xlu1 %460  ;;  %vm5566_vm15 = vmor %vm946_vm4, %vm978_vm12 }
 0x147   : > { %6753 = vst [vmem:[#allocation14_spill] sm:$0xff] %v5562_v43  ;;  %v6755_v62 = vsel %vm5566_vm15, 4294967295, %v6754_v62  ;;  %vm497_vm8 = vcmp.eq.s32.totalorder %v4467_v18, %v5562_v43  ;;  %vm1991_vm11 = vcmp.eq.s32.totalorder %v4476_v22, %v5562_v43  ;;  %vm5591_vm14 = vmor %vm370_vm7, %vm498_vm5  ;;  %vm949_vm7 = vcmp.eq.s32.totalorder %v4479_v24, %v4882_v7  ;;  %v4163_v43 = vld [vmem:[%s6500_s1 + $0xb8] sm:$0xff]  }
 0x148   : > { %vm529_vm4 = vmor %vm369_vm2, %vm497_vm8  ;;  %vm2473_vm2 = vcmp.eq.s32.totalorder %v4482_v26, %v4861_v3  ;;  %v6873_v3 = vmov 0 }
 0x149   : > { %vm3076_vm12 = vmpackc.low %vm529_vm4, %vm5546_vm3  ;;  %vm2441_vm3 = vcmp.eq.s32.totalorder %v4482_v26, %v4754_v19  ;;  %v6763_v19 = vmov 0 }
 0x14a   : > { %3538 = vmatprep.mubr.msk.bf16.mxu1 %vm3076_vm12, %v6674_v31  ;;  %vm2023_vm15 = vmor %vm1959_vm13, %vm1991_vm11 }
 0x14b   : > { %vm3292_vm8 = vmpackc.low %vm2023_vm15, %vm5556_vm0  ;;  %vm2440_vm0 = vcmp.eq.s32.totalorder %v4482_v26, %v4800_v47 }
 0x14c   : > { %v5599_v12 = vpop.permute.xlu1 %338  ;;  %3682 = vmatprep.mubr.msk.bf16.mxu0 %vm3292_vm8, %v6674_v31  ;;  %vm5606_vm13 = vmor %vm1960_vm1, %vm1992_vm10  ;;  %vm948_vm10 = vcmp.eq.s32.totalorder %v4479_v24, %v4783_v36  ;;  %vm980_vm1 = vcmp.eq.s32.totalorder %v4479_v24, %v4485_v27  ;;  %vm981_vm8 = vcmp.eq.s32.totalorder %v4479_v24, %v4907_v9 }
 0x14d   : > { %vm5620_vm4 = vmor %vm2440_vm0, %vm2472_vm6  ;;  %vm371_vm0 = vcmp.eq.s32.totalorder %v4467_v18, %v5599_v12 }
 0x14e   : > { %v6764_v19 = vsel %vm5620_vm4, 4294967295, %v6763_v19  ;;  %vm5628_vm12 = vmor %vm2441_vm3, %vm2473_vm2  ;;  %vm2477_vm4 = vcmp.eq.s32.totalorder %v4482_v26, %v4980_v46 }
 0x14f   : > { %v6766_v59 = vsel %vm5628_vm12, 4294967295, %v6765_v59  ;;  %vm5644_vm3 = vmor %vm948_vm10, %vm980_vm1  ;;  %vm1961_vm12 = vcmp.eq.s32.totalorder %v4476_v22, %v5599_v12 }
 0x150   : > { %vm5652_vm11 = vmor %vm949_vm7, %vm981_vm8  ;;  %vm2442_vm7 = vcmp.eq.s32.totalorder %v4482_v26, %v4783_v36  ;;  %vm2474_vm8 = vcmp.eq.s32.totalorder %v4482_v26, %v4485_v27  ;;  %v6781_v27 = vld [vmem:[#allocation8_spill] sm:$0xff]  ;;  %v6784_v36 = vmov 0 }
 0x151   : > { %v5638_v47 = vpop.permute.xlu1 %466 }
 0x152   : > { %vm499_vm2 = vcmp.eq.s32.totalorder %v4467_v18, %v5638_v47  ;;  %vm1993_vm15 = vcmp.eq.s32.totalorder %v4476_v22, %v5638_v47  ;;  %v6777_v18 = vmov 0  ;;  %v6779_v22 = vmov 0 }
 0x153   : > { %vm531_vm10 = vmor %vm371_vm0, %vm499_vm2  ;;  %vm6771_vm0 = vnez %v6683_v35  ;;  %v6804_v35 = vmov 0 }
 0x154   : > { %vm3078_vm1 = vmpackc.low %vm531_vm10, %vm5591_vm14  ;;  %vm6772_vm14 = vnez %v6617_v54  ;;  %vm2475_vm10 = vcmp.eq.s32.totalorder %v4482_v26, %v4907_v9  ;;  %v6782_v54 = vmov 0  ;;  %v6794_v9 = vld [vmem:[#allocation5_spill] sm:$0xff] }
 0x155   : > { %3539 = vmatmul.mubr.msk.bf16.gmra.mrb[28].mxu1 %vm3078_vm1, %v6674_v31  ;;  %vm2025_vm5 = vmor %vm1961_vm12, %vm1993_vm15  ;;  %vm2443_vm1 = vcmp.eq.s32.totalorder %v4482_v26, %v4882_v7  ;;  %v4156_v7 = vld [vmem:[%s6500_s1 + $0x80] sm:$0xff]   ;;  %vm6789_vm15 = vnez %v6710_v40  ;;  %v4159_v40 = vld [vmem:[%s6500_s1 + $0x98] sm:$0xff]  }
 0x156   : > { %vm3294_vm6 = vmpackc.low %vm2025_vm5, %vm5606_vm13  ;;  %vm6774_vm13 = vnez %v6693_v20  ;;  %vm6775_vm5 = vnez %v6686_v44  ;;  %v4158_v44 = vld [vmem:[%s6500_s1 + $0x90] sm:$0xff]   ;;  %v6808_v20 = vmov 0 }
 0x157   : > { %vm6773_vm2 = vmpackc.low %vm6771_vm0, %vm6772_vm14  ;;  %3683 = vmatmul.mubr.msk.bf16.gmra.mrb[28].mxu0 %vm3294_vm6, %v6674_v31  ;;  %vm982_vm6 = vcmp.eq.s32.totalorder %v4479_v24, %v4943_v28 }
 0x158   : > { %3558 = vmatprep.mubr.msk.bf16.mxu1 %vm6773_vm2, %v6674_v31  ;;  %vm6776_vm12 = vmpackc.low %vm6774_vm13, %vm6775_vm5  ;;  %vm951_vm2 = vcmp.eq.s32.totalorder %v4479_v24, %v4814_v50  ;;  %vm983_vm13 = vcmp.eq.s32.totalorder %v4479_v24, %v4980_v46 }
 0x159   : > { %3702 = vmatprep.mubr.msk.bf16.mxu0 %vm6776_vm12, %v6674_v31  ;;  %vm5692_vm0 = vmor %vm2442_vm7, %vm2474_vm8  ;;  %vm950_vm8 = vcmp.eq.s32.totalorder %v4479_v24, %v6781_v27  ;;  %vm6786_vm7 = vnez %v6595_v32  ;;  %v6792_v32 = vmov 0 }
 0x15a   : > { %v6778_v18 = vsel %vm5692_vm0, 4294967295, %v6777_v18  ;;  %vm5698_vm14 = vmor %vm2443_vm1, %vm2475_vm10  ;;  %vm2476_vm10 = vcmp.eq.s32.totalorder %v4482_v26, %v4943_v28  ;;  %vm2445_vm1 = vcmp.eq.s32.totalorder %v4482_v26, %v4814_v50  ;;  %vm6790_vm0 = vnez %v6602_v41  ;;  %v4157_v41 = vld [vmem:[%s6500_s1 + $0x88] sm:$0xff]  }
 0x15b   : > { %v6780_v22 = vsel %vm5698_vm14, 4294967295, %v6779_v22  ;;  %vm5712_vm5 = vmor %vm950_vm8, %vm982_vm6  ;;  %vm6787_vm6 = vnez %v6702_v56  ;;  %vm6795_vm14 = vnez %v6597_v33  ;;  %v6803_v33 = vld [vmem:[#allocation9_spill] sm:$0xff]  ;;  %v6813_v56 = vmov 0 }
 0x15c   : > { %v6783_v54 = vsel %vm5712_vm5, 4294967295, %v6782_v54  ;;  %vm5718_vm12 = vmor %vm951_vm2, %vm983_vm13  ;;  %vm2444_vm13 = vcmp.eq.s32.totalorder %v4482_v26, %v6781_v27  ;;  %vm984_vm2 = vcmp.eq.s32.totalorder %v4479_v24, %v6794_v9  ;;  %vm6796_vm5 = vnez %v6707_v13  ;;  %v6818_v13 = vld [vmem:[#allocation11_spill] sm:$0xff] }
 0x15d   : > { %v6785_v36 = vsel %vm5718_vm12, 4294967295, %v6784_v36  ;;  %vm6788_vm8 = vmpackc.low %vm6786_vm7, %vm6787_vm6 }
 0x15e   : > { %3559 = vmatmul.mubr.msk.bf16.vlgmr.msra.gmra.mrb[0].mxu1 %vm6788_vm8, %v6674_v31  ;;  %vm6791_vm7 = vmpackc.low %vm6789_vm15, %vm6790_vm0  ;;  %vm952_vm8 = vcmp.eq.s32.totalorder %v4479_v24, %v4855_v2  ;;  %vm985_vm0 = vcmp.eq.s32.totalorder %v4479_v24, %v5069_v0 }
 0x15f   : > { %3742 = vmatpush3.bf16.msra.mxu1 %v4156_v7  ;;  %3562 = vmatprep.mubr.msk.bf16.mxu1 %vm6791_vm7, %v6674_v31  ;;  %vm5747_vm6 = vmor %vm2444_vm13, %vm2476_vm10  ;;  %vm6800_vm10 = vnez %v6713_v63  ;;  %vm6801_vm13 = vnez %v6604_v42  ;;  %v6822_v63 = vmov 0  ;;  %v6905_v42 = vmov 0 }
 0x160   : > { %v6793_v32 = vsel %vm5747_vm6, 4294967295, %v6792_v32  ;;  %vm6797_vm12 = vmpackc.low %vm6795_vm14, %vm6796_vm5  ;;  %3735 = vmatprep.subr.bf16.mxu1 %v4157_v41  ;;  %vm6811_vm14 = vnez %v6716_v39  ;;  %v6827_v39 = vmov 0 }
 0x161   : > { %3703 = vmatmul.mubr.msk.bf16.vlgmr.msra.gmra.mrb[0].mxu0 %vm6797_vm12, %v6674_v31  ;;  %vm5764_vm15 = vmor %vm2445_vm1, %vm2477_vm4  ;;  %vm953_vm4 = vcmp.eq.s32.totalorder %v4479_v24, %v6803_v33  ;;  %vm2446_vm12 = vcmp.eq.s32.totalorder %v4482_v26, %v4855_v2  ;;  %vm2478_vm1 = vcmp.eq.s32.totalorder %v4482_v26, %v6794_v9 }
 0x162   : > { %v6799_v15 = vsel %vm5764_vm15, 4294967295, %v6798_v15  ;;  %vm6802_vm7 = vmpackc.low %vm6800_vm10, %vm6801_vm13  ;;  %vm2479_vm13 = vcmp.eq.s32.totalorder %v4482_v26, %v5069_v0 }
 0x163   : > { %3706 = vmatprep.mubr.msk.bf16.mxu0 %vm6802_vm7, %v6674_v31  ;;  %vm5782_vm5 = vmor %vm952_vm8, %vm984_vm2  ;;  %3743 = vmatpush3.bf16.msra.mxu1 %v4157_v41  ;;  %vm2447_vm8 = vcmp.eq.s32.totalorder %v4482_v26, %v6803_v33  ;;  %vm986_vm7 = vcmp.eq.s32.totalorder %v4479_v24, %v5168_v30  ;;  %vm6816_vm2 = vnez %v6732_v1 }
 0x164   : > { %v6805_v35 = vsel %vm5782_vm5, 4294967295, %v6804_v35  ;;  %vm5790_vm10 = vmor %vm953_vm4, %vm985_vm0  ;;  %3736 = vmatprep.subr.bf16.mxu1 %v4158_v44  ;;  %vm6810_vm4 = vnez %v6718_v48  ;;  %v4160_v48 = vld [vmem:[%s6500_s1 + $0xa0] sm:$0xff]  }
 0x165   : > { %vm5805_vm0 = vmor %vm2446_vm12, %vm2478_vm1  ;;  %vm987_vm12 = vcmp.eq.s32.totalorder %v4479_v24, %v5217_v58  ;;  %vm6815_vm1 = vnez %v6734_v4  ;;  %v4161_v4 = vld [vmem:[%s6500_s1 + $0xa8] sm:$0xff]  }
 0x166   : > { %v6809_v20 = vsel %vm5805_vm0, 4294967295, %v6808_v20  ;;  %vm6812_vm6 = vmpackc.low %vm6810_vm4, %vm6811_vm14  ;;  %vm954_vm14 = vcmp.eq.s32.totalorder %v4479_v24, %v6818_v13  ;;  %vm2448_vm0 = vcmp.eq.s32.totalorder %v4482_v26, %v6818_v13 }
 0x167   : > { %3563 = vmatmul.mubr.msk.bf16.gmra.mrb[4].mxu1 %vm6812_vm6, %v6674_v31  ;;  %vm5817_vm15 = vmor %vm2447_vm8, %vm2479_vm13  ;;  %vm6819_vm13 = vnez %v6726_v55  ;;  %vm6820_vm8 = vnez %v6720_v17  ;;  %vm6824_vm6 = vnez %v6738_v38  ;;  %v6829_v38 = vmov 0 }
 0x168   : > { %v6814_v56 = vsel %vm5817_vm15, 4294967295, %v6813_v56  ;;  %vm6817_vm5 = vmpackc.low %vm6815_vm1, %vm6816_vm2  ;;  %3744 = vmatpush3.bf16.msra.mxu1 %v4158_v44  ;;  %vm2480_vm1 = vcmp.eq.s32.totalorder %v4482_v26, %v5168_v30  ;;  %v6831_v17 = vmov 0  ;;  %vm6834_vm15 = vnez %v6741_v53 }
 0x169   : > { %3566 = vmatprep.mubr.msk.bf16.mxu1 %vm6817_vm5, %v6674_v31  ;;  %vm6821_vm4 = vmpackc.low %vm6819_vm13, %vm6820_vm8  ;;  %3737 = vmatprep.subr.bf16.mxu1 %v4159_v40  ;;  %vm955_vm5 = vcmp.eq.s32.totalorder %v4479_v24, %v4880_v6  ;;  %vm6825_vm13 = vnez %v6736_v5  ;;  %v6848_v5 = vmov 0  ;;  %v6852_v53 = vmov 0 }
 0x16a   : > { %3707 = vmatmul.mubr.msk.bf16.gmra.mrb[4].mxu0 %vm6821_vm4, %v6674_v31  ;;  %vm5846_vm2 = vmor %vm954_vm14, %vm986_vm7  ;;  %vm2481_vm7 = vcmp.eq.s32.totalorder %v4482_v26, %v5217_v58  ;;  %vm6833_vm14 = vnez %v6743_v8  ;;  %v4162_v8 = vld [vmem:[%s6500_s1 + $0xb0] sm:$0xff]   ;;  %v6911_v44 = vmov 0 }
 0x16b   : > { %v6823_v63 = vsel %vm5846_vm2, 4294967295, %v6822_v63  ;;  %vm6826_vm8 = vmpackc.low %vm6824_vm6, %vm6825_vm13  ;;  %vm2449_vm6 = vcmp.eq.s32.totalorder %v4482_v26, %v4880_v6 }
 0x16c   : > { %3710 = vmatprep.mubr.msk.bf16.mxu0 %vm6826_vm8, %v6674_v31  ;;  %vm5858_vm4 = vmor %vm955_vm5, %vm987_vm12  ;;  %3745 = vmatpush3.bf16.msra.mxu1 %v4159_v40  ;;  %vm956_vm12 = vcmp.eq.s32.totalorder %v4479_v24, %v4909_v10  ;;  %vm988_vm5 = vcmp.eq.s32.totalorder %v4479_v24, %v4512_v34 }
 0x16d   : > { %v6828_v39 = vsel %vm5858_vm4, 4294967295, %v6827_v39  ;;  %vm5872_vm13 = vmor %vm2448_vm0, %vm2480_vm1  ;;  %3738 = vmatprep.subr.bf16.mxu1 %v4160_v48  ;;  %vm989_vm0 = vcmp.eq.s32.totalorder %v4479_v24, %v5308_v57  ;;  %vm2450_vm4 = vcmp.eq.s32.totalorder %v4482_v26, %v4909_v10  ;;  %vm2482_vm1 = vcmp.eq.s32.totalorder %v4482_v26, %v4512_v34 }
 0x16e   : > { %v6830_v38 = vsel %vm5872_vm13, 4294967295, %v6829_v38  ;;  %vm5883_vm8 = vmor %vm2449_vm6, %vm2481_vm7  ;;  %vm957_vm7 = vcmp.eq.s32.totalorder %v4479_v24, %v5270_v49  ;;  %vm6838_vm13 = vnez %v6755_v62  ;;  %v6850_v62 = vmov 0 }
 0x16f   : > { %v6832_v17 = vsel %vm5883_vm8, 4294967295, %v6831_v17  ;;  %vm6835_vm2 = vmpackc.low %vm6833_vm14, %vm6834_vm15  ;;  %vm2483_vm14 = vcmp.eq.s32.totalorder %v4482_v26, %v5308_v57 }
 0x170   : > { %3567 = vmatmul.mubr.msk.bf16.gmra.mrb[8].mxu1 %vm6835_vm2, %v6674_v31  ;;  %vm5901_vm6 = vmor %vm956_vm12, %vm988_vm5  ;;  %vm6842_vm12 = vnez %v6748_v45  ;;  %vm6843_vm5 = vnez %v6745_v11  ;;  %v6865_v45 = vmov 0 }
 0x171   : > { %vm6839_vm15 = vmpackc.low %vm5578_vm9, %vm6838_vm13  ;;  %3746 = vmatpush3.bf16.msra.mxu1 %v4160_v48  ;;  %vm6845_vm13 = vnez %v6766_v59  ;;  %vm991_vm9 = vcmp.eq.s32.totalorder %v4479_v24, %v5396_v16  ;;  %v6871_v59 = vmov 0 }
 0x172   : > { %3570 = vmatprep.mubr.msk.bf16.mxu1 %vm6839_vm15, %v6674_v31  ;;  %vm5915_vm2 = vmor %vm957_vm7, %vm989_vm0  ;;  %3739 = vmatprep.subr.bf16.mxu1 %v4161_v4  ;;  %vm6846_vm0 = vnez %v6764_v19  ;;  %v6870_v19 = vld [vmem:[#allocation6_spill] sm:$0xff] }
 0x173   : > { %vm6844_vm8 = vmpackc.low %vm6842_vm12, %vm6843_vm5  ;;  %vm990_vm12 = vcmp.eq.s32.totalorder %v4479_v24, %v5366_v52 }
 0x174   : > { %3711 = vmatmul.mubr.msk.bf16.gmra.mrb[8].mxu0 %vm6844_vm8, %v6674_v31  ;;  %vm6847_vm7 = vmpackc.low %vm6845_vm13, %vm6846_vm0  ;;  %vm2451_vm8 = vcmp.eq.s32.totalorder %v4482_v26, %v5270_v49  ;;  %vm6858_vm13 = vnez %v6783_v54  ;;  %v6882_v54 = vld [vmem:[#allocation14_spill] sm:$0xff] }
 0x175   : > { %3714 = vmatprep.mubr.msk.bf16.mxu0 %vm6847_vm7, %v6674_v31  ;;  %vm5942_vm15 = vmor %vm2450_vm4, %vm2482_vm1  ;;  %3747 = vmatpush3.bf16.msra.mxu1 %v4161_v4  ;;  %vm958_vm4 = vcmp.eq.s32.totalorder %v4479_v24, %v5333_v29  ;;  %vm959_vm1 = vcmp.eq.s32.totalorder %v4479_v24, %v4925_v14 }
 0x176   : > { %v6849_v5 = vsel %vm5942_vm15, 4294967295, %v6848_v5  ;;  %vm5948_vm5 = vmor %vm2451_vm8, %vm2483_vm14  ;;  %vm2484_vm14 = vcmp.eq.s32.totalorder %v4482_v26, %v5366_v52  ;;  %3740 = vmatprep.subr.bf16.mxu1 %v4162_v8  ;;  %vm2485_vm8 = vcmp.eq.s32.totalorder %v4482_v26, %v5396_v16 }
 0x177   : > { %v6851_v62 = vsel %vm5948_vm5, 4294967295, %v6850_v62  ;;  %vm5962_vm0 = vmor %vm958_vm4, %vm990_vm12  ;;  %vm2453_vm5 = vcmp.eq.s32.totalorder %v4482_v26, %v4925_v14  ;;  %vm6863_vm4 = vnez %v6778_v18  ;;  %v6877_v18 = vld [vmem:[#allocation13_spill] sm:$0xff] }
 0x178   : > { %v6853_v53 = vsel %vm5962_vm0, 4294967295, %v6852_v53  ;;  %vm5971_vm7 = vmor %vm959_vm1, %vm991_vm9  ;;  %vm2452_vm9 = vcmp.eq.s32.totalorder %v4482_v26, %v5333_v29  ;;  %vm6857_vm1 = vnez %v6785_v36  ;;  %v6886_v36 = vld [vmem:[#allocation12_spill] sm:$0xff] }
 0x179   : > { %vm6856_vm12 = vmpackc.low %vm5652_vm11, %vm5644_vm3  ;;  %vm960_vm3 = vcmp.eq.s32.totalorder %v4479_v24, %v4966_v37  ;;  %3748 = vmatpush3.bf16.msra.mxu1 %v4162_v8 }
 0x17a   : > { %3571 = vmatmul.mubr.msk.bf16.gmra.mrb[12].mxu1 %vm6856_vm12, %v6674_v31  ;;  %vm6859_vm15 = vmpackc.low %vm6857_vm1, %vm6858_vm13  ;;  %vm6862_vm12 = vnez %v6780_v22  ;;  %3741 = vmatprep.subr.bf16.mxu1 %v4163_v43  ;;  %v6880_v22 = vmov 0 }
 0x17b   : > { %3574 = vmatprep.mubr.msk.bf16.mxu1 %vm6859_vm15, %v6674_v31  ;;  %vm5997_vm11 = vmor %vm2452_vm9, %vm2484_vm14  ;;  %vm993_vm15 = vcmp.eq.s32.totalorder %v4479_v24, %v5470_v61  ;;  %vm6867_vm14 = vnez %v6799_v15  ;;  %vm6868_vm9 = vnez %v6793_v32 }
 0x17c   : > { %v6861_v21 = vsel %vm5997_vm11, 4294967295, %v6860_v21  ;;  %vm6864_vm0 = vmpackc.low %vm6862_vm12, %vm6863_vm4  ;;  %vm2454_vm12 = vcmp.eq.s32.totalorder %v4482_v26, %v4966_v37 }
 0x17d   : > { %3715 = vmatmul.mubr.msk.bf16.gmra.mrb[12].mxu0 %vm6864_vm0, %v6674_v31  ;;  %vm6009_vm13 = vmor %vm2453_vm5, %vm2485_vm8  ;;  %vm992_vm0 = vcmp.eq.s32.totalorder %v4479_v24, %v6870_v19  ;;  %vm961_vm8 = vcmp.eq.s32.totalorder %v4479_v24, %v5435_v60  ;;  %3749 = vmatpush3.bf16.msra.mxu1 %v4163_v43 }
 0x17e   : > { %v6866_v45 = vsel %vm6009_vm13, 4294967295, %v6865_v45  ;;  %vm6869_vm1 = vmpackc.low %vm6867_vm14, %vm6868_vm9  ;;  %vm2487_vm9 = vcmp.eq.s32.totalorder %v4482_v26, %v5470_v61  ;;  %vm963_vm13 = vcmp.eq.s32.totalorder %v4479_v24, %v5005_v51 }
 0x17f   : > { %3718 = vmatprep.mubr.msk.bf16.mxu0 %vm6869_vm1, %v6674_v31  ;;  %vm6032_vm4 = vmor %vm960_vm3, %vm992_vm0  ;;  %vm2486_vm3 = vcmp.eq.s32.totalorder %v4482_v26, %v6870_v19  ;;  %vm2455_vm0 = vcmp.eq.s32.totalorder %v4482_v26, %v5435_v60 }
 0x180   : > { %v6872_v59 = vsel %vm6032_vm4, 4294967295, %v6871_v59  ;;  %vm6038_vm14 = vmor %vm961_vm8, %vm993_vm15  ;;  %vm994_vm15 = vcmp.eq.s32.totalorder %v4479_v24, %v6877_v18  ;;  %vm6878_vm8 = vnez %v6805_v35  ;;  %vm6884_vm4 = vnez %v6823_v63  ;;  %v6903_v35 = vld [vmem:[#allocation10_spill] sm:$0xff] }
 0x181   : > { %v6874_v3 = vsel %vm6038_vm14, 4294967295, %v6873_v3  ;;  %vm6052_vm5 = vmor %vm2454_vm12, %vm2486_vm3  ;;  %vm995_vm12 = vcmp.eq.s32.totalorder %v4479_v24, %v6882_v54  ;;  %vm6883_vm3 = vnez %v6828_v39 }
 0x182   : > { %v6876_v25 = vsel %vm6052_vm5, 4294967295, %v6875_v25  ;;  %vm6879_vm11 = vmpackc.low %vm5790_vm10, %vm6878_vm8  ;;  %vm6893_vm10 = vnez %v6830_v38 }
 0x183   : > { %3575 = vmatmul.mubr.msk.bf16.gmra.mrb[16].mxu1 %vm6879_vm11, %v6674_v31  ;;  %vm6064_vm1 = vmor %vm2455_vm0, %vm2487_vm9  ;;  %vm962_vm11 = vcmp.eq.s32.totalorder %v4479_v24, %v6886_v36  ;;  %vm6887_vm9 = vnez %v6814_v56  ;;  %vm6888_vm0 = vnez %v6809_v20  ;;  %v6923_v20 = vld [vmem:[#allocation7_spill] sm:$0xff]  ;;  %v6926_v56 = vmov 0 }
 0x184   : > { %v6881_v22 = vsel %vm6064_vm1, 4294967295, %v6880_v22  ;;  %vm6885_vm14 = vmpackc.low %vm6883_vm3, %vm6884_vm4  ;;  %vm6892_vm3 = vnez %v6832_v17 }
 0x185   : > { %3578 = vmatprep.mubr.msk.bf16.mxu1 %vm6885_vm14, %v6674_v31  ;;  %vm6889_vm8 = vmpackc.low %vm6887_vm9, %vm6888_vm0  ;;  %vm2488_vm14 = vcmp.eq.s32.totalorder %v4482_v26, %v6877_v18  ;;  %vm2456_vm9 = vcmp.eq.s32.totalorder %v4482_v26, %v6886_v36  ;;  %vm2457_vm0 = vcmp.eq.s32.totalorder %v4482_v26, %v5005_v51 }
 0x186   : > { %3719 = vmatmul.mubr.msk.bf16.gmra.mrb[16].mxu0 %vm6889_vm8, %v6674_v31  ;;  %vm6090_vm4 = vmor %vm962_vm11, %vm994_vm15  ;;  %vm2489_vm15 = vcmp.eq.s32.totalorder %v4482_v26, %v6882_v54  ;;  %vm6902_vm8 = vcmp.eq.s32.totalorder %v4479_v24, %v5111_v23 }
 0x187   : > { %vm6894_vm5 = vmpackc.low %vm6892_vm3, %vm6893_vm10 }
 0x188   : > { %3722 = vmatprep.mubr.msk.bf16.mxu0 %vm6894_vm5, %v6674_v31  ;;  %vm6102_vm1 = vmor %vm963_vm13, %vm995_vm12  ;;  %vm6920_vm5 = vcmp.eq.s32.totalorder %v4482_v26, %v6903_v35 }
 0x189   : > { %vm6116_vm10 = vmor %vm2456_vm9, %vm2488_vm14  ;;  %vm6904_vm14 = vcmp.eq.s32.totalorder %v4479_v24, %v6903_v35 }
 0x18a   : > { %vm6120_vm13 = vmor %vm2457_vm0, %vm2489_vm15  ;;  %vm6907_vm15 = vnez %v6853_v53 }
 0x18b   : > { %vm6901_vm12 = vmpackc.low %vm5915_vm2, %vm5901_vm6  ;;  %vm6909_vm6 = vcmp.eq.s32.totalorder %v4479_v24, %v5638_v47  ;;  %vm6910_vm2 = vcmp.eq.s32.totalorder %v4479_v24, %v5599_v12  ;;  %v6921_v24 = vmov 0 }
 0x18c   : > { %3579 = vmatmul.mubr.msk.bf16.gmra.mrb[20].mxu1 %vm6901_vm12, %v6674_v31  ;;  %vm6140_vm3 = vmor %vm6904_vm14, %vm6902_vm8  ;;  %vm6913_vm12 = vnez %v6851_v62  ;;  %vm6914_vm8 = vnez %v6849_v5 }
 0x18d   : > { %v6906_v42 = vsel %vm6140_vm3, 4294967295, %v6905_v42  ;;  %vm6908_vm9 = vmpackc.low %vm5971_vm7, %vm6907_vm15  ;;  %vm6916_vm15 = vnez %v6866_v45  ;;  %vm1448_vm7 = vcmp.eq.s32.totalorder %v6923_v20, %v6781_v27  ;;  %vm1483_vm3 = vcmp.eq.s32.totalorder %v6923_v20, %v5069_v0 }
 0x18e   : > { %3582 = vmatprep.mubr.msk.bf16.mxu1 %vm6908_vm9, %v6674_v31  ;;  %vm6156_vm0 = vmor %vm6910_vm2, %vm6909_vm6  ;;  %vm6917_vm9 = vnez %v6861_v21  ;;  %vm6919_vm2 = vcmp.eq.s32.totalorder %v4482_v26, %v5111_v23  ;;  %v6962_v0 = vmov 0 }
 0x18f   : > { %v6912_v44 = vsel %vm6156_vm0, 4294967295, %v6911_v44  ;;  %vm6915_vm14 = vmpackc.low %vm6913_vm12, %vm6914_vm8  ;;  %vm1480_vm8 = vcmp.eq.s32.totalorder %v6923_v20, %v4943_v28 }
 0x190   : > { %3723 = vmatmul.mubr.msk.bf16.gmra.mrb[20].mxu0 %vm6915_vm14, %v6674_v31  ;;  %vm6918_vm6 = vmpackc.low %vm6916_vm15, %vm6917_vm9  ;;  %vm6924_vm14 = vcmp.eq.s32.totalorder %v4482_v26, %v5638_v47  ;;  %vm6925_vm15 = vcmp.eq.s32.totalorder %v4482_v26, %v5599_v12  ;;  %v6928_v26 = vmov 0 }
 0x191   : > { %3726 = vmatprep.mubr.msk.bf16.mxu0 %vm6918_vm6, %v6674_v31  ;;  %vm6182_vm12 = vmor %vm6920_vm5, %vm6919_vm2  ;;  %vm1449_vm6 = vcmp.eq.s32.totalorder %v6923_v20, %v4814_v50  ;;  %vm1481_vm5 = vcmp.eq.s32.totalorder %v6923_v20, %v4980_v46  ;;  %vm6932_vm2 = vnez %v6874_v3 }
 0x192   : > { %v6922_v24 = vsel %vm6182_vm12, 4294967295, %v6921_v24  ;;  %vm6194_vm9 = vmor %vm6925_vm15, %vm6924_vm14  ;;  %vm1482_vm14 = vcmp.eq.s32.totalorder %v6923_v20, %v6794_v9  ;;  %vm1450_vm15 = vcmp.eq.s32.totalorder %v6923_v20, %v4855_v2  ;;  %vm6933_vm12 = vnez %v6872_v59 }
 0x193   : > { %v6927_v56 = vsel %vm6194_vm9, 4294967295, %v6926_v56  ;;  %vm6212_vm11 = vmor %vm1448_vm7, %vm1480_vm8  ;;  %vm1451_vm8 = vcmp.eq.s32.totalorder %v6923_v20, %v6803_v33 }
 0x194   : > { %v6929_v26 = vsel %vm6212_vm11, 4294967295, %v6928_v26  ;;  %vm6218_vm0 = vmor %vm1449_vm6, %vm1481_vm5 }
 0x195   : > { %vm6934_vm9 = vmpackc.low %vm6932_vm2, %vm6933_vm12  ;;  %vm1484_vm12 = vcmp.eq.s32.totalorder %v6923_v20, %v5168_v30  ;;  %vm6939_vm2 = vnez %v6876_v25 }
 0x196   : > { %3583 = vmatmul.mubr.msk.bf16.gmra.mrb[24].mxu1 %vm6934_vm9, %v6674_v31  ;;  %vm6935_vm6 = vmpackc.low %vm6102_vm1, %vm6090_vm4  ;;  %vm6938_vm9 = vnez %v6881_v22  ;;  %vm1485_vm1 = vcmp.eq.s32.totalorder %v6923_v20, %v5217_v58  ;;  %v6944_v58 = vmov 0 }
 0x197   : > { %3586 = vmatprep.mubr.msk.bf16.mxu1 %vm6935_vm6, %v6674_v31  ;;  %vm6240_vm5 = vmor %vm1450_vm15, %vm1482_vm14  ;;  %vm1453_vm15 = vcmp.eq.s32.totalorder %v6923_v20, %v4880_v6  ;;  %vm1487_vm6 = vcmp.eq.s32.totalorder %v6923_v20, %v5308_v57  ;;  %v6948_v6 = vmov 0 }
 0x198   : > { %vm6940_vm7 = vmpackc.low %vm6938_vm9, %vm6939_vm2  ;;  %vm1455_vm9 = vcmp.eq.s32.totalorder %v6923_v20, %v5270_v49 }
 0x199   : > { %3727 = vmatmul.mubr.msk.bf16.gmra.mrb[24].mxu0 %vm6940_vm7, %v6674_v31  ;;  %vm6252_vm11 = vmor %vm1451_vm8, %vm1483_vm3  ;;  %vm1452_vm3 = vcmp.eq.s32.totalorder %v6923_v20, %v6818_v13  ;;  %vm1454_vm8 = vcmp.eq.s32.totalorder %v6923_v20, %v4909_v10  ;;  %v6960_v10 = vmov 0 }
 0x19a   : > { %vm6943_vm4 = vmpackc.low %vm6120_vm13, %vm6116_vm10  ;;  %vm1486_vm10 = vcmp.eq.s32.totalorder %v6923_v20, %v4512_v34 }
 0x19b   : > { %3730 = vmatprep.mubr.msk.bf16.mxu0 %vm6943_vm4, %v6674_v31  ;;  %vm6272_vm7 = vmor %vm1452_vm3, %vm1484_vm12  ;;  %vm6950_vm4 = vnez %v6912_v44  ;;  %vm6951_vm3 = vnez %v6906_v42 }
 0x19c   : > { %v6945_v58 = vsel %vm6272_vm7, 4294967295, %v6944_v58  ;;  %vm6280_vm13 = vmor %vm1453_vm15, %vm1485_vm1  ;;  %vm1488_vm1 = vcmp.eq.s32.totalorder %v6923_v20, %v5366_v52  ;;  %vm1457_vm7 = vcmp.eq.s32.totalorder %v6923_v20, %v4925_v14  ;;  %v6964_v14 = vmov 0 }
 0x19d   : > { %vm6292_vm2 = vmor %vm1454_vm8, %vm1486_vm10  ;;  %vm1489_vm8 = vcmp.eq.s32.totalorder %v6923_v20, %v5396_v16  ;;  %vm6955_vm10 = vnez %v6929_v26 }
 0x19e   : > { %v6949_v6 = vsel %vm6292_vm2, 4294967295, %v6948_v6  ;;  %vm6952_vm15 = vmpackc.low %vm6950_vm4, %vm6951_vm3  ;;  %vm6958_vm3 = vnez %v6922_v24  ;;  %vm1491_vm4 = vcmp.eq.s32.totalorder %v6923_v20, %v5470_v61 }
 0x19f   : > { %3587 = vmatmul.mubr.msk.bf16.gmra.mrb[28].mxu1 %vm6952_vm15, %v6674_v31  ;;  %vm6304_vm14 = vmor %vm1455_vm9, %vm1487_vm6  ;;  %vm1456_vm6 = vcmp.eq.s32.totalorder %v6923_v20, %v5333_v29  ;;  %vm6957_vm9 = vnez %v6927_v56 }
 0x1a0   : > { %vm6956_vm12 = vmpackc.low %vm6218_vm0, %vm6955_vm10 }
 0x1a1   : > { %3622 = vmatprep.mubr.msk.bf16.mxu1 %vm6956_vm12, %v6674_v31  ;;  %vm6959_vm15 = vmpackc.low %vm6957_vm9, %vm6958_vm3  ;;  %vm1458_vm12 = vcmp.eq.s32.totalorder %v6923_v20, %v4966_v37  ;;  %v6966_v37 = vmov 0  ;;  %vm1494_vm9 = vcmp.eq.s32.totalorder %v6923_v20, %v5111_v23 }
 0x1a2   : > { %3731 = vmatmul.mubr.msk.bf16.gmra.mrb[28].mxu0 %vm6959_vm15, %v6674_v31  ;;  %vm6330_vm0 = vmor %vm1456_vm6, %vm1488_vm1  ;;  %vm1490_vm1 = vcmp.eq.s32.totalorder %v6923_v20, %v6870_v19  ;;  %vm1459_vm6 = vcmp.eq.s32.totalorder %v6923_v20, %v5435_v60  ;;  %vm1493_vm15 = vcmp.eq.s32.totalorder %v6923_v20, %v6882_v54 }
 0x1a3   : > { %v6961_v10 = vsel %vm6330_vm0, 4294967295, %v6960_v10  ;;  %vm6336_vm10 = vmor %vm1457_vm7, %vm1489_vm8  ;;  %vm1492_vm7 = vcmp.eq.s32.totalorder %v6923_v20, %v6877_v18  ;;  %vm1462_vm0 = vcmp.eq.s32.totalorder %v6923_v20, %v6903_v35 }
 0x1a4   : > { %v6963_v0 = vsel %vm6336_vm10, 4294967295, %v6962_v0  ;;  %vm6350_vm3 = vmor %vm1458_vm12, %vm1490_vm1  ;;  %vm1460_vm12 = vcmp.eq.s32.totalorder %v6923_v20, %v6886_v36  ;;  %vm1461_vm1 = vcmp.eq.s32.totalorder %v6923_v20, %v5005_v51 }
 0x1a5   : > { %v6965_v14 = vsel %vm6350_vm3, 4294967295, %v6964_v14  ;;  %vm6356_vm8 = vmor %vm1459_vm6, %vm1491_vm4  ;;  %vm6969_vm3 = vnez %v6945_v58 }
 0x1a6   : > { %v6967_v37 = vsel %vm6356_vm8, 4294967295, %v6966_v37  ;;  %vm6968_vm4 = vmpackc.low %vm6252_vm11, %vm6240_vm5  ;;  %vm1495_vm5 = vcmp.eq.s32.totalorder %v6923_v20, %v5638_v47 }
 0x1a7   : > { %3623 = vmatmul.mubr.msk.bf16.vlgmr.msra.gmra.mrb[16].mxu1 %vm6968_vm4, %v6674_v31  ;;  %vm1524_vm6 = vmor %vm1460_vm12, %vm1492_vm7  ;;  %vm1463_vm12 = vcmp.eq.s32.totalorder %v6923_v20, %v5599_v12 }
 0x1a8   : > { %vm6970_vm8 = vmpackc.low %vm6280_vm13, %vm6969_vm3  ;;  %vm6971_vm3 = vnez %v6949_v6 }
 0x1a9   : > { %3626 = vmatprep.mubr.msk.bf16.mxu1 %vm6970_vm8, %v6674_v31  ;;  %vm1525_vm11 = vmor %vm1461_vm1, %vm1493_vm15  ;;  %vm6973_vm8 = vnez %v6963_v0  ;;  %vm6974_vm15 = vnez %v6961_v10 }
 0x1aa   : > { %vm3220_vm7 = vmpackc.low %vm1525_vm11, %vm1524_vm6  ;;  %vm6976_vm6 = vnez %v6967_v37 }
 0x1ab   : > { %vm1526_vm4 = vmor %vm1462_vm0, %vm1494_vm9  ;;  %vm6977_vm0 = vnez %v6965_v14 }
 0x1ac   : > { %vm1527_vm10 = vmor %vm1463_vm12, %vm1495_vm5 }
 0x1ad   : > { %vm3222_vm2 = vmpackc.low %vm1527_vm10, %vm1526_vm4 }
 0x1ae   : > { %vm6972_vm13 = vmpackc.low %vm6304_vm14, %vm6971_vm3 }
 0x1af   : > { %3627 = vmatmul.mubr.msk.bf16.gmra.mrb[20].mxu1 %vm6972_vm13, %v6674_v31  ;;  %vm6975_vm1 = vmpackc.low %vm6973_vm8, %vm6974_vm15 }
 0x1b0   : > { %3630 = vmatprep.mubr.msk.bf16.mxu1 %vm6975_vm1, %v6674_v31  ;;  %vm6978_vm10 = vmpackc.low %vm6976_vm6, %vm6977_vm0 }
 0x1b7   : > { %3631 = vmatmul.mubr.msk.bf16.gmra.mrb[24].mxu1 %vm6978_vm10, %v6674_v31 }
 0x1b8   : > { %3634 = vmatprep.mubr.msk.bf16.mxu1 %vm3220_vm7, %v6674_v31 }
 0x1bf   : > { %3635 = vmatmul.mubr.msk.bf16.gmra.mrb[28].mxu1 %vm3222_vm2, %v6674_v31 }
 0x231   : > { %v3560_v51 = vpop.f32.mrb[0].mxu1 }
 0x232   : > { %v1240_v23 = vpop.f32.mrb[1].mxu1 }
 0x233   : > { %v3561_v49 = vpop.f32.mrb[2].mxu1 }
 0x234   : > { %v3704_v30 = vpop.f32.mrb[0].mxu0  ;;  %v1243_v52 = vpop.f32.mrb[3].mxu1 }
 0x235   : > { %v3755_v57 = vadd.f32 %v3704_v30, %v3560_v51  ;;  %v2734_v29 = vpop.f32.mrb[1].mxu0 }
 0x236   : > { %v3761_v16 = vadd.f32 %v2734_v29, %v1240_v23  ;;  %v3705_v60 = vpop.f32.mrb[2].mxu0 }
 0x237   : > { %2895 = vst [vmem:[%s6413_s3 + $0x10] sm:$0xff] %v3755_v57  ;;  %v3767_v31 = vadd.f32 %v3705_v60, %v3561_v49  ;;  %v2737_v61 = vpop.f32.mrb[3].mxu0 }
 0x238   : > { %2893 = vst [vmem:[%s6413_s3] sm:$0xff] %v3761_v16  ;;  %v3773_v12 = vadd.f32 %v2737_v61, %v1243_v52 }
 0x239   : > { %2896 = vst [vmem:[%s6413_s3 + $0x18] sm:$0xff] %v3767_v31 }
 0x23a   : > { %2894 = vst [vmem:[%s6413_s3 + $0x8] sm:$0xff] %v3773_v12  ;;  %v3564_v47 = vpop.f32.mrb[4].mxu1 }
 0x23b   : > { %v1256_v27 = vpop.f32.mrb[5].mxu1 }
 0x23c   : > { %v3565_v33 = vpop.f32.mrb[6].mxu1 }
 0x23d   : > { %v3708_v9 = vpop.f32.mrb[4].mxu0  ;;  %v1259_v63 = vpop.f32.mrb[7].mxu1 }
 0x23e   : > { %v3779_v13 = vadd.f32 %v3708_v9, %v3564_v47  ;;  %v2750_v40 = vpop.f32.mrb[5].mxu0 }
 0x23f   : > { %v3785_v39 = vadd.f32 %v2750_v40, %v1256_v27  ;;  %v3709_v38 = vpop.f32.mrb[6].mxu0 }
 0x240   : > { %2899 = vst [vmem:[%s6413_s3 + $0x30] sm:$0xff] %v3779_v13  ;;  %v3791_v48 = vadd.f32 %v3709_v38, %v3565_v33  ;;  %v2753_v17 = vpop.f32.mrb[7].mxu0 }
 0x241   : > { %2897 = vst [vmem:[%s6413_s3 + $0x20] sm:$0xff] %v3785_v39  ;;  %v3797_v55 = vadd.f32 %v2753_v17, %v1259_v63 }
 0x242   : > { %2900 = vst [vmem:[%s6413_s3 + $0x38] sm:$0xff] %v3791_v48 }
 0x243   : > { %2898 = vst [vmem:[%s6413_s3 + $0x28] sm:$0xff] %v3797_v55  ;;  %v3568_v1 = vpop.f32.mrb[8].mxu1 }
 0x244   : > { %v1272_v4 = vpop.f32.mrb[9].mxu1 }
 0x245   : > { %v3569_v62 = vpop.f32.mrb[10].mxu1 }
 0x246   : > { %v1275_v11 = vpop.f32.mrb[11].mxu1 }
 0x247   : > { %v3712_v5 = vpop.f32.mrb[8].mxu0 }
 0x248   : > { %v3803_v53 = vadd.f32 %v3712_v5, %v3568_v1  ;;  %v2766_v8 = vpop.f32.mrb[9].mxu0 }
 0x249   : > { %v3809_v21 = vadd.f32 %v2766_v8, %v1272_v4  ;;  %v3713_v45 = vpop.f32.mrb[10].mxu0 }
 0x24a   : > { %2903 = vst [vmem:[%s6413_s3 + $0x50] sm:$0xff] %v3803_v53  ;;  %v3815_v43 = vadd.f32 %v3713_v45, %v3569_v62  ;;  %v2769_v19 = vpop.f32.mrb[11].mxu0 }
 0x24b   : > { %2901 = vst [vmem:[%s6413_s3 + $0x40] sm:$0xff] %v3809_v21  ;;  %v3821_v59 = vadd.f32 %v2769_v19, %v1275_v11 }
 0x24c   : > { %2904 = vst [vmem:[%s6413_s3 + $0x58] sm:$0xff] %v3815_v43 }
 0x24d   : > { %2902 = vst [vmem:[%s6413_s3 + $0x48] sm:$0xff] %v3821_v59  ;;  %v3572_v3 = vpop.f32.mrb[12].mxu1 }
 0x24e   : > { %v1288_v25 = vpop.f32.mrb[13].mxu1 }
 0x24f   : > { %v3573_v22 = vpop.f32.mrb[14].mxu1 }
 0x250   : > { %v3716_v18 = vpop.f32.mrb[12].mxu0  ;;  %v1291_v7 = vpop.f32.mrb[15].mxu1 }
 0x251   : > { %v3827_v54 = vadd.f32 %v3716_v18, %v3572_v3  ;;  %v2782_v36 = vpop.f32.mrb[13].mxu0 }
 0x252   : > { %v3833_v32 = vadd.f32 %v2782_v36, %v1288_v25  ;;  %v3717_v41 = vpop.f32.mrb[14].mxu0 }
 0x253   : > { %2907 = vst [vmem:[%s6413_s3 + $0x70] sm:$0xff] %v3827_v54  ;;  %v3839_v15 = vadd.f32 %v3717_v41, %v3573_v22  ;;  %v2785_v35 = vpop.f32.mrb[15].mxu0 }
 0x254   : > { %2905 = vst [vmem:[%s6413_s3 + $0x60] sm:$0xff] %v3833_v32  ;;  %v3845_v42 = vadd.f32 %v2785_v35, %v1291_v7 }
 0x255   : > { %2908 = vst [vmem:[%s6413_s3 + $0x78] sm:$0xff] %v3839_v15 }
 0x256   : > { %2906 = vst [vmem:[%s6413_s3 + $0x68] sm:$0xff] %v3845_v42 }
 0x259   : > { %v3720_v44 = vpop.f32.mrb[16].mxu0 }
 0x25a   : > { %v2798_v24 = vpop.f32.mrb[17].mxu0 }
 0x25b   : > { %v3721_v20 = vpop.f32.mrb[18].mxu0 }
 0x25c   : > { %v2801_v56 = vpop.f32.mrb[19].mxu0 }
 0x263   : > { %v3724_v26 = vpop.f32.mrb[20].mxu0 }
 0x264   : > { %v2814_v50 = vpop.f32.mrb[21].mxu0 }
 0x265   : > { %v3725_v2 = vpop.f32.mrb[22].mxu0 }
 0x266   : > { %v2817_v28 = vpop.f32.mrb[23].mxu0 }
 0x26c   : > { %v3728_v58 = vpop.f32.mrb[24].mxu0 }
 0x26d   : > { %v2830_v46 = vpop.f32.mrb[25].mxu0 }
 0x26e   : > { %v3729_v6 = vpop.f32.mrb[26].mxu0 }
 0x26f   : > { %v2833_v34 = vpop.f32.mrb[27].mxu0 }
 0x275   : > { %v3732_v10 = vpop.f32.mrb[28].mxu0 }
 0x276   : > { %v2846_v0 = vpop.f32.mrb[29].mxu0 }
 0x277   : > { %v3733_v14 = vpop.f32.mrb[30].mxu0 }
 0x278   : > { %v2849_v37 = vpop.f32.mrb[31].mxu0 }
 0x27a   : > { %v3624_v51 = vpop.f32.mrb[16].mxu1 }
 0x27b   : > { %v1802_v23 = vpop.f32.mrb[17].mxu1  ;;  %v3851_v49 = vadd.f32 %v3720_v44, %v3624_v51 }
 0x27c   : > { %v3625_v30 = vpop.f32.mrb[18].mxu1  ;;  %v3857_v29 = vadd.f32 %v2798_v24, %v1802_v23 }
 0x27d   : > { %v1805_v57 = vpop.f32.mrb[19].mxu1  ;;  %2911 = vst [vmem:[%s6413_s3 + $0x90] sm:$0xff] %v3851_v49  ;;  %v3863_v52 = vadd.f32 %v3721_v20, %v3625_v30 }
 0x27e   : > { %2909 = vst [vmem:[%s6413_s3 + $0x80] sm:$0xff] %v3857_v29  ;;  %v3869_v16 = vadd.f32 %v2801_v56, %v1805_v57 }
 0x27f   : > { %2912 = vst [vmem:[%s6413_s3 + $0x98] sm:$0xff] %v3863_v52 }
 0x280   : > { %2910 = vst [vmem:[%s6413_s3 + $0x88] sm:$0xff] %v3869_v16 }
 0x282   : > { %v3628_v60 = vpop.f32.mrb[20].mxu1 }
 0x283   : > { %v1818_v31 = vpop.f32.mrb[21].mxu1  ;;  %v3875_v12 = vadd.f32 %v3724_v26, %v3628_v60 }
 0x284   : > { %v3629_v61 = vpop.f32.mrb[22].mxu1  ;;  %v3881_v27 = vadd.f32 %v2814_v50, %v1818_v31 }
 0x285   : > { %v1821_v47 = vpop.f32.mrb[23].mxu1  ;;  %2915 = vst [vmem:[%s6413_s3 + $0xb0] sm:$0xff] %v3875_v12  ;;  %v3887_v9 = vadd.f32 %v3725_v2, %v3629_v61 }
 0x286   : > { %2913 = vst [vmem:[%s6413_s3 + $0xa0] sm:$0xff] %v3881_v27  ;;  %v3893_v33 = vadd.f32 %v2817_v28, %v1821_v47 }
 0x287   : > { %2916 = vst [vmem:[%s6413_s3 + $0xb8] sm:$0xff] %v3887_v9 }
 0x288   : > { %2914 = vst [vmem:[%s6413_s3 + $0xa8] sm:$0xff] %v3893_v33 }
 0x28a   : > { %v3632_v13 = vpop.f32.mrb[24].mxu1 }
 0x28b   : > { %v1834_v40 = vpop.f32.mrb[25].mxu1  ;;  %v3899_v39 = vadd.f32 %v3728_v58, %v3632_v13 }
 0x28c   : > { %v3633_v63 = vpop.f32.mrb[26].mxu1  ;;  %v3905_v48 = vadd.f32 %v2830_v46, %v1834_v40 }
 0x28d   : > { %v1837_v38 = vpop.f32.mrb[27].mxu1  ;;  %2919 = vst [vmem:[%s6413_s3 + $0xd0] sm:$0xff] %v3899_v39  ;;  %v3911_v17 = vadd.f32 %v3729_v6, %v3633_v63 }
 0x28e   : > { %2917 = vst [vmem:[%s6413_s3 + $0xc0] sm:$0xff] %v3905_v48  ;;  %v3917_v55 = vadd.f32 %v2833_v34, %v1837_v38 }
 0x28f   : > { %2920 = vst [vmem:[%s6413_s3 + $0xd8] sm:$0xff] %v3911_v17 }
 0x290   : > { %2918 = vst [vmem:[%s6413_s3 + $0xc8] sm:$0xff] %v3917_v55 }
 0x292   : > { %v3636_v1 = vpop.f32.mrb[28].mxu1 }
 0x293   : > { %v1850_v4 = vpop.f32.mrb[29].mxu1  ;;  %v3923_v62 = vadd.f32 %v3732_v10, %v3636_v1 }
 0x294   : > { %v3637_v5 = vpop.f32.mrb[30].mxu1  ;;  %v3929_v8 = vadd.f32 %v2846_v0, %v1850_v4 }
 0x295   : > { %v1853_v53 = vpop.f32.mrb[31].mxu1  ;;  %2923 = vst [vmem:[%s6413_s3 + $0xf0] sm:$0xff] %v3923_v62  ;;  %v3935_v11 = vadd.f32 %v3733_v14, %v3637_v5 }
 0x296   : > { %2921 = vst [vmem:[%s6413_s3 + $0xe0] sm:$0xff] %v3929_v8  ;;  %v3941_v21 = vadd.f32 %v2849_v37, %v1853_v53 }
 0x297   : > { %2924 = vst [vmem:[%s6413_s3 + $0xf8] sm:$0xff] %v3935_v11 }
 0x298   : > { %2922 = vst [vmem:[%s6413_s3 + $0xe8] sm:$0xff] %v3941_v21 }
 0x299   : > { %4177 = shalt.err (!%p4174_p3)
}
 0x29a   : > { %s4178_s21 = scalar_lea.hbm %s6449_s7, 4096  ;;  %s4182_s24 = scalar_lea.hbm %s6501_s2, 8192 }
 0x29b   : > { %p4179_p4 = scmp.ne.s32.totalorder %s6449_s7, %s4178_s21  ;;  %p4183_p9 = scmp.lt.u32.totalorder %s6449_s7, %s6501_s2 }
 0x29c   : > { %p4184_p10 = scmp.lt.u32.totalorder %s4182_s24, %s4178_s21  ;;  %p4186_p12 = scmp.lt.u32.totalorder %s4178_s21, %s6449_s7 }
 0x29d   : > { %p4180_p7 = pnand %p4179_p4, %p4287_p5 }
 0x29e   : > { %p4185_p11 = por %p4184_p10, %p4183_p9 }
 0x29f   : > { %p4181_p8 = pneg %p4180_p7 }
 0x2a0   : > { %p4187_p13 = por %p4186_p12, %p4185_p11 }
 0x2a2   : > { %p4188_p0 = pnand %p4187_p13, %p4181_p8 }
 0x2a4   : > { %4191 = shalt.err (!%p4188_p0)
}
 0x2a5   : > { %s4232_s28 = smov 128   ;;  %s4233_s29 = smov 8  }
 0x2a6   : > { %4038 = dma.vmem_to_hbm [thread:$0]  (%p4287_p5), %s6451_s4, 4096, %s6449_s7, %s6458_s13, %s4232_s28, %s4232_s28, %s4233_s29  }
 0x2a7 PF: > { %p4044_p1 = scmp.ge.s32.totalorder %s4226_s12, 2  ;;  %s2954_s30 = sand.u32 1, %s4214_s9  }
 0x2a8   : > { %s2955_s3 = scalar_lea.sflag [#allocation3], %s2954_s30 }
 0x2a9   : > { %p4041_p2 = pnand %p4044_p1, %p4291_p6 }
 0x2ab   : > { %4209 = dma.done.wait (!%p4041_p2), %s2955_s3, 4096  }
 0x2ac   : > { %4211 = vsyncadd (!%p4041_p2), %s2955_s3, 4294963200  ;;  %p12_p3 = scmp.ge.s32.totalorder %s4274_s15, 4   ;;  %s6979_s9 = smov %s4218_s10 }
 0x2ad   : > { %s6980_s10 = smov %s4222_s11  ;;  %s6981_s11 = smov %s4285_s18 }
 0x2ae   : > { %s6982_s12 = smov %s4274_s15  ;;  %14 = sbr.rel (!%p12_p3) target bundleno = 3 (0x3), region = 63 }
 0x2b5   :  { %2960 = vsyncpa [#allocation3], 1 }
 0x2b6   :  { %2962 = vsyncpa [#allocation3 + $0x1], 1 }

// kernel: tpu_custom_call.1
= control target key start
LH: loop header
LB: loop body
LE: loop exit
PB: predicated region body
PF: predicated region fallthrough
CT: control target
= control target key end

     0   :  { %7 = vsyncpa [#allocation3], 0  ;;  %s6499_s0 = inlined_call_operand.vmem [shape: s32[512,2], index: 0, kind: input, shape index: {}]   ;;  %s6500_s1 = inlined_call_operand.vmem [shape: bf16[640,128], index: 1, kind: input, shape index: {}]   ;;  %s6501_s2 = inlined_call_operand.hbm [shape: f32[512,128], index: 2, kind: output, shape index: {}]  }
   0x1   :  { %9 = vsyncpa [#allocation3 + $0x1], 0  ;;  %s4249_s9 = smov 0   ;;  %s4251_s10 = smov 0  }
   0x2   :  { %s4253_s11 = smov 0   ;;  %s4255_s12 = smov 0  }
   0x3 LB: > { %s4270_s13 = sadd.s32 4294967295, %s4226_s12   ;;  %s3001_s14 = sadd.s32 4294967294, %s4226_s12   ;;  %s4226_s12 = sphi %s4255_s12, %s6982_s12   ;;  %s4222_s11 = sphi %s4253_s11, %s6981_s11   ;;  %s4218_s10 = sphi %s4251_s10, %s6980_s10   ;;  %s4214_s9 = sphi %s4249_s9, %s6979_s9  }
   0x4   : > { %s4274_s15 = sadd.s32 1, %s4226_s12   ;;  %s69_s16 = sadd.s32 1, %s4222_s11 }
   0x5   : > { %s66_s17 = ssub.s32 %s4226_s12, %s4274_s15  ;;  %p79_p0 = scmp.ne.s32.totalorder %s4222_s11, %s4218_s10 }
   0x6   : > { %p67_p1 = scmp.eq.s32.totalorder %s66_s17, 0  ;;  %p80_p2 = scmp.eq.s32.totalorder %s4270_s13, 1 }
   0x7   : > { %p85_p3 = scmp.ne.s32.totalorder %s4218_s10, %s4214_s9  ;;  %p86_p4 = scmp.eq.s32.totalorder %s3001_s14, 1 }
   0x8   : > { %s4285_s18 = scalar_select %p67_p1, %s4222_s11, %s69_s16  }
   0x9   : > { %p4287_p5 = por %p80_p2, %p79_p0  ;;  %p4291_p6 = por %p86_p4, %p85_p3 }
   0xa   : > { %p3004_p7 = scmp.ge.s32.totalorder %s4226_s12, 1  ;;  %p116_p8 = scmp.lt.s32.totalorder %s4226_s12, 3 }
   0xc   : > { %p117_p9 = pnand %p3004_p7, %p116_p8 }
   0xe   : > { %120 = sbr.rel (%p117_p9) target bundleno = 679 (0x2a7), region = 28 }
  0x15   : > { %s3006_s21 = sshll.u32 %s4270_s13, 5  ;;  %v4228_v0 = vmov 0   ;;  %v4229_v1 = vmov 1   ;;  %v4116_v14 = vld [vmem:[%s6500_s1] sm:$0xff]   ;;  %v4118_v21 = vld [vmem:[%s6500_s1 + $0x8] sm:$0xff]   ;;  %v4120_v26 = vld [vmem:[%s6500_s1 + $0x10] sm:$0xff]  }
  0x16   : > { %4083 = vset.pattern.permute.xlu1 %v4228_v0  ;;  %p139_p10 = scmp.lt.s32.totalorder %s3006_s21, 63  ;;  %4085 = vset.pattern.permute.xlu0 %v4229_v1  ;;  %v4336_v15 = vld [vmem:[%s6500_s1 + $0x80] sm:$0xff]   ;;  %v4119_v22 = vld [vmem:[%s6500_s1 + $0x88] sm:$0xff]   ;;  %v4121_v27 = vld [vmem:[%s6500_s1 + $0x90] sm:$0xff]   ;;  %s135_s29 = sand.u32 1, %s4218_s10  }
  0x17   : > { %3494 = vmatprep.subr.bf16.mxu1 %v4116_v14  ;;  %3590 = vmatprep.subr.bf16.mxu0 %v4336_v15  ;;  %v4122_v31 = vld [vmem:[%s6500_s1 + $0x18] sm:$0xff]   ;;  %v4124_v34 = vld [vmem:[%s6500_s1 + $0x20] sm:$0xff]   ;;  %v4126_v37 = vld [vmem:[%s6500_s1 + $0x28] sm:$0xff]   ;;  %s3005_s30 = sshll.u32 %s135_s29, 8  ;;  %s4231_s14 = smov [#allocation2]  }
  0x18   : > { %s6984_s21 = smov (!%p139_p10, %s3006_s21), 63  ;;  %3495 = vmatpush3.bf16.msra.mxu1 %v4116_v14  ;;  %3591 = vmatpush3.bf16.msra.mxu0 %v4336_v15  ;;  %v4123_v32 = vld [vmem:[%s6500_s1 + $0x98] sm:$0xff]   ;;  %v4125_v35 = vld [vmem:[%s6500_s1 + $0xa0] sm:$0xff]   ;;  %v4127_v38 = vld [vmem:[%s6500_s1 + $0xa8] sm:$0xff]   ;;  %v210_v14 = vlaneseq  ;;  %s6413_s3 = scalar_lea.vmem [#allocation2], %s3005_s30 }
  0x19   : > { %s3007_s22 = sshll.u32 %s6984_s21, 3  ;;  %3496 = vmatprep.subr.bf16.mxu1 %v4118_v21  ;;  %3592 = vmatprep.subr.bf16.mxu0 %v4119_v22  ;;  %v4128_v39 = vld [vmem:[%s6500_s1 + $0x30] sm:$0xff]   ;;  %v4130_v42 = vld [vmem:[%s6500_s1 + $0x38] sm:$0xff]   ;;  %v4423_v53 = vld [vmem:[%s6500_s1 + $0xc0] sm:$0xff]   ;;  %s2939_s4 = sshll.u32 %s6413_s3, 4  ;;  %s6451_s4 = int_to_ptr.vmem [resolvable:$true] %s2939_s4 }
  0x1a   : > { %s4303_s25 = scalar_lea.vmem %s6499_s0, %s3007_s22  ;;  %v4129_v40 = vld [vmem:[%s6500_s1 + $0xb0] sm:$0xff]   ;;  %v4131_v43 = vld [vmem:[%s6500_s1 + $0xb8] sm:$0xff]   ;;  %s4164_s8 = scalar_lea.vmem %s6451_s4, 4096 }
  0x1b   : > { %v149_v2 = vld [vmem:[%s4303_s25 + $0x18] sm:$0xff]  ;;  %v4307_v3 = vld [vmem:[%s4303_s25 + $0x10] sm:$0xff]  ;;  %v4310_v4 = vld [vmem:[%s4303_s25] sm:$0xff]  ;;  %p4165_p11 = scmp.ne.s32.totalorder %s6451_s4, %s4164_s8  ;;  %s4168_s16 = sshll.u32 %s4231_s14, 4  ;;  %s4169_s16 = int_to_ptr.vmem [resolvable:$false] %s4168_s16 }
  0x1c   : > { %254 = vperm.xlu1 %4083, %v149_v2   ;;  %v180_v5 = vadd.s32 512, %v4307_v3  ;;  %v4314_v6 = vld [vmem:[%s4303_s25 + $0x30] sm:$0xff]  ;;  %v178_v7 = vadd.s32 512, %v4310_v4  ;;  %v4319_v9 = vld [vmem:[%s4303_s25 + $0x8] sm:$0xff]  ;;  %v181_v16 = vadd.s32 512, %v149_v2  ;;  %v150_v23 = vld [vmem:[%s4303_s25 + $0x20] sm:$0xff]  ;;  %3497 = vmatpush3.bf16.msra.mxu1 %v4118_v21  ;;  %p4171_p0 = scmp.lt.s32.totalorder %s6451_s4, %s4169_s16 }
  0x1d   : > { %v184_v8 = vadd.s32 512, %v4314_v6  ;;  %v4322_v10 = vld [vmem:[%s4303_s25 + $0x50] sm:$0xff]  ;;  %v179_v11 = vadd.s32 512, %v4319_v9  ;;  %3593 = vmatpush3.bf16.msra.mxu0 %v4119_v22  ;;  %v151_v28 = vld [vmem:[%s4303_s25 + $0x28] sm:$0xff]  ;;  %v182_v29 = vadd.s32 512, %v150_v23  ;;  %3498 = vmatprep.subr.bf16.mxu1 %v4120_v26  ;;  %v153_v36 = vld [vmem:[%s4303_s25 + $0x38] sm:$0xff]  ;;  %p4166_p12 = pnand %p4165_p11, %p4287_p5 }
  0x1e   : > { %379 = vperm.xlu0 %4085, %v180_v5   ;;  %v188_v12 = vadd.s32 512, %v4322_v10  ;;  %v4328_v13 = vld [vmem:[%s4303_s25 + $0x70] sm:$0xff]  ;;  %3594 = vmatprep.subr.bf16.mxu0 %v4121_v27  ;;  %v183_v33 = vadd.s32 512, %v151_v28  ;;  %v185_v41 = vadd.s32 512, %v153_v36  ;;  %v154_v44 = vld [vmem:[%s4303_s25 + $0x40] sm:$0xff]  ;;  %v155_v46 = vld [vmem:[%s4303_s25 + $0x48] sm:$0xff] }
  0x1f   : > { %v4339_v17 = vld [vmem:[%s4303_s25 + $0x90] sm:$0xff]  ;;  %v192_v18 = vadd.s32 512, %v4328_v13  ;;  %v186_v45 = vadd.s32 512, %v154_v44  ;;  %v187_v47 = vadd.s32 512, %v155_v46  ;;  %v157_v48 = vld [vmem:[%s4303_s25 + $0x58] sm:$0xff]  ;;  %v159_v49 = vld [vmem:[%s4303_s25 + $0x68] sm:$0xff]  ;;  %p4167_p13 = pneg %p4166_p12 }
  0x20   : > { %4084 = vset.pattern.permute.xlu1 %v4229_v1  ;;  %v4343_v19 = vld [vmem:[%s4303_s25 + $0xb0] sm:$0xff]  ;;  %v196_v20 = vadd.s32 512, %v4339_v17  ;;  %3499 = vmatpush3.bf16.msra.mxu1 %v4120_v26  ;;  %v189_v50 = vadd.s32 512, %v157_v48  ;;  %v158_v51 = vld [vmem:[%s4303_s25 + $0x60] sm:$0xff]  ;;  %v163_v52 = vld [vmem:[%s4303_s25 + $0x88] sm:$0xff]  ;;  %v191_v55 = vadd.s32 512, %v159_v49 }
  0x21   : > { %373 = vperm.xlu1 %4084, %v178_v7   ;;  %v4356_v24 = vld [vmem:[%s4303_s25 + $0xd0] sm:$0xff]  ;;  %v200_v25 = vadd.s32 512, %v4343_v19  ;;  %3595 = vmatpush3.bf16.msra.mxu0 %v4121_v27  ;;  %v190_v54 = vadd.s32 512, %v158_v51  ;;  %v167_v56 = vld [vmem:[%s4303_s25 + $0xa8] sm:$0xff]  ;;  %v161_v57 = vld [vmem:[%s4303_s25 + $0x78] sm:$0xff]  ;;  %v195_v2 = vadd.s32 512, %v163_v52 }
  0x22   : > { %391 = vperm.xlu0 %4085, %v184_v8   ;;  %v204_v30 = vadd.s32 512, %v4356_v24  ;;  %3500 = vmatprep.subr.bf16.mxu1 %v4122_v31  ;;  %v171_v58 = vld [vmem:[%s4303_s25 + $0xc8] sm:$0xff]  ;;  %v193_v59 = vadd.s32 512, %v161_v57  ;;  %v162_v60 = vld [vmem:[%s4303_s25 + $0x80] sm:$0xff]  ;;  %v176_v63 = vld [vmem:[%s4303_s25 + $0xf0] sm:$0xff]  ;;  %v199_v8 = vadd.s32 512, %v167_v56 }
  0x23   : > { %3596 = vmatprep.subr.bf16.mxu0 %v4123_v32  ;;  %v4437_v61 = vld [vmem:[%s4303_s25 + $0xe8] sm:$0xff]  ;;  %v194_v62 = vadd.s32 512, %v162_v60  ;;  %s4170_s17 = scalar_lea.vmem %s4169_s16, 8192 }
  0x24   : > { %3501 = vmatpush3.bf16.msra.mxu1 %v4122_v31  ;;  %p4172_p1 = scmp.lt.s32.totalorder %s4170_s17, %s4164_s8 }
  0x25   : > { %376 = vperm.xlu1 %4084, %v179_v11   ;;  %3597 = vmatpush3.bf16.msra.mxu0 %v4123_v32  ;;  %v6594_v32 = vmov 0 }
  0x26   : > { %403 = vperm.xlu0 %4085, %v188_v12   ;;  %3502 = vmatprep.subr.bf16.mxu1 %v4124_v34  ;;  %p4173_p2 = por %p4172_p1, %p4171_p0 }
  0x27   : > { %3598 = vmatprep.subr.bf16.mxu0 %v4125_v35 }
  0x28   : > { %3503 = vmatpush3.bf16.msra.mxu1 %v4124_v34  ;;  %p4174_p3 = pnand %p4173_p2, %p4167_p13 }
  0x29   : > { %382 = vperm.xlu1 %4084, %v181_v16   ;;  %3599 = vmatpush3.bf16.msra.mxu0 %v4125_v35  ;;  %v173_v35 = vld [vmem:[%s4303_s25 + $0xd8] sm:$0xff] }
  0x2a   : > { %415 = vperm.xlu0 %4085, %v192_v18   ;;  %3504 = vmatprep.subr.bf16.mxu1 %v4126_v37  ;;  %v4467_v18 = vand.u32 127, %v210_v14  ;;  %v4144_v14 = vld [vmem:[%s6500_s1 + $0x60] sm:$0xff]  }
  0x2b   : > { %3600 = vmatprep.subr.bf16.mxu0 %v4127_v38 }
  0x2c   : > { %3505 = vmatpush3.bf16.msra.mxu1 %v4126_v37  ;;  %v4476_v22 = vadd.s32 384, %v4467_v18  ;;  %v4482_v26 = vadd.s32 512, %v4467_v18  ;;  %v205_v37 = vadd.s32 512, %v173_v35 }
  0x2d   : > { %4086 = vset.pattern.permute.xlu1 %v4228_v0  ;;  %3601 = vmatpush3.bf16.msra.mxu0 %v4127_v38 }
  0x2e   : > { %427 = vperm.xlu0 %4085, %v196_v20   ;;  %257 = vperm.xlu1 %4086, %v150_v23  }
  0x2f   : > { %3506 = vmatprep.subr.bf16.mxu1 %v4128_v39  ;;  %3602 = vmatprep.subr.bf16.mxu0 %v4129_v40 }
  0x30   : > { %3507 = vmatpush3.bf16.msra.mxu1 %v4128_v39 }
  0x31   : > { %3603 = vmatpush3.bf16.msra.mxu0 %v4129_v40  ;;  %3508 = vmatprep.subr.bf16.mxu1 %v4130_v42  ;;  %v6599_v40 = vmov 0 }
  0x32   : > { %439 = vperm.xlu0 %4085, %v200_v25   ;;  %4087 = vset.pattern.permute.xlu1 %v4229_v1 }
  0x33   : > { %385 = vperm.xlu1 %4087, %v182_v29   ;;  %3604 = vmatprep.subr.bf16.mxu0 %v4131_v43  ;;  %v6591_v29 = vmov 0 }
  0x34   : > { %3509 = vmatpush3.bf16.msra.mxu1 %v4130_v42  ;;  %v6603_v42 = vmov 0 }
  0x35   : > { %3605 = vmatpush3.bf16.msra.mxu0 %v4131_v43  ;;  %v4543_v43 = vadd.s32 256, %v4467_v18 }
  0x36   : > { %451 = vperm.xlu0 %4085, %v204_v30   ;;  %3638 = vmatprep.subr.bf16.mxu0 %v4423_v53 }
  0x37   : > { %388 = vperm.xlu1 %4087, %v183_v33   ;;  %v6596_v33 = vmov 0  ;;  %6605 = vst [vmem:[#allocation7_spill] sm:$0xff] %v4543_v43 }
  0x3a   : > { %4109 = vset.pattern.permute.xlu0 %v4228_v0 }
  0x3b   : > { %245 = vperm.xlu0 %4109, %v4310_v4   ;;  %4088 = vset.pattern.permute.xlu1 %v4228_v0  ;;  %v165_v4 = vld [vmem:[%s4303_s25 + $0x98] sm:$0xff] }
  0x3c   : > { %266 = vperm.xlu1 %4088, %v153_v36   ;;  %v197_v5 = vadd.s32 512, %v165_v4 }
  0x3f   : > { %248 = vperm.xlu0 %4109, %v4319_v9   ;;  %v169_v9 = vld [vmem:[%s4303_s25 + $0xb8] sm:$0xff] }
  0x40   : > { %4089 = vset.pattern.permute.xlu1 %v4229_v1  ;;  %v201_v12 = vadd.s32 512, %v169_v9 }
  0x41   : > { %394 = vperm.xlu1 %4089, %v185_v41   ;;  %v6601_v41 = vmov 0 }
  0x43   : > { %251 = vperm.xlu0 %4109, %v4307_v3   ;;  %v208_v3 = vadd.s32 512, %v176_v63 }
  0x45   : > { %4090 = vset.pattern.permute.xlu1 %v4228_v0 }
  0x46   : > { %269 = vperm.xlu1 %4090, %v154_v44  }
  0x47   : > { %260 = vperm.xlu0 %4109, %v151_v28   ;;  %v203_v28 = vadd.s32 512, %v171_v58 }
  0x4a   : > { %4091 = vset.pattern.permute.xlu1 %v4229_v1 }
  0x4b   : > { %263 = vperm.xlu0 %4109, %v4314_v6   ;;  %397 = vperm.xlu1 %4091, %v186_v45   ;;  %v166_v6 = vld [vmem:[%s4303_s25 + $0xa0] sm:$0xff] }
  0x4c   : > { %v198_v7 = vadd.s32 512, %v166_v6 }
  0x4f   : > { %272 = vperm.xlu0 %4109, %v155_v46   ;;  %400 = vperm.xlu1 %4091, %v187_v47   ;;  %v174_v46 = vld [vmem:[%s4303_s25 + $0xe0] sm:$0xff] }
  0x53   : > { %275 = vperm.xlu0 %4109, %v4322_v10   ;;  %4092 = vset.pattern.permute.xlu1 %v4228_v0  ;;  %v4454_v10 = vld [vmem:[%s6500_s1 + $0x40] sm:$0xff]  }
  0x54   : > { %278 = vperm.xlu1 %4092, %v157_v48   ;;  %3542 = vmatprep.subr.bf16.mxu1 %v4454_v10  ;;  %v4139_v48 = vld [vmem:[%s6500_s1 + $0xf8] sm:$0xff]  }
  0x57   : > { %284 = vperm.xlu0 %4109, %v159_v49  }
  0x58   : > { %4093 = vset.pattern.permute.xlu1 %v4229_v1 }
  0x59   : > { %406 = vperm.xlu1 %4093, %v189_v50   ;;  %v206_v50 = vadd.s32 512, %v174_v46 }
  0x5b   : > { %287 = vperm.xlu0 %4109, %v4328_v13  }
  0x5d   : > { %4094 = vset.pattern.permute.xlu1 %v4228_v0 }
  0x5e   : > { %281 = vperm.xlu1 %4094, %v158_v51  }
  0x5f   : > { %296 = vperm.xlu0 %4109, %v163_v52  }
  0x62   : > { %4095 = vset.pattern.permute.xlu1 %v4229_v1 }
  0x63   : > { %299 = vperm.xlu0 %4109, %v4339_v17   ;;  %409 = vperm.xlu1 %4095, %v190_v54   ;;  %v6616_v54 = vmov 0 }
  0x67   : > { %308 = vperm.xlu0 %4109, %v167_v56   ;;  %412 = vperm.xlu1 %4095, %v191_v55   ;;  %v4153_v56 = vld [vmem:[%s6500_s1 + $0x78] sm:$0xff]  }
  0x6b   : > { %311 = vperm.xlu0 %4109, %v4343_v19   ;;  %4096 = vset.pattern.permute.xlu1 %v4228_v0  ;;  %v170_v19 = vld [vmem:[%s4303_s25 + $0xc0] sm:$0xff] }
  0x6c   : > { %290 = vperm.xlu1 %4096, %v161_v57   ;;  %v202_v23 = vadd.s32 512, %v170_v19 }
  0x6f   : > { %320 = vperm.xlu0 %4109, %v171_v58   ;;  %v6513_v58 = vmov 1.0|1.0  }
  0x70   : > { %4097 = vset.pattern.permute.xlu1 %v4229_v1 }
  0x71   : > { %418 = vperm.xlu1 %4097, %v193_v59  }
  0x73   : > { %323 = vperm.xlu0 %4109, %v4356_v24   ;;  %v4479_v24 = vadd.s32 128, %v4467_v18 }
  0x75   : > { %4098 = vset.pattern.permute.xlu1 %v4228_v0 }
  0x76   : > { %293 = vperm.xlu1 %4098, %v162_v60   ;;  %v207_v60 = vadd.s32 512, %v4437_v61 }
  0x77   : > { %332 = vperm.xlu0 %4109, %v4437_v61   ;;  %v4141_v61 = vld [vmem:[%s6500_s1 + $0x48] sm:$0xff]  }
  0x7a   : > { %4099 = vset.pattern.permute.xlu1 %v4229_v1 }
  0x7b   : > { %421 = vperm.xlu1 %4099, %v194_v62   ;;  %335 = vperm.xlu0 %4109, %v176_v63  }
  0x7f   : > { %424 = vperm.xlu1 %4099, %v195_v2   ;;  %4114 = vset.pattern.permute.xlu0 %v4229_v1  ;;  %v4133_v2 = vld [vmem:[%s6500_s1 + $0xc8] sm:$0xff]  }
  0x80   : > { %463 = vperm.xlu0 %4114, %v208_v3   ;;  %v177_v3 = vld [vmem:[%s4303_s25 + $0xf8] sm:$0xff]  ;;  %s3373_s25 = sshll.u32 %s4270_s13, 12  ;;  %s6458_s13 = scalar_lea.sflag [#allocation3], %s135_s29 }
  0x81   : > { %s6449_s7 = scalar_lea.hbm %s6501_s2, %s3373_s25 }
  0x83   : > { %4100 = vset.pattern.permute.xlu1 %v4228_v0 }
  0x84   : > { %302 = vperm.xlu1 %4100, %v165_v4  }
  0x88   : > { %4101 = vset.pattern.permute.xlu1 %v4229_v1 }
  0x89   : > { %430 = vperm.xlu1 %4101, %v197_v5  }
  0x8d   : > { %4102 = vset.pattern.permute.xlu1 %v4228_v0 }
  0x8e   : > { %305 = vperm.xlu1 %4102, %v166_v6   ;;  %v4134_v6 = vld [vmem:[%s6500_s1 + $0xd0] sm:$0xff]  }
  0x92   : > { %4103 = vset.pattern.permute.xlu1 %v4229_v1 }
  0x93   : > { %433 = vperm.xlu1 %4103, %v198_v7   ;;  %v4142_v7 = vld [vmem:[%s6500_s1 + $0x50] sm:$0xff]  }
  0x97   : > { %436 = vperm.xlu1 %4103, %v199_v8  }
  0x9b   : > { %v4456_v11 = vpop.permute.xlu1 %254  ;;  %4104 = vset.pattern.permute.xlu1 %v4228_v0 }
  0x9c   : > { %314 = vperm.xlu1 %4104, %v169_v9   ;;  %vm1933_vm2 = vcmp.eq.s32.totalorder %v4476_v22, %v4456_v11  ;;  %vm937_vm4 = vcmp.eq.s32.totalorder %v4479_v24, %v4456_v11  ;;  %vm2431_vm6 = vcmp.eq.s32.totalorder %v4482_v26, %v4456_v11  ;;  %v4135_v9 = vld [vmem:[%s6500_s1 + $0xd8] sm:$0xff]  }
  0x9d   : > { %v4459_v13 = vpop.permute.xlu0 %379 }
  0xa0   : > { %4105 = vset.pattern.permute.xlu1 %v4229_v1  ;;  %v4463_v16 = vpop.permute.xlu1 %373 }
  0xa1   : > { %442 = vperm.xlu1 %4105, %v201_v12   ;;  %v4465_v17 = vpop.permute.xlu0 %391 }
  0xa4   : > { %v4470_v20 = vpop.permute.xlu1 %376 }
  0xa5   : > { %4106 = vset.pattern.permute.xlu1 %v4228_v0  ;;  %v4473_v21 = vpop.permute.xlu0 %403 }
  0xa6   : > { %317 = vperm.xlu1 %4106, %v170_v19  }
  0xa8   : > { %v383_v25 = vpop.permute.xlu1 %382 }
  0xa9   : > { %vm1965_vm0 = vcmp.eq.s32.totalorder %v4476_v22, %v383_v25  ;;  %v4485_v27 = vpop.permute.xlu0 %415  ;;  %vm969_vm1 = vcmp.eq.s32.totalorder %v4479_v24, %v383_v25  ;;  %vm2463_vm3 = vcmp.eq.s32.totalorder %v4482_v26, %v383_v25 }
  0xaa   : > { %4107 = vset.pattern.permute.xlu1 %v4229_v1  ;;  %vm4494_vm5 = vmor %vm1933_vm2, %vm1965_vm0  ;;  %vm471_vm2 = vcmp.eq.s32.totalorder %v4467_v18, %v383_v25 }
  0xab   : > { %445 = vperm.xlu1 %4107, %v202_v23   ;;  %v6592_v29 = vsel %vm4494_vm5, 4294967295, %v6591_v29  ;;  %vm4504_vm7 = vmor %vm937_vm4, %vm969_vm1  ;;  %vm1435_vm4 = vcmp.eq.s32.totalorder %v4543_v43, %v4456_v11  ;;  %vm1465_vm5 = vcmp.eq.s32.totalorder %v4543_v43, %v4470_v20  ;;  %v4137_v23 = vld [vmem:[%s6500_s1 + $0xe8] sm:$0xff]  }
  0xac   : > { %v6595_v32 = vsel %vm4504_vm7, 4294967295, %v6594_v32  ;;  %vm4508_vm8 = vmor %vm2431_vm6, %vm2463_vm3  ;;  %vm343_vm6 = vcmp.eq.s32.totalorder %v4467_v18, %v4456_v11 }
  0xad   : > { %v4500_v30 = vpop.permute.xlu1 %257  ;;  %v4502_v31 = vpop.permute.xlu0 %427  ;;  %v6597_v33 = vsel %vm4508_vm8, 4294967295, %v6596_v33 }
  0xae   : > { %6593 = vst [vmem:[#allocation5_spill] sm:$0xff] %v4502_v31  ;;  %vm1934_vm11 = vcmp.eq.s32.totalorder %v4476_v22, %v4500_v30  ;;  %vm938_vm14 = vcmp.eq.s32.totalorder %v4479_v24, %v4500_v30  ;;  %vm2432_vm0 = vcmp.eq.s32.totalorder %v4482_v26, %v4500_v30  ;;  %vm344_vm8 = vcmp.eq.s32.totalorder %v4467_v18, %v4500_v30 }
  0xaf   : > { %448 = vperm.xlu1 %4107, %v203_v28  }
  0xb1   : > { %v4512_v34 = vpop.permute.xlu0 %439 }
  0xb2   : > { %v386_v36 = vpop.permute.xlu1 %385 }
  0xb3   : > { %4108 = vset.pattern.permute.xlu1 %v4228_v0  ;;  %vm1966_vm9 = vcmp.eq.s32.totalorder %v4476_v22, %v386_v36  ;;  %vm970_vm10 = vcmp.eq.s32.totalorder %v4479_v24, %v386_v36  ;;  %vm2464_vm12 = vcmp.eq.s32.totalorder %v4482_v26, %v386_v36  ;;  %vm6618_vm7 = vcmp.eq.s32.totalorder %v4467_v18, %v386_v36 }
  0xb4   : > { %326 = vperm.xlu1 %4108, %v173_v35   ;;  %vm4525_vm13 = vmor %vm1934_vm11, %vm1966_vm9  ;;  %vm1467_vm9 = vcmp.eq.s32.totalorder %v4543_v43, %v383_v25  ;;  %v4146_v35 = vld [vmem:[%s6500_s1 + $0x108] sm:$0xff]  }
  0xb5   : > { %v4518_v38 = vpop.permute.xlu0 %451  ;;  %v6600_v40 = vsel %vm4525_vm13, 4294967295, %v6599_v40  ;;  %vm4531_vm15 = vmor %vm938_vm14, %vm970_vm10  ;;  %vm468_vm10 = vcmp.eq.s32.totalorder %v4467_v18, %v4463_v16 }
  0xb6   : > { %6598 = vst [vmem:[#allocation6_spill] sm:$0xff] %v4518_v38  ;;  %v4523_v39 = vpop.permute.xlu1 %388  ;;  %v6602_v41 = vsel %vm4531_vm15, 4294967295, %v6601_v41  ;;  %vm4538_vm1 = vmor %vm2432_vm0, %vm2464_vm12  ;;  %vm1464_vm0 = vcmp.eq.s32.totalorder %v4543_v43, %v4463_v16 }
  0xb7   : > { %v6604_v42 = vsel %vm4538_vm1, 4294967295, %v6603_v42  ;;  %vm4560_vm11 = vmor %vm343_vm6, %vm471_vm2  ;;  %vm469_vm6 = vcmp.eq.s32.totalorder %v4467_v18, %v4470_v20  ;;  %vm966_vm2 = vcmp.eq.s32.totalorder %v4479_v24, %v4463_v16 }
  0xb8   : > { %4110 = vset.pattern.permute.xlu1 %v4229_v1  ;;  %vm4587_vm12 = vmor %vm1435_vm4, %vm1467_vm9 }
  0xb9   : > { %454 = vperm.xlu1 %4110, %v205_v37   ;;  %vm4611_vm13 = vmor %vm344_vm8, %vm6618_vm7  ;;  %v4138_v37 = vld [vmem:[%s6500_s1 + $0xf0] sm:$0xff]  }
  0xba   : > { %v4546_v44 = vpop.permute.xlu0 %245 }
  0xbb   : > { %v4548_v45 = vpop.permute.xlu1 %266  ;;  %vm340_vm3 = vcmp.eq.s32.totalorder %v4467_v18, %v4546_v44  ;;  %vm6615_vm4 = vcmp.eq.s32.totalorder %v4479_v24, %v4546_v44 }
  0xbc   : > { %vm4567_vm14 = vmor %vm340_vm3, %vm468_vm10  ;;  %vm6610_vm3 = vcmp.eq.s32.totalorder %v4543_v43, %v4546_v44 }
  0xbd   : > { %4111 = vset.pattern.permute.xlu1 %v4228_v0  ;;  %vm4583_vm10 = vmor %vm6610_vm3, %vm1464_vm0  ;;  %vm1468_vm0 = vcmp.eq.s32.totalorder %v4543_v43, %v386_v36 }
  0xbe   : > { %v4576_v49 = vpop.permute.xlu0 %248  ;;  %329 = vperm.xlu1 %4111, %v174_v46   ;;  %vm4603_vm9 = vmor %vm6615_vm4, %vm966_vm2  ;;  %vm470_vm2 = vcmp.eq.s32.totalorder %v4467_v18, %v4459_v13  ;;  %vm1436_vm4 = vcmp.eq.s32.totalorder %v4543_v43, %v4500_v30  ;;  %v4147_v30 = vld [vmem:[%s6500_s1 + $0x68] sm:$0xff]   ;;  %v4150_v46 = vld [vmem:[%s6500_s1 + $0x70] sm:$0xff]  }
  0xbf   : > { %vm341_vm1 = vcmp.eq.s32.totalorder %v4467_v18, %v4576_v49  ;;  %v6617_v54 = vsel %vm4603_vm9, 4294967295, %v6616_v54  ;;  %vm6621_vm7 = vcmp.eq.s32.totalorder %v4543_v43, %v4576_v49  ;;  %vm1968_vm9 = vcmp.eq.s32.totalorder %v4476_v22, %v4465_v17 }
  0xc0   : > { %v4607_v55 = vpop.permute.xlu1 %394  ;;  %vm501_vm3 = vmor %vm341_vm1, %vm469_vm6 }
  0xc1   : > { %vm3048_vm15 = vmpackc.low %vm501_vm3, %vm4567_vm14 }
  0xc2   : > { %v4623_v57 = vpop.permute.xlu0 %251  ;;  %4112 = vset.pattern.permute.xlu1 %v4229_v1  ;;  %3510 = vmatprep.mubr.msk.bf16.mxu1 %vm3048_vm15, %v6513_v58  ;;  %vm1497_vm8 = vmor %vm6621_vm7, %vm1465_vm5  ;;  %vm1466_vm15 = vcmp.eq.s32.totalorder %v4543_v43, %v4459_v13 }
  0xc3   : > { %vm4630_vm1 = vmor %vm1436_vm4, %vm1468_vm0  ;;  %457 = vperm.xlu1 %4112, %v206_v50   ;;  %vm342_vm6 = vcmp.eq.s32.totalorder %v4467_v18, %v4623_v57  ;;  %vm1434_vm5 = vcmp.eq.s32.totalorder %v4543_v43, %v4623_v57 }
  0xc4   : > { %vm3192_vm14 = vmpackc.low %vm1497_vm8, %vm4583_vm10 }
  0xc5   : > { %3606 = vmatprep.mubr.msk.bf16.mxu0 %vm3192_vm14, %v6513_v58  ;;  %vm502_vm3 = vmor %vm342_vm6, %vm470_vm2  ;;  %v4647_v62 = vpop.permute.xlu1 %269  ;;  %vm474_vm6 = vcmp.eq.s32.totalorder %v4467_v18, %v4465_v17 }
  0xc6   : > { %vm3050_vm10 = vmpackc.low %vm4560_vm11, %vm502_vm3  ;;  %v4651_v63 = vpop.permute.xlu0 %260  ;;  %vm473_vm11 = vcmp.eq.s32.totalorder %v4467_v18, %v4523_v39  ;;  %vm475_vm3 = vcmp.eq.s32.totalorder %v4467_v18, %v4607_v55 }
  0xc7   : > { %3511 = vmatmul.mubr.msk.bf16.vlgmr.msra.gmra.mrb[0].mxu1 %vm3050_vm10, %v6513_v58  ;;  %vm1498_vm0 = vmor %vm1434_vm5, %vm1466_vm15  ;;  %460 = vperm.xlu1 %4112, %v207_v60   ;;  %vm345_vm4 = vcmp.eq.s32.totalorder %v4467_v18, %v4651_v63  ;;  %vm1437_vm7 = vcmp.eq.s32.totalorder %v4543_v43, %v4651_v63  ;;  %vm347_vm10 = vcmp.eq.s32.totalorder %v4467_v18, %v4548_v45  ;;  %v6632_v60 = vmov 0 }
  0xc8   : > { %vm3194_vm2 = vmpackc.low %vm4587_vm12, %vm1498_vm0  ;;  %3543 = vmatpush3.bf16.msra.mxu1 %v4454_v10  ;;  %vm1469_vm12 = vcmp.eq.s32.totalorder %v4543_v43, %v4523_v39  ;;  %v4143_v10 = vld [vmem:[%s6500_s1 + $0x58] sm:$0xff]  }
  0xc9   : > { %3607 = vmatmul.mubr.msk.bf16.vlgmr.msra.gmra.mrb[0].mxu0 %vm3194_vm2, %v6513_v58  ;;  %vm505_vm8 = vmor %vm345_vm4, %vm473_vm11  ;;  %3544 = vmatprep.subr.bf16.mxu1 %v4141_v61  ;;  %vm1471_vm11 = vcmp.eq.s32.totalorder %v4543_v43, %v4607_v55 }
  0xca   : > { %vm3052_vm14 = vmpackc.low %vm505_vm8, %vm4611_vm13  ;;  %3639 = vmatpush3.bf16.msra.mxu0 %v4423_v53  ;;  %v4675_v4 = vpop.permute.xlu0 %263  ;;  %v4678_v5 = vpop.permute.xlu1 %397  ;;  %vm1439_vm8 = vcmp.eq.s32.totalorder %v4543_v43, %v4548_v45 }
  0xcb   : > { %3514 = vmatprep.mubr.msk.bf16.mxu1 %vm3052_vm14, %v6513_v58  ;;  %vm1501_vm15 = vmor %vm1437_vm7, %vm1469_vm12  ;;  %3640 = vmatprep.subr.bf16.mxu0 %v4133_v2  ;;  %vm346_vm5 = vcmp.eq.s32.totalorder %v4467_v18, %v4675_v4  ;;  %vm1438_vm2 = vcmp.eq.s32.totalorder %v4543_v43, %v4675_v4  ;;  %vm476_vm12 = vcmp.eq.s32.totalorder %v4467_v18, %v4678_v5 }
  0xcc   : > { %vm3196_vm13 = vmpackc.low %vm1501_vm15, %vm4630_vm1  ;;  %4113 = vset.pattern.permute.xlu1 %v4228_v0  ;;  %vm1470_vm1 = vcmp.eq.s32.totalorder %v4543_v43, %v4465_v17  ;;  %v209_v0 = vadd.s32 512, %v177_v3  ;;  %3545 = vmatpush3.bf16.msra.mxu1 %v4141_v61  ;;  %v4845_v61 = vld [vmem:[%s6500_s1 + $0x100] sm:$0xff]  }
  0xcd   : > { %3610 = vmatprep.mubr.msk.bf16.mxu0 %vm3196_vm13, %v6513_v58  ;;  %338 = vperm.xlu1 %4113, %v177_v3   ;;  %vm506_vm0 = vmor %vm346_vm5, %vm474_vm6  ;;  %vm348_vm5 = vcmp.eq.s32.totalorder %v4467_v18, %v4647_v62 }
  0xce   : > { %vm507_vm4 = vmor %vm347_vm10, %vm475_vm3  ;;  %3641 = vmatpush3.bf16.msra.mxu0 %v4133_v2  ;;  %v4705_v53 = vpop.permute.xlu0 %272  ;;  %v4707_v8 = vpop.permute.xlu1 %400  ;;  %3546 = vmatprep.subr.bf16.mxu1 %v4142_v7 }
  0xcf   : > { %vm3054_vm7 = vmpackc.low %vm507_vm4, %vm506_vm0  ;;  %3642 = vmatprep.subr.bf16.mxu0 %v4134_v6  ;;  %vm349_vm15 = vcmp.eq.s32.totalorder %v4467_v18, %v4705_v53  ;;  %vm477_vm3 = vcmp.eq.s32.totalorder %v4467_v18, %v4707_v8  ;;  %vm1472_vm0 = vcmp.eq.s32.totalorder %v4543_v43, %v4678_v5  ;;  %vm1473_vm4 = vcmp.eq.s32.totalorder %v4543_v43, %v4707_v8 }
  0xd0   : > { %3515 = vmatmul.mubr.msk.bf16.gmra.mrb[4].mxu1 %vm3054_vm7, %v6513_v58  ;;  %vm1502_vm14 = vmor %vm1438_vm2, %vm1470_vm1  ;;  %vm1441_vm1 = vcmp.eq.s32.totalorder %v4543_v43, %v4705_v53  ;;  %vm1440_vm7 = vcmp.eq.s32.totalorder %v4543_v43, %v4647_v62 }
  0xd1   : > { %vm1503_vm6 = vmor %vm1439_vm8, %vm1471_vm11  ;;  %4115 = vset.pattern.permute.xlu1 %v4229_v1  ;;  %v4136_v1 = vld [vmem:[%s6500_s1 + $0xe0] sm:$0xff]   ;;  %3547 = vmatpush3.bf16.msra.mxu1 %v4142_v7 }
  0xd2   : > { %vm3198_vm13 = vmpackc.low %vm1503_vm6, %vm1502_vm14  ;;  %466 = vperm.xlu1 %4115, %v209_v0   ;;  %3643 = vmatpush3.bf16.msra.mxu0 %v4134_v6  ;;  %v4731_v11 = vpop.permute.xlu0 %275 }
  0xd3   : > { %3611 = vmatmul.mubr.msk.bf16.gmra.mrb[4].mxu0 %vm3198_vm13, %v6513_v58  ;;  %vm508_vm10 = vmor %vm348_vm5, %vm476_vm12  ;;  %3644 = vmatprep.subr.bf16.mxu0 %v4135_v9  ;;  %v4742_v12 = vpop.permute.xlu1 %278  ;;  %vm350_vm14 = vcmp.eq.s32.totalorder %v4467_v18, %v4731_v11  ;;  %vm478_vm12 = vcmp.eq.s32.totalorder %v4467_v18, %v4473_v21 }
  0xd4   : > { %vm509_vm2 = vmor %vm349_vm15, %vm477_vm3  ;;  %3548 = vmatprep.subr.bf16.mxu1 %v4143_v10  ;;  %vm1442_vm15 = vcmp.eq.s32.totalorder %v4543_v43, %v4731_v11  ;;  %vm1474_vm3 = vcmp.eq.s32.totalorder %v4543_v43, %v4473_v21 }
  0xd5   : > { %vm3056_vm11 = vmpackc.low %vm509_vm2, %vm508_vm10  ;;  %3549 = vmatpush3.bf16.msra.mxu1 %v4143_v10  ;;  %vm351_vm10 = vcmp.eq.s32.totalorder %v4467_v18, %v4742_v12 }
  0xd6   : > { %3518 = vmatprep.mubr.msk.bf16.mxu1 %vm3056_vm11, %v6513_v58  ;;  %vm1504_vm8 = vmor %vm1440_vm7, %vm1472_vm0  ;;  %3645 = vmatpush3.bf16.msra.mxu0 %v4135_v9  ;;  %v4754_v19 = vpop.permute.xlu0 %284  ;;  %vm1443_vm7 = vcmp.eq.s32.totalorder %v4543_v43, %v4742_v12 }
  0xd7   : > { %vm1505_vm6 = vmor %vm1441_vm1, %vm1473_vm4  ;;  %3646 = vmatprep.subr.bf16.mxu0 %v4136_v1  ;;  %3550 = vmatprep.subr.bf16.mxu1 %v4144_v14 }
  0xd8   : > { %vm3200_vm13 = vmpackc.low %vm1505_vm6, %vm1504_vm8  ;;  %v4764_v25 = vpop.permute.xlu1 %406  ;;  %vm1931_vm6 = vcmp.eq.s32.totalorder %v4476_v22, %v4576_v49 }
  0xd9   : > { %3614 = vmatprep.mubr.msk.bf16.mxu0 %vm3200_vm13, %v6513_v58  ;;  %vm4766_vm5 = vmor %vm350_vm14, %vm478_vm12  ;;  %vm479_vm0 = vcmp.eq.s32.totalorder %v4467_v18, %v4764_v25  ;;  %vm1475_vm2 = vcmp.eq.s32.totalorder %v4543_v43, %v4764_v25  ;;  %3551 = vmatpush3.bf16.msra.mxu1 %v4144_v14  ;;  %vm1930_vm14 = vcmp.eq.s32.totalorder %v4476_v22, %v4546_v44 }
  0xda   : > { %vm4779_vm1 = vmor %vm1442_vm15, %vm1474_vm3  ;;  %3647 = vmatpush3.bf16.msra.mxu0 %v4136_v1  ;;  %v4783_v36 = vpop.permute.xlu0 %287  ;;  %3552 = vmatprep.subr.bf16.mxu1 %v4147_v30  ;;  %vm1962_vm15 = vcmp.eq.s32.totalorder %v4476_v22, %v4463_v16  ;;  %vm1964_vm3 = vcmp.eq.s32.totalorder %v4476_v22, %v4459_v13  ;;  %vm1932_vm13 = vcmp.eq.s32.totalorder %v4476_v22, %v4623_v57 }
  0xdb   : > { %vm511_vm4 = vmor %vm351_vm10, %vm479_vm0  ;;  %3648 = vmatprep.subr.bf16.mxu0 %v4137_v23 }
  0xdc   : > { %vm3058_vm11 = vmpackc.low %vm511_vm4, %vm4766_vm5  ;;  %vm1963_vm5 = vcmp.eq.s32.totalorder %v4476_v22, %v4470_v20 }
  0xdd   : > { %3519 = vmatmul.mubr.msk.bf16.gmra.mrb[8].mxu1 %vm3058_vm11, %v6513_v58  ;;  %vm1507_vm8 = vmor %vm1443_vm7, %vm1475_vm2  ;;  %v4800_v47 = vpop.permute.xlu1 %281  ;;  %vm1969_vm11 = vcmp.eq.s32.totalorder %v4476_v22, %v4607_v55 }
  0xde   : > { %vm3202_vm12 = vmpackc.low %vm1507_vm8, %vm4779_vm1  ;;  %3649 = vmatpush3.bf16.msra.mxu0 %v4137_v23  ;;  %v4814_v50 = vpop.permute.xlu0 %296  ;;  %3553 = vmatpush3.bf16.msra.mxu1 %v4147_v30  ;;  %v4149_v23 = vld [vmem:[%s6500_s1 + $0x118] sm:$0xff]   ;;  %v4151_v30 = vld [vmem:[%s6500_s1 + $0x120] sm:$0xff]  }
  0xdf   : > { %3615 = vmatmul.mubr.msk.bf16.gmra.mrb[8].mxu0 %vm3202_vm12, %v6513_v58  ;;  %3650 = vmatprep.subr.bf16.mxu0 %v4138_v37  ;;  %vm4821_vm10 = vmor %vm1930_vm14, %vm1962_vm15  ;;  %vm352_vm14 = vcmp.eq.s32.totalorder %v4467_v18, %v4800_v47  ;;  %vm353_vm12 = vcmp.eq.s32.totalorder %v4467_v18, %v4754_v19  ;;  %vm1444_vm15 = vcmp.eq.s32.totalorder %v4543_v43, %v4800_v47 }
  0xe0   : > { %vm4825_vm0 = vmor %vm1931_vm6, %vm1963_vm5  ;;  %3554 = vmatprep.subr.bf16.mxu1 %v4150_v46 }
  0xe1   : > { %vm4838_vm1 = vmor %vm1932_vm13, %vm1964_vm3  ;;  %vm1445_vm13 = vcmp.eq.s32.totalorder %v4543_v43, %v4754_v19 }
  0xe2   : > { %3651 = vmatpush3.bf16.msra.mxu0 %v4138_v37  ;;  %v4836_v59 = vpop.permute.xlu1 %409  ;;  %v6633_v60 = vsel %vm4838_vm1, 4294967295, %v6632_v60  ;;  %3555 = vmatpush3.bf16.msra.mxu1 %v4150_v46  ;;  %v4855_v2 = vpop.permute.xlu0 %299 }
  0xe3   : > { %3652 = vmatprep.subr.bf16.mxu0 %v4139_v48  ;;  %vm480_vm4 = vcmp.eq.s32.totalorder %v4467_v18, %v4836_v59  ;;  %vm1476_vm8 = vcmp.eq.s32.totalorder %v4543_v43, %v4836_v59  ;;  %3556 = vmatprep.subr.bf16.mxu1 %v4153_v56 }
  0xe4   : > { %vm512_vm6 = vmor %vm352_vm14, %vm480_vm4  ;;  %vm1936_vm14 = vcmp.eq.s32.totalorder %v4476_v22, %v4675_v4 }
  0xe5   : > { %vm1508_vm7 = vmor %vm1444_vm15, %vm1476_vm8  ;;  %vm482_vm15 = vcmp.eq.s32.totalorder %v4467_v18, %v4485_v27 }
  0xe6   : > { %3653 = vmatpush3.bf16.msra.mxu0 %v4139_v48  ;;  %v4861_v3 = vpop.permute.xlu1 %412  ;;  %3557 = vmatpush3.bf16.msra.mxu1 %v4153_v56  ;;  %v4880_v6 = vpop.permute.xlu0 %308  ;;  %v6678_v48 = vmov 0 }
  0xe7   : > { %3686 = vmatprep.subr.bf16.mxu0 %v4845_v61  ;;  %vm481_vm3 = vcmp.eq.s32.totalorder %v4467_v18, %v4861_v3  ;;  %vm1477_vm5 = vcmp.eq.s32.totalorder %v4543_v43, %v4861_v3  ;;  %3734 = vmatprep.subr.bf16.mxu1 %v4336_v15  ;;  %v6635_v15 = vmov 0 }
  0xe8   : > { %vm513_vm2 = vmor %vm353_vm12, %vm481_vm3 }
  0xe9   : > { %vm3060_vm4 = vmpackc.low %vm513_vm2, %vm512_vm6  ;;  %vm1937_vm2 = vcmp.eq.s32.totalorder %v4476_v22, %v4548_v45  ;;  %vm354_vm6 = vcmp.eq.s32.totalorder %v4467_v18, %v4783_v36 }
  0xea   : > { %3522 = vmatprep.mubr.msk.bf16.mxu1 %vm3060_vm4, %v6513_v58  ;;  %vm1509_vm1 = vmor %vm1445_vm13, %vm1477_vm5  ;;  %v4909_v10 = vpop.permute.xlu0 %311 }
  0xeb   : > { %vm3204_vm8 = vmpackc.low %vm1509_vm1, %vm1508_vm7  ;;  %v4882_v7 = vpop.permute.xlu1 %290  ;;  %vm1446_vm1 = vcmp.eq.s32.totalorder %v4543_v43, %v4783_v36  ;;  %vm1478_vm7 = vcmp.eq.s32.totalorder %v4543_v43, %v4485_v27 }
  0xec   : > { %3618 = vmatprep.mubr.msk.bf16.mxu0 %vm3204_vm8, %v6513_v58  ;;  %vm4887_vm12 = vmor %vm1936_vm14, %vm1968_vm9  ;;  %vm1447_vm9 = vcmp.eq.s32.totalorder %v4543_v43, %v4882_v7 }
  0xed   : > { %v6636_v15 = vsel %vm4887_vm12, 4294967295, %v6635_v15  ;;  %vm4895_vm3 = vmor %vm1937_vm2, %vm1969_vm11  ;;  %vm355_vm11 = vcmp.eq.s32.totalorder %v4467_v18, %v4882_v7  ;;  %vm1935_vm12 = vcmp.eq.s32.totalorder %v4476_v22, %v4651_v63 }
  0xee   : > { %vm514_vm13 = vmor %vm354_vm6, %vm482_vm15  ;;  %v4925_v14 = vpop.permute.xlu0 %320 }
  0xef   : > { %vm1510_vm14 = vmor %vm1446_vm1, %vm1478_vm7  ;;  %vm1967_vm7 = vcmp.eq.s32.totalorder %v4476_v22, %v4523_v39 }
  0xf0   : > { %v4907_v9 = vpop.permute.xlu1 %418  ;;  %vm6640_vm1 = vmpackc.low %vm4825_vm0, %vm4821_vm10  ;;  %vm1940_vm0 = vcmp.eq.s32.totalorder %v4476_v22, %v4731_v11 }
  0xf1   : > { %vm483_vm5 = vcmp.eq.s32.totalorder %v4467_v18, %v4907_v9  ;;  %vm1479_vm4 = vcmp.eq.s32.totalorder %v4543_v43, %v4907_v9 }
  0xf2   : > { %vm515_vm8 = vmor %vm355_vm11, %vm483_vm5  ;;  %vm1970_vm5 = vcmp.eq.s32.totalorder %v4476_v22, %v4678_v5  ;;  %v4966_v37 = vpop.permute.xlu0 %323 }
  0xf3   : > { %vm3062_vm2 = vmpackc.low %vm515_vm8, %vm514_vm13  ;;  %vm1971_vm13 = vcmp.eq.s32.totalorder %v4476_v22, %v4707_v8 }
  0xf4   : > { %3523 = vmatmul.mubr.msk.bf16.gmra.mrb[12].mxu1 %vm3062_vm2, %v6513_v58  ;;  %vm1511_vm6 = vmor %vm1447_vm9, %vm1479_vm4  ;;  %vm1939_vm9 = vcmp.eq.s32.totalorder %v4476_v22, %v4705_v53  ;;  %vm1972_vm4 = vcmp.eq.s32.totalorder %v4476_v22, %v4473_v21  ;;  %vm1938_vm2 = vcmp.eq.s32.totalorder %v4476_v22, %v4647_v62 }
  0xf5   : > { %vm3206_vm15 = vmpackc.low %vm1511_vm6, %vm1510_vm14  ;;  %v4920_v1 = vpop.permute.xlu1 %293  ;;  %vm357_vm6 = vcmp.eq.s32.totalorder %v4467_v18, %v4814_v50 }
  0xf6   : > { %6639 = vst [vmem:[#allocation8_spill] sm:$0xff] %v4920_v1  ;;  %3619 = vmatmul.mubr.msk.bf16.gmra.mrb[12].mxu0 %vm3206_vm15, %v6513_v58  ;;  %vm4939_vm11 = vmor %vm1935_vm12, %vm1967_vm7  ;;  %vm6645_vm12 = vnez %v6600_v40  ;;  %vm6649_vm7 = vnez %v6633_v60  ;;  %v5005_v51 = vpop.permute.xlu0 %332  ;;  %v4152_v60 = vld [vmem:[%s6500_s1 + $0x128] sm:$0xff]   ;;  %v6709_v40 = vmov 0 }
  0xf7   : > { %3654 = vmatprep.mubr.msk.bf16.mxu0 %vm6640_vm1, %v6513_v58  ;;  %vm4947_vm10 = vmor %vm1939_vm9, %vm1971_vm13  ;;  %vm6648_vm1 = vnez %v6592_v29  ;;  %vm356_vm13 = vcmp.eq.s32.totalorder %v4467_v18, %v4920_v1  ;;  %v4148_v29 = vld [vmem:[%s6500_s1 + $0x110] sm:$0xff]  }
  0xf8   : > { %vm3268_vm14 = vmpackc.low %vm4939_vm11, %vm6645_vm12 }
  0xf9   : > { %vm4970_vm15 = vmor %vm1938_vm2, %vm1970_vm5 }
  0xfa   : > { %v4943_v28 = vpop.permute.xlu1 %421  ;;  %vm6650_vm9 = vmpackc.low %vm6648_vm1, %vm6649_vm7  ;;  %vm1973_vm1 = vcmp.eq.s32.totalorder %v4476_v22, %v4764_v25 }
  0xfb   : > { %vm484_vm8 = vcmp.eq.s32.totalorder %v4467_v18, %v4943_v28  ;;  %vm3272_vm11 = vmpackc.low %vm4947_vm10, %vm4970_vm15 }
  0xfc   : > { %vm4988_vm5 = vmor %vm1940_vm0, %vm1972_vm4  ;;  %vm486_vm0 = vcmp.eq.s32.totalorder %v4467_v18, %v4502_v31 }
  0xfd   : > { %vm516_vm2 = vmor %vm356_vm13, %vm484_vm8  ;;  %vm1943_vm8 = vcmp.eq.s32.totalorder %v4476_v22, %v4754_v19 }
  0xfe   : > { %3655 = vmatmul.mubr.msk.bf16.vlgmr.msra.gmra.mrb[0].mxu0 %vm6650_vm9, %v6513_v58  ;;  %v4980_v46 = vpop.permute.xlu1 %424  ;;  %vm358_vm9 = vcmp.eq.s32.totalorder %v4467_v18, %v4855_v2 }
  0xff   : > { %3658 = vmatprep.mubr.msk.bf16.mxu0 %vm3268_vm14, %v6513_v58  ;;  %vm485_vm12 = vcmp.eq.s32.totalorder %v4467_v18, %v4980_v46  ;;  %3687 = vmatpush3.bf16.msra.mxu0 %v4845_v61  ;;  %vm1941_vm14 = vcmp.eq.s32.totalorder %v4476_v22, %v4742_v12  ;;  %v4154_v61 = vld [vmem:[%s6500_s1 + $0x130] sm:$0xff]  }
 0x100   : > { %vm517_vm7 = vmor %vm357_vm6, %vm485_vm12  ;;  %3688 = vmatprep.subr.bf16.mxu0 %v4146_v35  ;;  %vm1975_vm6 = vcmp.eq.s32.totalorder %v4476_v22, %v4861_v3 }
 0x101   : > { %vm3064_vm4 = vmpackc.low %vm517_vm7, %vm516_vm2  ;;  %vm1974_vm2 = vcmp.eq.s32.totalorder %v4476_v22, %v4836_v59 }
 0x102   : > { %3526 = vmatprep.mubr.msk.bf16.mxu1 %vm3064_vm4, %v6513_v58  ;;  %vm5014_vm13 = vmor %vm1941_vm14, %vm1973_vm1  ;;  %vm6660_vm4 = vnez %v6636_v15  ;;  %vm1979_vm1 = vcmp.eq.s32.totalorder %v4476_v22, %v4980_v46  ;;  %v5061_v15 = vpop.permute.xlu0 %335 }
 0x103   : > { %v5018_v56 = vpop.permute.xlu1 %302  ;;  %vm5020_vm12 = vmor %vm358_vm9, %vm486_vm0  ;;  %3689 = vmatpush3.bf16.msra.mxu0 %v4146_v35  ;;  %vm1942_vm9 = vcmp.eq.s32.totalorder %v4476_v22, %v4800_v47  ;;  %vm1977_vm0 = vcmp.eq.s32.totalorder %v4476_v22, %v4907_v9  ;;  %v6662_v35 = vmov 0  ;;  %6664 = vst [vmem:[#allocation10_spill] sm:$0xff] %v5061_v15 }
 0x104   : > { %6655 = vst [vmem:[#allocation9_spill] sm:$0xff] %v5018_v56  ;;  %vm5026_vm7 = vmor %vm1943_vm8, %vm1975_vm6  ;;  %3690 = vmatprep.subr.bf16.mxu0 %v4148_v29  ;;  %vm1947_vm6 = vcmp.eq.s32.totalorder %v4476_v22, %v4814_v50  ;;  %vm359_vm10 = vcmp.eq.s32.totalorder %v4467_v18, %v5018_v56 }
 0x105   : > { %vm6661_vm14 = vmpackc.low %vm4895_vm3, %vm6660_vm4 }
 0x106   : > { %3659 = vmatmul.mubr.msk.bf16.gmra.mrb[4].mxu0 %vm6661_vm14, %v6513_v58  ;;  %vm5047_vm8 = vmor %vm1942_vm9, %vm1974_vm2  ;;  %vm1945_vm2 = vcmp.eq.s32.totalorder %v4476_v22, %v4882_v7 }
 0x107   : > { %v6663_v35 = vsel %vm5047_vm8, 4294967295, %v6662_v35  ;;  %3662 = vmatprep.mubr.msk.bf16.mxu0 %vm3272_vm11, %v6513_v58  ;;  %3691 = vmatpush3.bf16.msra.mxu0 %v4148_v29  ;;  %vm5071_vm9 = vmor %vm1945_vm2, %vm1977_vm0  ;;  %vm1944_vm11 = vcmp.eq.s32.totalorder %v4476_v22, %v4783_v36  ;;  %vm1976_vm0 = vcmp.eq.s32.totalorder %v4476_v22, %v4485_v27  ;;  %vm1978_vm2 = vcmp.eq.s32.totalorder %v4476_v22, %v4943_v28 }
 0x108   : > { %v5069_v0 = vpop.permute.xlu1 %430  ;;  %3692 = vmatprep.subr.bf16.mxu0 %v4149_v23  ;;  %vm5089_vm4 = vmor %vm1947_vm6, %vm1979_vm1  ;;  %vm1946_vm1 = vcmp.eq.s32.totalorder %v4476_v22, %v4920_v1  ;;  %vm1948_vm6 = vcmp.eq.s32.totalorder %v4476_v22, %v4855_v2  ;;  %v6731_v1 = vmov 0 }
 0x109   : > { %vm487_vm15 = vcmp.eq.s32.totalorder %v4467_v18, %v5069_v0  ;;  %vm5098_vm8 = vmor %vm1944_vm11, %vm1976_vm0 }
 0x10a   : > { %vm519_vm14 = vmor %vm359_vm10, %vm487_vm15  ;;  %vm1980_vm10 = vcmp.eq.s32.totalorder %v4476_v22, %v4502_v31  ;;  %vm1981_vm15 = vcmp.eq.s32.totalorder %v4476_v22, %v5069_v0  ;;  %v6674_v31 = vmov 1.0|1.0  }
 0x10b   : > { %vm3066_vm3 = vmpackc.low %vm519_vm14, %vm5020_vm12  ;;  %3693 = vmatpush3.bf16.msra.mxu0 %v4149_v23  ;;  %v5111_v23 = vpop.permute.xlu0 %463  ;;  %vm935_vm14 = vcmp.eq.s32.totalorder %v4479_v24, %v4576_v49  ;;  %vm1949_vm12 = vcmp.eq.s32.totalorder %v4476_v22, %v5018_v56  ;;  %v6701_v56 = vmov 0 }
 0x10c   : > { %3527 = vmatmul.mubr.msk.bf16.gmra.mrb[16].mxu1 %vm3066_vm3, %v6513_v58  ;;  %3694 = vmatprep.subr.bf16.mxu0 %v4151_v30  ;;  %vm5119_vm3 = vmor %vm1946_vm1, %vm1978_vm2  ;;  %vm6676_vm2 = vnez %v6663_v35  ;;  %v6682_v35 = vmov 0 }
 0x10d   : > { %v5113_v58 = vpop.permute.xlu1 %305  ;;  %vm6675_vm11 = vmpackc.low %vm5014_vm13, %vm4988_vm5 }
 0x10e   : > { %6671 = vst [vmem:[#allocation11_spill] sm:$0xff] %v5113_v58  ;;  %3663 = vmatmul.mubr.msk.bf16.gmra.mrb[8].mxu0 %vm6675_vm11, %v6674_v31  ;;  %vm6677_vm1 = vmpackc.low %vm5026_vm7, %vm6676_vm2  ;;  %vm967_vm7 = vcmp.eq.s32.totalorder %v4479_v24, %v4470_v20  ;;  %vm360_vm13 = vcmp.eq.s32.totalorder %v4467_v18, %v5113_v58 }
 0x10f   : > { %3666 = vmatprep.mubr.msk.bf16.mxu0 %vm6677_vm1, %v6674_v31  ;;  %vm5145_vm5 = vmor %vm1948_vm6, %vm1980_vm10  ;;  %3695 = vmatpush3.bf16.msra.mxu0 %v4151_v30  ;;  %vm2428_vm6 = vcmp.eq.s32.totalorder %v4482_v26, %v4546_v44  ;;  %vm2460_vm1 = vcmp.eq.s32.totalorder %v4482_v26, %v4463_v16  ;;  %v6685_v44 = vmov 0  ;;  %v4155_v16 = vld [vmem:[%s6500_s1 + $0x138] sm:$0xff]  }
 0x110   : > { %v6679_v48 = vsel %vm5145_vm5, 4294967295, %v6678_v48  ;;  %vm5151_vm11 = vmor %vm1949_vm12, %vm1981_vm15  ;;  %3696 = vmatprep.subr.bf16.mxu0 %v4152_v60  ;;  %vm1950_vm12 = vcmp.eq.s32.totalorder %v4476_v22, %v5113_v58  ;;  %vm1952_vm5 = vcmp.eq.s32.totalorder %v4476_v22, %v4909_v10 }
 0x111   : > { %vm5164_vm2 = vmor %vm935_vm14, %vm967_vm7  ;;  %vm2429_vm7 = vcmp.eq.s32.totalorder %v4482_v26, %v4576_v49 }
 0x112   : > { %v6683_v35 = vsel %vm5164_vm2, 4294967295, %v6682_v35  ;;  %v5168_v30 = vpop.permute.xlu1 %433  ;;  %vm5184_vm0 = vmor %vm2428_vm6, %vm2460_vm1  ;;  %vm2461_vm1 = vcmp.eq.s32.totalorder %v4482_v26, %v4470_v20  ;;  %vm361_vm6 = vcmp.eq.s32.totalorder %v4467_v18, %v4880_v6  ;;  %v6692_v20 = vmov 0 }
 0x113   : > { %vm488_vm10 = vcmp.eq.s32.totalorder %v4467_v18, %v5168_v30  ;;  %vm1982_vm14 = vcmp.eq.s32.totalorder %v4476_v22, %v5168_v30  ;;  %3697 = vmatpush3.bf16.msra.mxu0 %v4152_v60  ;;  %v6686_v44 = vsel %vm5184_vm0, 4294967295, %v6685_v44  ;;  %vm6691_vm2 = vmpackc.low %vm5071_vm9, %vm5098_vm8 }
 0x114   : > { %vm5188_vm15 = vmor %vm360_vm13, %vm488_vm10  ;;  %3698 = vmatprep.subr.bf16.mxu0 %v4154_v61  ;;  %vm362_vm13 = vcmp.eq.s32.totalorder %v4467_v18, %v4909_v10 }
 0x115   : > { %vm5205_vm10 = vmor %vm1950_vm12, %vm1982_vm14  ;;  %vm1951_vm12 = vcmp.eq.s32.totalorder %v4476_v22, %v4880_v6 }
 0x116   : > { %3667 = vmatmul.mubr.msk.bf16.gmra.mrb[12].mxu0 %vm6691_vm2, %v6674_v31  ;;  %v5217_v58 = vpop.permute.xlu1 %436  ;;  %vm5226_vm14 = vmor %vm2429_vm7, %vm2461_vm1  ;;  %vm1984_vm7 = vcmp.eq.s32.totalorder %v4476_v22, %v4512_v34 }
 0x117   : > { %v6693_v20 = vsel %vm5226_vm14, 4294967295, %v6692_v20  ;;  %vm6694_vm8 = vmpackc.low %vm5089_vm4, %vm5119_vm3  ;;  %vm489_vm9 = vcmp.eq.s32.totalorder %v4467_v18, %v5217_v58  ;;  %vm1983_vm2 = vcmp.eq.s32.totalorder %v4476_v22, %v5217_v58  ;;  %3699 = vmatpush3.bf16.msra.mxu0 %v4154_v61  ;;  %vm936_vm3 = vcmp.eq.s32.totalorder %v4479_v24, %v4623_v57 }
 0x118   : > { %3670 = vmatprep.mubr.msk.bf16.mxu0 %vm6694_vm8, %v6674_v31  ;;  %vm521_vm4 = vmor %vm361_vm6, %vm489_vm9  ;;  %3700 = vmatprep.subr.bf16.mxu0 %v4155_v16  ;;  %vm6695_vm6 = vcmp.eq.s32.totalorder %v4467_v18, %v4512_v34 }
 0x119   : > { %vm3068_vm8 = vmpackc.low %vm521_vm4, %vm5188_vm15  ;;  %vm2462_vm15 = vcmp.eq.s32.totalorder %v4482_v26, %v4459_v13  ;;  %vm2430_vm4 = vcmp.eq.s32.totalorder %v4482_v26, %v4623_v57 }
 0x11a   : > { %3530 = vmatprep.mubr.msk.bf16.mxu1 %vm3068_vm8, %v6674_v31  ;;  %vm2015_vm1 = vmor %vm1951_vm12, %vm1983_vm2  ;;  %vm974_vm8 = vcmp.eq.s32.totalorder %v4479_v24, %v4678_v5 }
 0x11b   : > { %vm5262_vm9 = vmor %vm362_vm13, %vm6695_vm6  ;;  %v5270_v49 = vpop.permute.xlu1 %314  ;;  %3701 = vmatpush3.bf16.msra.mxu0 %v4155_v16  ;;  %vm6700_vm13 = vcmp.eq.s32.totalorder %v4479_v24, %v4459_v13  ;;  %v6706_v13 = vmov 0  ;;  %vm971_vm6 = vcmp.eq.s32.totalorder %v4479_v24, %v4523_v39 }
 0x11c   : > { %vm3284_vm0 = vmpackc.low %vm2015_vm1, %vm5205_vm10  ;;  %vm939_vm10 = vcmp.eq.s32.totalorder %v4479_v24, %v4651_v63 }
 0x11d   : > { %vm5274_vm12 = vmor %vm1952_vm5, %vm1984_vm7  ;;  %vm6704_vm5 = vnez %v6679_v48  ;;  %v6717_v48 = vmov 0 }
 0x11e   : > { %vm5281_vm2 = vmor %vm936_vm3, %vm6700_vm13  ;;  %vm2433_vm13 = vcmp.eq.s32.totalorder %v4482_v26, %v4651_v63  ;;  %v6712_v63 = vmov 0 }
 0x11f   : > { %v6702_v56 = vsel %vm5281_vm2, 4294967295, %v6701_v56  ;;  %vm6705_vm7 = vmpackc.low %vm5151_vm11, %vm6704_vm5  ;;  %vm363_vm11 = vcmp.eq.s32.totalorder %v4467_v18, %v5270_v49 }
 0x120   : > { %3671 = vmatmul.mubr.msk.bf16.gmra.mrb[16].mxu0 %vm6705_vm7, %v6674_v31  ;;  %vm5297_vm1 = vmor %vm2430_vm4, %vm2462_vm15  ;;  %v5308_v57 = vpop.permute.xlu1 %442  ;;  %vm494_vm4 = vcmp.eq.s32.totalorder %v4467_v18, %v4518_v38 }
 0x121   : > { %v6707_v13 = vsel %vm5297_vm1, 4294967295, %v6706_v13  ;;  %3674 = vmatprep.mubr.msk.bf16.mxu0 %vm3284_vm0, %v6674_v31  ;;  %vm5310_vm2 = vmor %vm939_vm10, %vm971_vm6  ;;  %vm491_vm0 = vcmp.eq.s32.totalorder %v4467_v18, %v5308_v57  ;;  %vm1985_vm15 = vcmp.eq.s32.totalorder %v4476_v22, %v5308_v57  ;;  %vm1953_vm10 = vcmp.eq.s32.totalorder %v4476_v22, %v5270_v49 }
 0x122   : > { %v6710_v40 = vsel %vm5310_vm2, 4294967295, %v6709_v40  ;;  %vm523_vm7 = vmor %vm363_vm11, %vm491_vm0  ;;  %vm2465_vm11 = vcmp.eq.s32.totalorder %v4482_v26, %v4523_v39  ;;  %vm972_vm0 = vcmp.eq.s32.totalorder %v4479_v24, %v4465_v17  ;;  %v6715_v39 = vmov 0 }
 0x123   : > { %vm3070_vm6 = vmpackc.low %vm523_vm7, %vm5262_vm9  ;;  %vm940_vm9 = vcmp.eq.s32.totalorder %v4479_v24, %v4675_v4  ;;  %vm1956_vm2 = vcmp.eq.s32.totalorder %v4476_v22, %v4966_v37 }
 0x124   : > { %3531 = vmatmul.mubr.msk.bf16.gmra.mrb[20].mxu1 %vm3070_vm6, %v6674_v31  ;;  %vm2017_vm1 = vmor %vm1953_vm10, %vm1985_vm15  ;;  %vm941_vm6 = vcmp.eq.s32.totalorder %v4479_v24, %v4548_v45 }
 0x125   : > { %vm3286_vm3 = vmpackc.low %vm2017_vm1, %vm5274_vm12  ;;  %v5333_v29 = vpop.permute.xlu1 %317  ;;  %vm973_vm12 = vcmp.eq.s32.totalorder %v4479_v24, %v4607_v55 }
 0x126   : > { %vm5342_vm7 = vmor %vm2433_vm13, %vm2465_vm11  ;;  %vm2466_vm13 = vcmp.eq.s32.totalorder %v4482_v26, %v4465_v17  ;;  %v6719_v17 = vmov 0 }
 0x127   : > { %v6713_v63 = vsel %vm5342_vm7, 4294967295, %v6712_v63  ;;  %vm5354_vm10 = vmor %vm940_vm9, %vm972_vm0  ;;  %vm364_vm0 = vcmp.eq.s32.totalorder %v4467_v18, %v5333_v29  ;;  %vm1954_vm9 = vcmp.eq.s32.totalorder %v4476_v22, %v5333_v29  ;;  %vm1955_vm7 = vcmp.eq.s32.totalorder %v4476_v22, %v4925_v14 }
 0x128   : > { %3675 = vmatmul.mubr.msk.bf16.gmra.mrb[20].mxu0 %vm3286_vm3, %v6674_v31  ;;  %v6716_v39 = vsel %vm5354_vm10, 4294967295, %v6715_v39  ;;  %vm2434_vm3 = vcmp.eq.s32.totalorder %v4482_v26, %v4675_v4  ;;  %vm5362_vm11 = vmor %vm941_vm6, %vm973_vm12  ;;  %vm2467_vm12 = vcmp.eq.s32.totalorder %v4482_v26, %v4607_v55  ;;  %v6725_v55 = vmov 0 }
 0x129   : > { %v6718_v48 = vsel %vm5362_vm11, 4294967295, %v6717_v48  ;;  %vm5380_vm6 = vmor %vm2434_vm3, %vm2466_vm13  ;;  %vm2435_vm11 = vcmp.eq.s32.totalorder %v4482_v26, %v4548_v45  ;;  %v6733_v4 = vmov 0  ;;  %v6747_v45 = vmov 0 }
 0x12a   : > { %v5366_v52 = vpop.permute.xlu1 %445  ;;  %v6720_v17 = vsel %vm5380_vm6, 4294967295, %v6719_v17  ;;  %vm5398_vm3 = vmor %vm2435_vm11, %vm2467_vm12  ;;  %vm976_vm6 = vcmp.eq.s32.totalorder %v4479_v24, %v4473_v21 }
 0x12b   : > { %vm492_vm15 = vcmp.eq.s32.totalorder %v4467_v18, %v5366_v52  ;;  %vm1986_vm5 = vcmp.eq.s32.totalorder %v4476_v22, %v5366_v52  ;;  %v6726_v55 = vsel %vm5398_vm3, 4294967295, %v6725_v55 }
 0x12c   : > { %vm5384_vm1 = vmor %vm364_vm0, %vm492_vm15  ;;  %vm365_vm15 = vcmp.eq.s32.totalorder %v4467_v18, %v4925_v14 }
 0x12d   : > { %vm5390_vm10 = vmor %vm1954_vm9, %vm1986_vm5  ;;  %vm366_vm9 = vcmp.eq.s32.totalorder %v4467_v18, %v4966_v37 }
 0x12e   : > { %v5396_v16 = vpop.permute.xlu1 %448  ;;  %vm5425_vm11 = vmor %vm366_vm9, %vm494_vm4  ;;  %vm942_vm4 = vcmp.eq.s32.totalorder %v4479_v24, %v4647_v62  ;;  %vm2437_vm9 = vcmp.eq.s32.totalorder %v4482_v26, %v4705_v53 }
 0x12f   : > { %vm493_vm13 = vcmp.eq.s32.totalorder %v4467_v18, %v5396_v16  ;;  %vm1987_vm5 = vcmp.eq.s32.totalorder %v4476_v22, %v5396_v16 }
 0x130   : > { %vm525_vm0 = vmor %vm365_vm15, %vm493_vm13  ;;  %vm975_vm15 = vcmp.eq.s32.totalorder %v4479_v24, %v4707_v8 }
 0x131   : > { %vm3072_vm12 = vmpackc.low %vm525_vm0, %vm5384_vm1  ;;  %vm943_vm1 = vcmp.eq.s32.totalorder %v4479_v24, %v4705_v53  ;;  %vm1988_vm0 = vcmp.eq.s32.totalorder %v4476_v22, %v4518_v38  ;;  %v6737_v38 = vmov 0  ;;  %v6740_v53 = vmov 0 }
 0x132   : > { %3534 = vmatprep.mubr.msk.bf16.mxu1 %vm3072_vm12, %v6674_v31  ;;  %vm2019_vm14 = vmor %vm1955_vm7, %vm1987_vm5  ;;  %vm2436_vm12 = vcmp.eq.s32.totalorder %v4482_v26, %v4647_v62 }
 0x133   : > { %vm3288_vm13 = vmpackc.low %vm2019_vm14, %vm5390_vm10  ;;  %v5435_v60 = vpop.permute.xlu1 %326  ;;  %vm2468_vm14 = vcmp.eq.s32.totalorder %v4482_v26, %v4678_v5  ;;  %v6735_v5 = vmov 0 }
 0x134   : > { %3678 = vmatprep.mubr.msk.bf16.mxu0 %vm3288_vm13, %v6674_v31  ;;  %vm5442_vm7 = vmor %vm1956_vm2, %vm1988_vm0  ;;  %vm2469_vm2 = vcmp.eq.s32.totalorder %v4482_v26, %v4707_v8  ;;  %v6742_v8 = vmov 0 }
 0x135   : > { %vm5446_vm5 = vmor %vm942_vm4, %vm974_vm8  ;;  %vm944_vm8 = vcmp.eq.s32.totalorder %v4479_v24, %v4731_v11 }
 0x136   : > { %v6732_v1 = vsel %vm5446_vm5, 4294967295, %v6731_v1  ;;  %vm5452_vm10 = vmor %vm943_vm1, %vm975_vm15  ;;  %vm367_vm15 = vcmp.eq.s32.totalorder %v4467_v18, %v5435_v60  ;;  %vm977_vm5 = vcmp.eq.s32.totalorder %v4479_v24, %v4764_v25 }
 0x137   : > { %v6734_v4 = vsel %vm5452_vm10, 4294967295, %v6733_v4  ;;  %vm5466_vm13 = vmor %vm2436_vm12, %vm2468_vm14  ;;  %vm979_vm14 = vcmp.eq.s32.totalorder %v4479_v24, %v4861_v3  ;;  %vm1992_vm10 = vcmp.eq.s32.totalorder %v4476_v22, %v5111_v23 }
 0x138   : > { %v6736_v5 = vsel %vm5466_vm13, 4294967295, %v6735_v5  ;;  %v5470_v61 = vpop.permute.xlu1 %454  ;;  %vm5472_vm1 = vmor %vm2437_vm9, %vm2469_vm2  ;;  %vm1957_vm2 = vcmp.eq.s32.totalorder %v4476_v22, %v5435_v60  ;;  %vm1959_vm13 = vcmp.eq.s32.totalorder %v4476_v22, %v5005_v51 }
 0x139   : > { %v6738_v38 = vsel %vm5472_vm1, 4294967295, %v6737_v38  ;;  %vm495_vm0 = vcmp.eq.s32.totalorder %v4467_v18, %v5470_v61  ;;  %vm1989_vm4 = vcmp.eq.s32.totalorder %v4476_v22, %v5470_v61  ;;  %vm1960_vm1 = vcmp.eq.s32.totalorder %v4476_v22, %v5061_v15 }
 0x13a   : > { %vm527_vm12 = vmor %vm367_vm15, %vm495_vm0 }
 0x13b   : > { %vm3074_vm9 = vmpackc.low %vm527_vm12, %vm5425_vm11  ;;  %vm945_vm11 = vcmp.eq.s32.totalorder %v4479_v24, %v4742_v12  ;;  %vm2470_vm12 = vcmp.eq.s32.totalorder %v4482_v26, %v4473_v21 }
 0x13c   : > { %3535 = vmatmul.mubr.msk.bf16.gmra.mrb[24].mxu1 %vm3074_vm9, %v6674_v31  ;;  %vm2021_vm3 = vmor %vm1957_vm2, %vm1989_vm4  ;;  %vm2438_vm4 = vcmp.eq.s32.totalorder %v4482_v26, %v4731_v11  ;;  %v6744_v11 = vmov 0 }
 0x13d   : > { %vm3290_vm15 = vmpackc.low %vm2021_vm3, %vm5442_vm7  ;;  %v5499_v62 = vpop.permute.xlu1 %329  ;;  %vm2471_vm3 = vcmp.eq.s32.totalorder %v4482_v26, %v4764_v25  ;;  %vm2439_vm7 = vcmp.eq.s32.totalorder %v4482_v26, %v4742_v12  ;;  %v6875_v25 = vmov 0 }
 0x13e   : > { %6739 = vst [vmem:[#allocation12_spill] sm:$0xff] %v5499_v62  ;;  %3679 = vmatmul.mubr.msk.bf16.gmra.mrb[24].mxu0 %vm3290_vm15, %v6674_v31  ;;  %vm5504_vm0 = vmor %vm944_vm8, %vm976_vm6  ;;  %vm368_vm2 = vcmp.eq.s32.totalorder %v4467_v18, %v5499_v62  ;;  %vm947_vm6 = vcmp.eq.s32.totalorder %v4479_v24, %v4754_v19 }
 0x13f   : > { %v6741_v53 = vsel %vm5504_vm0, 4294967295, %v6740_v53  ;;  %vm5512_vm9 = vmor %vm945_vm11, %vm977_vm5 }
 0x140   : > { %v6743_v8 = vsel %vm5512_vm9, 4294967295, %v6742_v8  ;;  %vm5524_vm8 = vmor %vm2438_vm4, %vm2470_vm12  ;;  %vm978_vm12 = vcmp.eq.s32.totalorder %v4479_v24, %v4836_v59  ;;  %vm946_vm4 = vcmp.eq.s32.totalorder %v4479_v24, %v4800_v47 }
 0x141   : > { %v6745_v11 = vsel %vm5524_vm8, 4294967295, %v6744_v11  ;;  %vm5530_vm5 = vmor %vm2439_vm7, %vm2471_vm3  ;;  %vm1958_vm7 = vcmp.eq.s32.totalorder %v4476_v22, %v5499_v62  ;;  %v6754_v62 = vmov 0 }
 0x142   : > { %v5528_v21 = vpop.permute.xlu1 %457  ;;  %v6748_v45 = vsel %vm5530_vm5, 4294967295, %v6747_v45  ;;  %vm498_vm5 = vcmp.eq.s32.totalorder %v4467_v18, %v5111_v23  ;;  %vm5578_vm9 = vmor %vm947_vm6, %vm979_vm14  ;;  %vm2472_vm6 = vcmp.eq.s32.totalorder %v4482_v26, %v4836_v59  ;;  %v6765_v59 = vmov 0 }
 0x143   : > { %6746 = vst [vmem:[#allocation13_spill] sm:$0xff] %v5528_v21  ;;  %vm496_vm15 = vcmp.eq.s32.totalorder %v4467_v18, %v5528_v21  ;;  %vm1990_vm11 = vcmp.eq.s32.totalorder %v4476_v22, %v5528_v21  ;;  %v6860_v21 = vmov 0 }
 0x144   : > { %vm5546_vm3 = vmor %vm368_vm2, %vm496_vm15  ;;  %vm369_vm2 = vcmp.eq.s32.totalorder %v4467_v18, %v5005_v51 }
 0x145   : > { %vm5556_vm0 = vmor %vm1958_vm7, %vm1990_vm11  ;;  %vm370_vm7 = vcmp.eq.s32.totalorder %v4467_v18, %v5061_v15  ;;  %v6798_v15 = vmov 0 }
 0x146   : > { %v5562_v43 = vpop.permute.xlu1 %460  ;;  %vm5566_vm15 = vmor %vm946_vm4, %vm978_vm12 }
 0x147   : > { %6753 = vst [vmem:[#allocation14_spill] sm:$0xff] %v5562_v43  ;;  %v6755_v62 = vsel %vm5566_vm15, 4294967295, %v6754_v62  ;;  %vm497_vm8 = vcmp.eq.s32.totalorder %v4467_v18, %v5562_v43  ;;  %vm1991_vm11 = vcmp.eq.s32.totalorder %v4476_v22, %v5562_v43  ;;  %vm5591_vm14 = vmor %vm370_vm7, %vm498_vm5  ;;  %vm949_vm7 = vcmp.eq.s32.totalorder %v4479_v24, %v4882_v7  ;;  %v4163_v43 = vld [vmem:[%s6500_s1 + $0xb8] sm:$0xff]  }
 0x148   : > { %vm529_vm4 = vmor %vm369_vm2, %vm497_vm8  ;;  %vm2473_vm2 = vcmp.eq.s32.totalorder %v4482_v26, %v4861_v3  ;;  %v6873_v3 = vmov 0 }
 0x149   : > { %vm3076_vm12 = vmpackc.low %vm529_vm4, %vm5546_vm3  ;;  %vm2441_vm3 = vcmp.eq.s32.totalorder %v4482_v26, %v4754_v19  ;;  %v6763_v19 = vmov 0 }
 0x14a   : > { %3538 = vmatprep.mubr.msk.bf16.mxu1 %vm3076_vm12, %v6674_v31  ;;  %vm2023_vm15 = vmor %vm1959_vm13, %vm1991_vm11 }
 0x14b   : > { %vm3292_vm8 = vmpackc.low %vm2023_vm15, %vm5556_vm0  ;;  %vm2440_vm0 = vcmp.eq.s32.totalorder %v4482_v26, %v4800_v47 }
 0x14c   : > { %v5599_v12 = vpop.permute.xlu1 %338  ;;  %3682 = vmatprep.mubr.msk.bf16.mxu0 %vm3292_vm8, %v6674_v31  ;;  %vm5606_vm13 = vmor %vm1960_vm1, %vm1992_vm10  ;;  %vm948_vm10 = vcmp.eq.s32.totalorder %v4479_v24, %v4783_v36  ;;  %vm980_vm1 = vcmp.eq.s32.totalorder %v4479_v24, %v4485_v27  ;;  %vm981_vm8 = vcmp.eq.s32.totalorder %v4479_v24, %v4907_v9 }
 0x14d   : > { %vm5620_vm4 = vmor %vm2440_vm0, %vm2472_vm6  ;;  %vm371_vm0 = vcmp.eq.s32.totalorder %v4467_v18, %v5599_v12 }
 0x14e   : > { %v6764_v19 = vsel %vm5620_vm4, 4294967295, %v6763_v19  ;;  %vm5628_vm12 = vmor %vm2441_vm3, %vm2473_vm2  ;;  %vm2477_vm4 = vcmp.eq.s32.totalorder %v4482_v26, %v4980_v46 }
 0x14f   : > { %v6766_v59 = vsel %vm5628_vm12, 4294967295, %v6765_v59  ;;  %vm5644_vm3 = vmor %vm948_vm10, %vm980_vm1  ;;  %vm1961_vm12 = vcmp.eq.s32.totalorder %v4476_v22, %v5599_v12 }
 0x150   : > { %vm5652_vm11 = vmor %vm949_vm7, %vm981_vm8  ;;  %vm2442_vm7 = vcmp.eq.s32.totalorder %v4482_v26, %v4783_v36  ;;  %vm2474_vm8 = vcmp.eq.s32.totalorder %v4482_v26, %v4485_v27  ;;  %v6781_v27 = vld [vmem:[#allocation8_spill] sm:$0xff]  ;;  %v6784_v36 = vmov 0 }
 0x151   : > { %v5638_v47 = vpop.permute.xlu1 %466 }
 0x152   : > { %vm499_vm2 = vcmp.eq.s32.totalorder %v4467_v18, %v5638_v47  ;;  %vm1993_vm15 = vcmp.eq.s32.totalorder %v4476_v22, %v5638_v47  ;;  %v6777_v18 = vmov 0  ;;  %v6779_v22 = vmov 0 }
 0x153   : > { %vm531_vm10 = vmor %vm371_vm0, %vm499_vm2  ;;  %vm6771_vm0 = vnez %v6683_v35  ;;  %v6804_v35 = vmov 0 }
 0x154   : > { %vm3078_vm1 = vmpackc.low %vm531_vm10, %vm5591_vm14  ;;  %vm6772_vm14 = vnez %v6617_v54  ;;  %vm2475_vm10 = vcmp.eq.s32.totalorder %v4482_v26, %v4907_v9  ;;  %v6782_v54 = vmov 0  ;;  %v6794_v9 = vld [vmem:[#allocation5_spill] sm:$0xff] }
 0x155   : > { %3539 = vmatmul.mubr.msk.bf16.gmra.mrb[28].mxu1 %vm3078_vm1, %v6674_v31  ;;  %vm2025_vm5 = vmor %vm1961_vm12, %vm1993_vm15  ;;  %vm2443_vm1 = vcmp.eq.s32.totalorder %v4482_v26, %v4882_v7  ;;  %v4156_v7 = vld [vmem:[%s6500_s1 + $0x80] sm:$0xff]   ;;  %vm6789_vm15 = vnez %v6710_v40  ;;  %v4159_v40 = vld [vmem:[%s6500_s1 + $0x98] sm:$0xff]  }
 0x156   : > { %vm3294_vm6 = vmpackc.low %vm2025_vm5, %vm5606_vm13  ;;  %vm6774_vm13 = vnez %v6693_v20  ;;  %vm6775_vm5 = vnez %v6686_v44  ;;  %v4158_v44 = vld [vmem:[%s6500_s1 + $0x90] sm:$0xff]   ;;  %v6808_v20 = vmov 0 }
 0x157   : > { %vm6773_vm2 = vmpackc.low %vm6771_vm0, %vm6772_vm14  ;;  %3683 = vmatmul.mubr.msk.bf16.gmra.mrb[28].mxu0 %vm3294_vm6, %v6674_v31  ;;  %vm982_vm6 = vcmp.eq.s32.totalorder %v4479_v24, %v4943_v28 }
 0x158   : > { %3558 = vmatprep.mubr.msk.bf16.mxu1 %vm6773_vm2, %v6674_v31  ;;  %vm6776_vm12 = vmpackc.low %vm6774_vm13, %vm6775_vm5  ;;  %vm951_vm2 = vcmp.eq.s32.totalorder %v4479_v24, %v4814_v50  ;;  %vm983_vm13 = vcmp.eq.s32.totalorder %v4479_v24, %v4980_v46 }
 0x159   : > { %3702 = vmatprep.mubr.msk.bf16.mxu0 %vm6776_vm12, %v6674_v31  ;;  %vm5692_vm0 = vmor %vm2442_vm7, %vm2474_vm8  ;;  %vm950_vm8 = vcmp.eq.s32.totalorder %v4479_v24, %v6781_v27  ;;  %vm6786_vm7 = vnez %v6595_v32  ;;  %v6792_v32 = vmov 0 }
 0x15a   : > { %v6778_v18 = vsel %vm5692_vm0, 4294967295, %v6777_v18  ;;  %vm5698_vm14 = vmor %vm2443_vm1, %vm2475_vm10  ;;  %vm2476_vm10 = vcmp.eq.s32.totalorder %v4482_v26, %v4943_v28  ;;  %vm2445_vm1 = vcmp.eq.s32.totalorder %v4482_v26, %v4814_v50  ;;  %vm6790_vm0 = vnez %v6602_v41  ;;  %v4157_v41 = vld [vmem:[%s6500_s1 + $0x88] sm:$0xff]  }
 0x15b   : > { %v6780_v22 = vsel %vm5698_vm14, 4294967295, %v6779_v22  ;;  %vm5712_vm5 = vmor %vm950_vm8, %vm982_vm6  ;;  %vm6787_vm6 = vnez %v6702_v56  ;;  %vm6795_vm14 = vnez %v6597_v33  ;;  %v6803_v33 = vld [vmem:[#allocation9_spill] sm:$0xff]  ;;  %v6813_v56 = vmov 0 }
 0x15c   : > { %v6783_v54 = vsel %vm5712_vm5, 4294967295, %v6782_v54  ;;  %vm5718_vm12 = vmor %vm951_vm2, %vm983_vm13  ;;  %vm2444_vm13 = vcmp.eq.s32.totalorder %v4482_v26, %v6781_v27  ;;  %vm984_vm2 = vcmp.eq.s32.totalorder %v4479_v24, %v6794_v9  ;;  %vm6796_vm5 = vnez %v6707_v13  ;;  %v6818_v13 = vld [vmem:[#allocation11_spill] sm:$0xff] }
 0x15d   : > { %v6785_v36 = vsel %vm5718_vm12, 4294967295, %v6784_v36  ;;  %vm6788_vm8 = vmpackc.low %vm6786_vm7, %vm6787_vm6 }
 0x15e   : > { %3559 = vmatmul.mubr.msk.bf16.vlgmr.msra.gmra.mrb[0].mxu1 %vm6788_vm8, %v6674_v31  ;;  %vm6791_vm7 = vmpackc.low %vm6789_vm15, %vm6790_vm0  ;;  %vm952_vm8 = vcmp.eq.s32.totalorder %v4479_v24, %v4855_v2  ;;  %vm985_vm0 = vcmp.eq.s32.totalorder %v4479_v24, %v5069_v0 }
 0x15f   : > { %3742 = vmatpush3.bf16.msra.mxu1 %v4156_v7  ;;  %3562 = vmatprep.mubr.msk.bf16.mxu1 %vm6791_vm7, %v6674_v31  ;;  %vm5747_vm6 = vmor %vm2444_vm13, %vm2476_vm10  ;;  %vm6800_vm10 = vnez %v6713_v63  ;;  %vm6801_vm13 = vnez %v6604_v42  ;;  %v6822_v63 = vmov 0  ;;  %v6905_v42 = vmov 0 }
 0x160   : > { %v6793_v32 = vsel %vm5747_vm6, 4294967295, %v6792_v32  ;;  %vm6797_vm12 = vmpackc.low %vm6795_vm14, %vm6796_vm5  ;;  %3735 = vmatprep.subr.bf16.mxu1 %v4157_v41  ;;  %vm6811_vm14 = vnez %v6716_v39  ;;  %v6827_v39 = vmov 0 }
 0x161   : > { %3703 = vmatmul.mubr.msk.bf16.vlgmr.msra.gmra.mrb[0].mxu0 %vm6797_vm12, %v6674_v31  ;;  %vm5764_vm15 = vmor %vm2445_vm1, %vm2477_vm4  ;;  %vm953_vm4 = vcmp.eq.s32.totalorder %v4479_v24, %v6803_v33  ;;  %vm2446_vm12 = vcmp.eq.s32.totalorder %v4482_v26, %v4855_v2  ;;  %vm2478_vm1 = vcmp.eq.s32.totalorder %v4482_v26, %v6794_v9 }
 0x162   : > { %v6799_v15 = vsel %vm5764_vm15, 4294967295, %v6798_v15  ;;  %vm6802_vm7 = vmpackc.low %vm6800_vm10, %vm6801_vm13  ;;  %vm2479_vm13 = vcmp.eq.s32.totalorder %v4482_v26, %v5069_v0 }
 0x163   : > { %3706 = vmatprep.mubr.msk.bf16.mxu0 %vm6802_vm7, %v6674_v31  ;;  %vm5782_vm5 = vmor %vm952_vm8, %vm984_vm2  ;;  %3743 = vmatpush3.bf16.msra.mxu1 %v4157_v41  ;;  %vm2447_vm8 = vcmp.eq.s32.totalorder %v4482_v26, %v6803_v33  ;;  %vm986_vm7 = vcmp.eq.s32.totalorder %v4479_v24, %v5168_v30  ;;  %vm6816_vm2 = vnez %v6732_v1 }
 0x164   : > { %v6805_v35 = vsel %vm5782_vm5, 4294967295, %v6804_v35  ;;  %vm5790_vm10 = vmor %vm953_vm4, %vm985_vm0  ;;  %3736 = vmatprep.subr.bf16.mxu1 %v4158_v44  ;;  %vm6810_vm4 = vnez %v6718_v48  ;;  %v4160_v48 = vld [vmem:[%s6500_s1 + $0xa0] sm:$0xff]  }
 0x165   : > { %vm5805_vm0 = vmor %vm2446_vm12, %vm2478_vm1  ;;  %vm987_vm12 = vcmp.eq.s32.totalorder %v4479_v24, %v5217_v58  ;;  %vm6815_vm1 = vnez %v6734_v4  ;;  %v4161_v4 = vld [vmem:[%s6500_s1 + $0xa8] sm:$0xff]  }
 0x166   : > { %v6809_v20 = vsel %vm5805_vm0, 4294967295, %v6808_v20  ;;  %vm6812_vm6 = vmpackc.low %vm6810_vm4, %vm6811_vm14  ;;  %vm954_vm14 = vcmp.eq.s32.totalorder %v4479_v24, %v6818_v13  ;;  %vm2448_vm0 = vcmp.eq.s32.totalorder %v4482_v26, %v6818_v13 }
 0x167   : > { %3563 = vmatmul.mubr.msk.bf16.gmra.mrb[4].mxu1 %vm6812_vm6, %v6674_v31  ;;  %vm5817_vm15 = vmor %vm2447_vm8, %vm2479_vm13  ;;  %vm6819_vm13 = vnez %v6726_v55  ;;  %vm6820_vm8 = vnez %v6720_v17  ;;  %vm6824_vm6 = vnez %v6738_v38  ;;  %v6829_v38 = vmov 0 }
 0x168   : > { %v6814_v56 = vsel %vm5817_vm15, 4294967295, %v6813_v56  ;;  %vm6817_vm5 = vmpackc.low %vm6815_vm1, %vm6816_vm2  ;;  %3744 = vmatpush3.bf16.msra.mxu1 %v4158_v44  ;;  %vm2480_vm1 = vcmp.eq.s32.totalorder %v4482_v26, %v5168_v30  ;;  %v6831_v17 = vmov 0  ;;  %vm6834_vm15 = vnez %v6741_v53 }
 0x169   : > { %3566 = vmatprep.mubr.msk.bf16.mxu1 %vm6817_vm5, %v6674_v31  ;;  %vm6821_vm4 = vmpackc.low %vm6819_vm13, %vm6820_vm8  ;;  %3737 = vmatprep.subr.bf16.mxu1 %v4159_v40  ;;  %vm955_vm5 = vcmp.eq.s32.totalorder %v4479_v24, %v4880_v6  ;;  %vm6825_vm13 = vnez %v6736_v5  ;;  %v6848_v5 = vmov 0  ;;  %v6852_v53 = vmov 0 }
 0x16a   : > { %3707 = vmatmul.mubr.msk.bf16.gmra.mrb[4].mxu0 %vm6821_vm4, %v6674_v31  ;;  %vm5846_vm2 = vmor %vm954_vm14, %vm986_vm7  ;;  %vm2481_vm7 = vcmp.eq.s32.totalorder %v4482_v26, %v5217_v58  ;;  %vm6833_vm14 = vnez %v6743_v8  ;;  %v4162_v8 = vld [vmem:[%s6500_s1 + $0xb0] sm:$0xff]   ;;  %v6911_v44 = vmov 0 }
 0x16b   : > { %v6823_v63 = vsel %vm5846_vm2, 4294967295, %v6822_v63  ;;  %vm6826_vm8 = vmpackc.low %vm6824_vm6, %vm6825_vm13  ;;  %vm2449_vm6 = vcmp.eq.s32.totalorder %v4482_v26, %v4880_v6 }
 0x16c   : > { %3710 = vmatprep.mubr.msk.bf16.mxu0 %vm6826_vm8, %v6674_v31  ;;  %vm5858_vm4 = vmor %vm955_vm5, %vm987_vm12  ;;  %3745 = vmatpush3.bf16.msra.mxu1 %v4159_v40  ;;  %vm956_vm12 = vcmp.eq.s32.totalorder %v4479_v24, %v4909_v10  ;;  %vm988_vm5 = vcmp.eq.s32.totalorder %v4479_v24, %v4512_v34 }
 0x16d   : > { %v6828_v39 = vsel %vm5858_vm4, 4294967295, %v6827_v39  ;;  %vm5872_vm13 = vmor %vm2448_vm0, %vm2480_vm1  ;;  %3738 = vmatprep.subr.bf16.mxu1 %v4160_v48  ;;  %vm989_vm0 = vcmp.eq.s32.totalorder %v4479_v24, %v5308_v57  ;;  %vm2450_vm4 = vcmp.eq.s32.totalorder %v4482_v26, %v4909_v10  ;;  %vm2482_vm1 = vcmp.eq.s32.totalorder %v4482_v26, %v4512_v34 }
 0x16e   : > { %v6830_v38 = vsel %vm5872_vm13, 4294967295, %v6829_v38  ;;  %vm5883_vm8 = vmor %vm2449_vm6, %vm2481_vm7  ;;  %vm957_vm7 = vcmp.eq.s32.totalorder %v4479_v24, %v5270_v49  ;;  %vm6838_vm13 = vnez %v6755_v62  ;;  %v6850_v62 = vmov 0 }
 0x16f   : > { %v6832_v17 = vsel %vm5883_vm8, 4294967295, %v6831_v17  ;;  %vm6835_vm2 = vmpackc.low %vm6833_vm14, %vm6834_vm15  ;;  %vm2483_vm14 = vcmp.eq.s32.totalorder %v4482_v26, %v5308_v57 }
 0x170   : > { %3567 = vmatmul.mubr.msk.bf16.gmra.mrb[8].mxu1 %vm6835_vm2, %v6674_v31  ;;  %vm5901_vm6 = vmor %vm956_vm12, %vm988_vm5  ;;  %vm6842_vm12 = vnez %v6748_v45  ;;  %vm6843_vm5 = vnez %v6745_v11  ;;  %v6865_v45 = vmov 0 }
 0x171   : > { %vm6839_vm15 = vmpackc.low %vm5578_vm9, %vm6838_vm13  ;;  %3746 = vmatpush3.bf16.msra.mxu1 %v4160_v48  ;;  %vm6845_vm13 = vnez %v6766_v59  ;;  %vm991_vm9 = vcmp.eq.s32.totalorder %v4479_v24, %v5396_v16  ;;  %v6871_v59 = vmov 0 }
 0x172   : > { %3570 = vmatprep.mubr.msk.bf16.mxu1 %vm6839_vm15, %v6674_v31  ;;  %vm5915_vm2 = vmor %vm957_vm7, %vm989_vm0  ;;  %3739 = vmatprep.subr.bf16.mxu1 %v4161_v4  ;;  %vm6846_vm0 = vnez %v6764_v19  ;;  %v6870_v19 = vld [vmem:[#allocation6_spill] sm:$0xff] }
 0x173   : > { %vm6844_vm8 = vmpackc.low %vm6842_vm12, %vm6843_vm5  ;;  %vm990_vm12 = vcmp.eq.s32.totalorder %v4479_v24, %v5366_v52 }
 0x174   : > { %3711 = vmatmul.mubr.msk.bf16.gmra.mrb[8].mxu0 %vm6844_vm8, %v6674_v31  ;;  %vm6847_vm7 = vmpackc.low %vm6845_vm13, %vm6846_vm0  ;;  %vm2451_vm8 = vcmp.eq.s32.totalorder %v4482_v26, %v5270_v49  ;;  %vm6858_vm13 = vnez %v6783_v54  ;;  %v6882_v54 = vld [vmem:[#allocation14_spill] sm:$0xff] }
 0x175   : > { %3714 = vmatprep.mubr.msk.bf16.mxu0 %vm6847_vm7, %v6674_v31  ;;  %vm5942_vm15 = vmor %vm2450_vm4, %vm2482_vm1  ;;  %3747 = vmatpush3.bf16.msra.mxu1 %v4161_v4  ;;  %vm958_vm4 = vcmp.eq.s32.totalorder %v4479_v24, %v5333_v29  ;;  %vm959_vm1 = vcmp.eq.s32.totalorder %v4479_v24, %v4925_v14 }
 0x176   : > { %v6849_v5 = vsel %vm5942_vm15, 4294967295, %v6848_v5  ;;  %vm5948_vm5 = vmor %vm2451_vm8, %vm2483_vm14  ;;  %vm2484_vm14 = vcmp.eq.s32.totalorder %v4482_v26, %v5366_v52  ;;  %3740 = vmatprep.subr.bf16.mxu1 %v4162_v8  ;;  %vm2485_vm8 = vcmp.eq.s32.totalorder %v4482_v26, %v5396_v16 }
 0x177   : > { %v6851_v62 = vsel %vm5948_vm5, 4294967295, %v6850_v62  ;;  %vm5962_vm0 = vmor %vm958_vm4, %vm990_vm12  ;;  %vm2453_vm5 = vcmp.eq.s32.totalorder %v4482_v26, %v4925_v14  ;;  %vm6863_vm4 = vnez %v6778_v18  ;;  %v6877_v18 = vld [vmem:[#allocation13_spill] sm:$0xff] }
 0x178   : > { %v6853_v53 = vsel %vm5962_vm0, 4294967295, %v6852_v53  ;;  %vm5971_vm7 = vmor %vm959_vm1, %vm991_vm9  ;;  %vm2452_vm9 = vcmp.eq.s32.totalorder %v4482_v26, %v5333_v29  ;;  %vm6857_vm1 = vnez %v6785_v36  ;;  %v6886_v36 = vld [vmem:[#allocation12_spill] sm:$0xff] }
 0x179   : > { %vm6856_vm12 = vmpackc.low %vm5652_vm11, %vm5644_vm3  ;;  %vm960_vm3 = vcmp.eq.s32.totalorder %v4479_v24, %v4966_v37  ;;  %3748 = vmatpush3.bf16.msra.mxu1 %v4162_v8 }
 0x17a   : > { %3571 = vmatmul.mubr.msk.bf16.gmra.mrb[12].mxu1 %vm6856_vm12, %v6674_v31  ;;  %vm6859_vm15 = vmpackc.low %vm6857_vm1, %vm6858_vm13  ;;  %vm6862_vm12 = vnez %v6780_v22  ;;  %3741 = vmatprep.subr.bf16.mxu1 %v4163_v43  ;;  %v6880_v22 = vmov 0 }
 0x17b   : > { %3574 = vmatprep.mubr.msk.bf16.mxu1 %vm6859_vm15, %v6674_v31  ;;  %vm5997_vm11 = vmor %vm2452_vm9, %vm2484_vm14  ;;  %vm993_vm15 = vcmp.eq.s32.totalorder %v4479_v24, %v5470_v61  ;;  %vm6867_vm14 = vnez %v6799_v15  ;;  %vm6868_vm9 = vnez %v6793_v32 }
 0x17c   : > { %v6861_v21 = vsel %vm5997_vm11, 4294967295, %v6860_v21  ;;  %vm6864_vm0 = vmpackc.low %vm6862_vm12, %vm6863_vm4  ;;  %vm2454_vm12 = vcmp.eq.s32.totalorder %v4482_v26, %v4966_v37 }
 0x17d   : > { %3715 = vmatmul.mubr.msk.bf16.gmra.mrb[12].mxu0 %vm6864_vm0, %v6674_v31  ;;  %vm6009_vm13 = vmor %vm2453_vm5, %vm2485_vm8  ;;  %vm992_vm0 = vcmp.eq.s32.totalorder %v4479_v24, %v6870_v19  ;;  %vm961_vm8 = vcmp.eq.s32.totalorder %v4479_v24, %v5435_v60  ;;  %3749 = vmatpush3.bf16.msra.mxu1 %v4163_v43 }
 0x17e   : > { %v6866_v45 = vsel %vm6009_vm13, 4294967295, %v6865_v45  ;;  %vm6869_vm1 = vmpackc.low %vm6867_vm14, %vm6868_vm9  ;;  %vm2487_vm9 = vcmp.eq.s32.totalorder %v4482_v26, %v5470_v61  ;;  %vm963_vm13 = vcmp.eq.s32.totalorder %v4479_v24, %v5005_v51 }
 0x17f   : > { %3718 = vmatprep.mubr.msk.bf16.mxu0 %vm6869_vm1, %v6674_v31  ;;  %vm6032_vm4 = vmor %vm960_vm3, %vm992_vm0  ;;  %vm2486_vm3 = vcmp.eq.s32.totalorder %v4482_v26, %v6870_v19  ;;  %vm2455_vm0 = vcmp.eq.s32.totalorder %v4482_v26, %v5435_v60 }
 0x180   : > { %v6872_v59 = vsel %vm6032_vm4, 4294967295, %v6871_v59  ;;  %vm6038_vm14 = vmor %vm961_vm8, %vm993_vm15  ;;  %vm994_vm15 = vcmp.eq.s32.totalorder %v4479_v24, %v6877_v18  ;;  %vm6878_vm8 = vnez %v6805_v35  ;;  %vm6884_vm4 = vnez %v6823_v63  ;;  %v6903_v35 = vld [vmem:[#allocation10_spill] sm:$0xff] }
 0x181   : > { %v6874_v3 = vsel %vm6038_vm14, 4294967295, %v6873_v3  ;;  %vm6052_vm5 = vmor %vm2454_vm12, %vm2486_vm3  ;;  %vm995_vm12 = vcmp.eq.s32.totalorder %v4479_v24, %v6882_v54  ;;  %vm6883_vm3 = vnez %v6828_v39 }
 0x182   : > { %v6876_v25 = vsel %vm6052_vm5, 4294967295, %v6875_v25  ;;  %vm6879_vm11 = vmpackc.low %vm5790_vm10, %vm6878_vm8  ;;  %vm6893_vm10 = vnez %v6830_v38 }
 0x183   : > { %3575 = vmatmul.mubr.msk.bf16.gmra.mrb[16].mxu1 %vm6879_vm11, %v6674_v31  ;;  %vm6064_vm1 = vmor %vm2455_vm0, %vm2487_vm9  ;;  %vm962_vm11 = vcmp.eq.s32.totalorder %v4479_v24, %v6886_v36  ;;  %vm6887_vm9 = vnez %v6814_v56  ;;  %vm6888_vm0 = vnez %v6809_v20  ;;  %v6923_v20 = vld [vmem:[#allocation7_spill] sm:$0xff]  ;;  %v6926_v56 = vmov 0 }
 0x184   : > { %v6881_v22 = vsel %vm6064_vm1, 4294967295, %v6880_v22  ;;  %vm6885_vm14 = vmpackc.low %vm6883_vm3, %vm6884_vm4  ;;  %vm6892_vm3 = vnez %v6832_v17 }
 0x185   : > { %3578 = vmatprep.mubr.msk.bf16.mxu1 %vm6885_vm14, %v6674_v31  ;;  %vm6889_vm8 = vmpackc.low %vm6887_vm9, %vm6888_vm0  ;;  %vm2488_vm14 = vcmp.eq.s32.totalorder %v4482_v26, %v6877_v18  ;;  %vm2456_vm9 = vcmp.eq.s32.totalorder %v4482_v26, %v6886_v36  ;;  %vm2457_vm0 = vcmp.eq.s32.totalorder %v4482_v26, %v5005_v51 }
 0x186   : > { %3719 = vmatmul.mubr.msk.bf16.gmra.mrb[16].mxu0 %vm6889_vm8, %v6674_v31  ;;  %vm6090_vm4 = vmor %vm962_vm11, %vm994_vm15  ;;  %vm2489_vm15 = vcmp.eq.s32.totalorder %v4482_v26, %v6882_v54  ;;  %vm6902_vm8 = vcmp.eq.s32.totalorder %v4479_v24, %v5111_v23 }
 0x187   : > { %vm6894_vm5 = vmpackc.low %vm6892_vm3, %vm6893_vm10 }
 0x188   : > { %3722 = vmatprep.mubr.msk.bf16.mxu0 %vm6894_vm5, %v6674_v31  ;;  %vm6102_vm1 = vmor %vm963_vm13, %vm995_vm12  ;;  %vm6920_vm5 = vcmp.eq.s32.totalorder %v4482_v26, %v6903_v35 }
 0x189   : > { %vm6116_vm10 = vmor %vm2456_vm9, %vm2488_vm14  ;;  %vm6904_vm14 = vcmp.eq.s32.totalorder %v4479_v24, %v6903_v35 }
 0x18a   : > { %vm6120_vm13 = vmor %vm2457_vm0, %vm2489_vm15  ;;  %vm6907_vm15 = vnez %v6853_v53 }
 0x18b   : > { %vm6901_vm12 = vmpackc.low %vm5915_vm2, %vm5901_vm6  ;;  %vm6909_vm6 = vcmp.eq.s32.totalorder %v4479_v24, %v5638_v47  ;;  %vm6910_vm2 = vcmp.eq.s32.totalorder %v4479_v24, %v5599_v12  ;;  %v6921_v24 = vmov 0 }
 0x18c   : > { %3579 = vmatmul.mubr.msk.bf16.gmra.mrb[20].mxu1 %vm6901_vm12, %v6674_v31  ;;  %vm6140_vm3 = vmor %vm6904_vm14, %vm6902_vm8  ;;  %vm6913_vm12 = vnez %v6851_v62  ;;  %vm6914_vm8 = vnez %v6849_v5 }
 0x18d   : > { %v6906_v42 = vsel %vm6140_vm3, 4294967295, %v6905_v42  ;;  %vm6908_vm9 = vmpackc.low %vm5971_vm7, %vm6907_vm15  ;;  %vm6916_vm15 = vnez %v6866_v45  ;;  %vm1448_vm7 = vcmp.eq.s32.totalorder %v6923_v20, %v6781_v27  ;;  %vm1483_vm3 = vcmp.eq.s32.totalorder %v6923_v20, %v5069_v0 }
 0x18e   : > { %3582 = vmatprep.mubr.msk.bf16.mxu1 %vm6908_vm9, %v6674_v31  ;;  %vm6156_vm0 = vmor %vm6910_vm2, %vm6909_vm6  ;;  %vm6917_vm9 = vnez %v6861_v21  ;;  %vm6919_vm2 = vcmp.eq.s32.totalorder %v4482_v26, %v5111_v23  ;;  %v6962_v0 = vmov 0 }
 0x18f   : > { %v6912_v44 = vsel %vm6156_vm0, 4294967295, %v6911_v44  ;;  %vm6915_vm14 = vmpackc.low %vm6913_vm12, %vm6914_vm8  ;;  %vm1480_vm8 = vcmp.eq.s32.totalorder %v6923_v20, %v4943_v28 }
 0x190   : > { %3723 = vmatmul.mubr.msk.bf16.gmra.mrb[20].mxu0 %vm6915_vm14, %v6674_v31  ;;  %vm6918_vm6 = vmpackc.low %vm6916_vm15, %vm6917_vm9  ;;  %vm6924_vm14 = vcmp.eq.s32.totalorder %v4482_v26, %v5638_v47  ;;  %vm6925_vm15 = vcmp.eq.s32.totalorder %v4482_v26, %v5599_v12  ;;  %v6928_v26 = vmov 0 }
 0x191   : > { %3726 = vmatprep.mubr.msk.bf16.mxu0 %vm6918_vm6, %v6674_v31  ;;  %vm6182_vm12 = vmor %vm6920_vm5, %vm6919_vm2  ;;  %vm1449_vm6 = vcmp.eq.s32.totalorder %v6923_v20, %v4814_v50  ;;  %vm1481_vm5 = vcmp.eq.s32.totalorder %v6923_v20, %v4980_v46  ;;  %vm6932_vm2 = vnez %v6874_v3 }
 0x192   : > { %v6922_v24 = vsel %vm6182_vm12, 4294967295, %v6921_v24  ;;  %vm6194_vm9 = vmor %vm6925_vm15, %vm6924_vm14  ;;  %vm1482_vm14 = vcmp.eq.s32.totalorder %v6923_v20, %v6794_v9  ;;  %vm1450_vm15 = vcmp.eq.s32.totalorder %v6923_v20, %v4855_v2  ;;  %vm6933_vm12 = vnez %v6872_v59 }
 0x193   : > { %v6927_v56 = vsel %vm6194_vm9, 4294967295, %v6926_v56  ;;  %vm6212_vm11 = vmor %vm1448_vm7, %vm1480_vm8  ;;  %vm1451_vm8 = vcmp.eq.s32.totalorder %v6923_v20, %v6803_v33 }
 0x194   : > { %v6929_v26 = vsel %vm6212_vm11, 4294967295, %v6928_v26  ;;  %vm6218_vm0 = vmor %vm1449_vm6, %vm1481_vm5 }
 0x195   : > { %vm6934_vm9 = vmpackc.low %vm6932_vm2, %vm6933_vm12  ;;  %vm1484_vm12 = vcmp.eq.s32.totalorder %v6923_v20, %v5168_v30  ;;  %vm6939_vm2 = vnez %v6876_v25 }
 0x196   : > { %3583 = vmatmul.mubr.msk.bf16.gmra.mrb[24].mxu1 %vm6934_vm9, %v6674_v31  ;;  %vm6935_vm6 = vmpackc.low %vm6102_vm1, %vm6090_vm4  ;;  %vm6938_vm9 = vnez %v6881_v22  ;;  %vm1485_vm1 = vcmp.eq.s32.totalorder %v6923_v20, %v5217_v58  ;;  %v6944_v58 = vmov 0 }
 0x197   : > { %3586 = vmatprep.mubr.msk.bf16.mxu1 %vm6935_vm6, %v6674_v31  ;;  %vm6240_vm5 = vmor %vm1450_vm15, %vm1482_vm14  ;;  %vm1453_vm15 = vcmp.eq.s32.totalorder %v6923_v20, %v4880_v6  ;;  %vm1487_vm6 = vcmp.eq.s32.totalorder %v6923_v20, %v5308_v57  ;;  %v6948_v6 = vmov 0 }
 0x198   : > { %vm6940_vm7 = vmpackc.low %vm6938_vm9, %vm6939_vm2  ;;  %vm1455_vm9 = vcmp.eq.s32.totalorder %v6923_v20, %v5270_v49 }
 0x199   : > { %3727 = vmatmul.mubr.msk.bf16.gmra.mrb[24].mxu0 %vm6940_vm7, %v6674_v31  ;;  %vm6252_vm11 = vmor %vm1451_vm8, %vm1483_vm3  ;;  %vm1452_vm3 = vcmp.eq.s32.totalorder %v6923_v20, %v6818_v13  ;;  %vm1454_vm8 = vcmp.eq.s32.totalorder %v6923_v20, %v4909_v10  ;;  %v6960_v10 = vmov 0 }
 0x19a   : > { %vm6943_vm4 = vmpackc.low %vm6120_vm13, %vm6116_vm10  ;;  %vm1486_vm10 = vcmp.eq.s32.totalorder %v6923_v20, %v4512_v34 }
 0x19b   : > { %3730 = vmatprep.mubr.msk.bf16.mxu0 %vm6943_vm4, %v6674_v31  ;;  %vm6272_vm7 = vmor %vm1452_vm3, %vm1484_vm12  ;;  %vm6950_vm4 = vnez %v6912_v44  ;;  %vm6951_vm3 = vnez %v6906_v42 }
 0x19c   : > { %v6945_v58 = vsel %vm6272_vm7, 4294967295, %v6944_v58  ;;  %vm6280_vm13 = vmor %vm1453_vm15, %vm1485_vm1  ;;  %vm1488_vm1 = vcmp.eq.s32.totalorder %v6923_v20, %v5366_v52  ;;  %vm1457_vm7 = vcmp.eq.s32.totalorder %v6923_v20, %v4925_v14  ;;  %v6964_v14 = vmov 0 }
 0x19d   : > { %vm6292_vm2 = vmor %vm1454_vm8, %vm1486_vm10  ;;  %vm1489_vm8 = vcmp.eq.s32.totalorder %v6923_v20, %v5396_v16  ;;  %vm6955_vm10 = vnez %v6929_v26 }
 0x19e   : > { %v6949_v6 = vsel %vm6292_vm2, 4294967295, %v6948_v6  ;;  %vm6952_vm15 = vmpackc.low %vm6950_vm4, %vm6951_vm3  ;;  %vm6958_vm3 = vnez %v6922_v24  ;;  %vm1491_vm4 = vcmp.eq.s32.totalorder %v6923_v20, %v5470_v61 }
 0x19f   : > { %3587 = vmatmul.mubr.msk.bf16.gmra.mrb[28].mxu1 %vm6952_vm15, %v6674_v31  ;;  %vm6304_vm14 = vmor %vm1455_vm9, %vm1487_vm6  ;;  %vm1456_vm6 = vcmp.eq.s32.totalorder %v6923_v20, %v5333_v29  ;;  %vm6957_vm9 = vnez %v6927_v56 }
 0x1a0   : > { %vm6956_vm12 = vmpackc.low %vm6218_vm0, %vm6955_vm10 }
 0x1a1   : > { %3622 = vmatprep.mubr.msk.bf16.mxu1 %vm6956_vm12, %v6674_v31  ;;  %vm6959_vm15 = vmpackc.low %vm6957_vm9, %vm6958_vm3  ;;  %vm1458_vm12 = vcmp.eq.s32.totalorder %v6923_v20, %v4966_v37  ;;  %v6966_v37 = vmov 0  ;;  %vm1494_vm9 = vcmp.eq.s32.totalorder %v6923_v20, %v5111_v23 }
 0x1a2   : > { %3731 = vmatmul.mubr.msk.bf16.gmra.mrb[28].mxu0 %vm6959_vm15, %v6674_v31  ;;  %vm6330_vm0 = vmor %vm1456_vm6, %vm1488_vm1  ;;  %vm1490_vm1 = vcmp.eq.s32.totalorder %v6923_v20, %v6870_v19  ;;  %vm1459_vm6 = vcmp.eq.s32.totalorder %v6923_v20, %v5435_v60  ;;  %vm1493_vm15 = vcmp.eq.s32.totalorder %v6923_v20, %v6882_v54 }
 0x1a3   : > { %v6961_v10 = vsel %vm6330_vm0, 4294967295, %v6960_v10  ;;  %vm6336_vm10 = vmor %vm1457_vm7, %vm1489_vm8  ;;  %vm1492_vm7 = vcmp.eq.s32.totalorder %v6923_v20, %v6877_v18  ;;  %vm1462_vm0 = vcmp.eq.s32.totalorder %v6923_v20, %v6903_v35 }
 0x1a4   : > { %v6963_v0 = vsel %vm6336_vm10, 4294967295, %v6962_v0  ;;  %vm6350_vm3 = vmor %vm1458_vm12, %vm1490_vm1  ;;  %vm1460_vm12 = vcmp.eq.s32.totalorder %v6923_v20, %v6886_v36  ;;  %vm1461_vm1 = vcmp.eq.s32.totalorder %v6923_v20, %v5005_v51 }
 0x1a5   : > { %v6965_v14 = vsel %vm6350_vm3, 4294967295, %v6964_v14  ;;  %vm6356_vm8 = vmor %vm1459_vm6, %vm1491_vm4  ;;  %vm6969_vm3 = vnez %v6945_v58 }
 0x1a6   : > { %v6967_v37 = vsel %vm6356_vm8, 4294967295, %v6966_v37  ;;  %vm6968_vm4 = vmpackc.low %vm6252_vm11, %vm6240_vm5  ;;  %vm1495_vm5 = vcmp.eq.s32.totalorder %v6923_v20, %v5638_v47 }
 0x1a7   : > { %3623 = vmatmul.mubr.msk.bf16.vlgmr.msra.gmra.mrb[16].mxu1 %vm6968_vm4, %v6674_v31  ;;  %vm1524_vm6 = vmor %vm1460_vm12, %vm1492_vm7  ;;  %vm1463_vm12 = vcmp.eq.s32.totalorder %v6923_v20, %v5599_v12 }
 0x1a8   : > { %vm6970_vm8 = vmpackc.low %vm6280_vm13, %vm6969_vm3  ;;  %vm6971_vm3 = vnez %v6949_v6 }
 0x1a9   : > { %3626 = vmatprep.mubr.msk.bf16.mxu1 %vm6970_vm8, %v6674_v31  ;;  %vm1525_vm11 = vmor %vm1461_vm1, %vm1493_vm15  ;;  %vm6973_vm8 = vnez %v6963_v0  ;;  %vm6974_vm15 = vnez %v6961_v10 }
 0x1aa   : > { %vm3220_vm7 = vmpackc.low %vm1525_vm11, %vm1524_vm6  ;;  %vm6976_vm6 = vnez %v6967_v37 }
 0x1ab   : > { %vm1526_vm4 = vmor %vm1462_vm0, %vm1494_vm9  ;;  %vm6977_vm0 = vnez %v6965_v14 }
 0x1ac   : > { %vm1527_vm10 = vmor %vm1463_vm12, %vm1495_vm5 }
 0x1ad   : > { %vm3222_vm2 = vmpackc.low %vm1527_vm10, %vm1526_vm4 }
 0x1ae   : > { %vm6972_vm13 = vmpackc.low %vm6304_vm14, %vm6971_vm3 }
 0x1af   : > { %3627 = vmatmul.mubr.msk.bf16.gmra.mrb[20].mxu1 %vm6972_vm13, %v6674_v31  ;;  %vm6975_vm1 = vmpackc.low %vm6973_vm8, %vm6974_vm15 }
 0x1b0   : > { %3630 = vmatprep.mubr.msk.bf16.mxu1 %vm6975_vm1, %v6674_v31  ;;  %vm6978_vm10 = vmpackc.low %vm6976_vm6, %vm6977_vm0 }
 0x1b7   : > { %3631 = vmatmul.mubr.msk.bf16.gmra.mrb[24].mxu1 %vm6978_vm10, %v6674_v31 }
 0x1b8   : > { %3634 = vmatprep.mubr.msk.bf16.mxu1 %vm3220_vm7, %v6674_v31 }
 0x1bf   : > { %3635 = vmatmul.mubr.msk.bf16.gmra.mrb[28].mxu1 %vm3222_vm2, %v6674_v31 }
 0x231   : > { %v3560_v51 = vpop.f32.mrb[0].mxu1 }
 0x232   : > { %v1240_v23 = vpop.f32.mrb[1].mxu1 }
 0x233   : > { %v3561_v49 = vpop.f32.mrb[2].mxu1 }
 0x234   : > { %v3704_v30 = vpop.f32.mrb[0].mxu0  ;;  %v1243_v52 = vpop.f32.mrb[3].mxu1 }
 0x235   : > { %v3755_v57 = vadd.f32 %v3704_v30, %v3560_v51  ;;  %v2734_v29 = vpop.f32.mrb[1].mxu0 }
 0x236   : > { %v3761_v16 = vadd.f32 %v2734_v29, %v1240_v23  ;;  %v3705_v60 = vpop.f32.mrb[2].mxu0 }
 0x237   : > { %2895 = vst [vmem:[%s6413_s3 + $0x10] sm:$0xff] %v3755_v57  ;;  %v3767_v31 = vadd.f32 %v3705_v60, %v3561_v49  ;;  %v2737_v61 = vpop.f32.mrb[3].mxu0 }
 0x238   : > { %2893 = vst [vmem:[%s6413_s3] sm:$0xff] %v3761_v16  ;;  %v3773_v12 = vadd.f32 %v2737_v61, %v1243_v52 }
 0x239   : > { %2896 = vst [vmem:[%s6413_s3 + $0x18] sm:$0xff] %v3767_v31 }
 0x23a   : > { %2894 = vst [vmem:[%s6413_s3 + $0x8] sm:$0xff] %v3773_v12  ;;  %v3564_v47 = vpop.f32.mrb[4].mxu1 }
 0x23b   : > { %v1256_v27 = vpop.f32.mrb[5].mxu1 }
 0x23c   : > { %v3565_v33 = vpop.f32.mrb[6].mxu1 }
 0x23d   : > { %v3708_v9 = vpop.f32.mrb[4].mxu0  ;;  %v1259_v63 = vpop.f32.mrb[7].mxu1 }
 0x23e   : > { %v3779_v13 = vadd.f32 %v3708_v9, %v3564_v47  ;;  %v2750_v40 = vpop.f32.mrb[5].mxu0 }
 0x23f   : > { %v3785_v39 = vadd.f32 %v2750_v40, %v1256_v27  ;;  %v3709_v38 = vpop.f32.mrb[6].mxu0 }
 0x240   : > { %2899 = vst [vmem:[%s6413_s3 + $0x30] sm:$0xff] %v3779_v13  ;;  %v3791_v48 = vadd.f32 %v3709_v38, %v3565_v33  ;;  %v2753_v17 = vpop.f32.mrb[7].mxu0 }
 0x241   : > { %2897 = vst [vmem:[%s6413_s3 + $0x20] sm:$0xff] %v3785_v39  ;;  %v3797_v55 = vadd.f32 %v2753_v17, %v1259_v63 }
 0x242   : > { %2900 = vst [vmem:[%s6413_s3 + $0x38] sm:$0xff] %v3791_v48 }
 0x243   : > { %2898 = vst [vmem:[%s6413_s3 + $0x28] sm:$0xff] %v3797_v55  ;;  %v3568_v1 = vpop.f32.mrb[8].mxu1 }
 0x244   : > { %v1272_v4 = vpop.f32.mrb[9].mxu1 }
 0x245   : > { %v3569_v62 = vpop.f32.mrb[10].mxu1 }
 0x246   : > { %v1275_v11 = vpop.f32.mrb[11].mxu1 }
 0x247   : > { %v3712_v5 = vpop.f32.mrb[8].mxu0 }
 0x248   : > { %v3803_v53 = vadd.f32 %v3712_v5, %v3568_v1  ;;  %v2766_v8 = vpop.f32.mrb[9].mxu0 }
 0x249   : > { %v3809_v21 = vadd.f32 %v2766_v8, %v1272_v4  ;;  %v3713_v45 = vpop.f32.mrb[10].mxu0 }
 0x24a   : > { %2903 = vst [vmem:[%s6413_s3 + $0x50] sm:$0xff] %v3803_v53  ;;  %v3815_v43 = vadd.f32 %v3713_v45, %v3569_v62  ;;  %v2769_v19 = vpop.f32.mrb[11].mxu0 }
 0x24b   : > { %2901 = vst [vmem:[%s6413_s3 + $0x40] sm:$0xff] %v3809_v21  ;;  %v3821_v59 = vadd.f32 %v2769_v19, %v1275_v11 }
 0x24c   : > { %2904 = vst [vmem:[%s6413_s3 + $0x58] sm:$0xff] %v3815_v43 }
 0x24d   : > { %2902 = vst [vmem:[%s6413_s3 + $0x48] sm:$0xff] %v3821_v59  ;;  %v3572_v3 = vpop.f32.mrb[12].mxu1 }
 0x24e   : > { %v1288_v25 = vpop.f32.mrb[13].mxu1 }
 0x24f   : > { %v3573_v22 = vpop.f32.mrb[14].mxu1 }
 0x250   : > { %v3716_v18 = vpop.f32.mrb[12].mxu0  ;;  %v1291_v7 = vpop.f32.mrb[15].mxu1 }
 0x251   : > { %v3827_v54 = vadd.f32 %v3716_v18, %v3572_v3  ;;  %v2782_v36 = vpop.f32.mrb[13].mxu0 }
 0x252   : > { %v3833_v32 = vadd.f32 %v2782_v36, %v1288_v25  ;;  %v3717_v41 = vpop.f32.mrb[14].mxu0 }
 0x253   : > { %2907 = vst [vmem:[%s6413_s3 + $0x70] sm:$0xff] %v3827_v54  ;;  %v3839_v15 = vadd.f32 %v3717_v41, %v3573_v22  ;;  %v2785_v35 = vpop.f32.mrb[15].mxu0 }
 0x254   : > { %2905 = vst [vmem:[%s6413_s3 + $0x60] sm:$0xff] %v3833_v32  ;;  %v3845_v42 = vadd.f32 %v2785_v35, %v1291_v7 }
 0x255   : > { %2908 = vst [vmem:[%s6413_s3 + $0x78] sm:$0xff] %v3839_v15 }
 0x256   : > { %2906 = vst [vmem:[%s6413_s3 + $0x68] sm:$0xff] %v3845_v42 }
 0x259   : > { %v3720_v44 = vpop.f32.mrb[16].mxu0 }
 0x25a   : > { %v2798_v24 = vpop.f32.mrb[17].mxu0 }
 0x25b   : > { %v3721_v20 = vpop.f32.mrb[18].mxu0 }
 0x25c   : > { %v2801_v56 = vpop.f32.mrb[19].mxu0 }
 0x263   : > { %v3724_v26 = vpop.f32.mrb[20].mxu0 }
 0x264   : > { %v2814_v50 = vpop.f32.mrb[21].mxu0 }
 0x265   : > { %v3725_v2 = vpop.f32.mrb[22].mxu0 }
 0x266   : > { %v2817_v28 = vpop.f32.mrb[23].mxu0 }
 0x26c   : > { %v3728_v58 = vpop.f32.mrb[24].mxu0 }
 0x26d   : > { %v2830_v46 = vpop.f32.mrb[25].mxu0 }
 0x26e   : > { %v3729_v6 = vpop.f32.mrb[26].mxu0 }
 0x26f   : > { %v2833_v34 = vpop.f32.mrb[27].mxu0 }
 0x275   : > { %v3732_v10 = vpop.f32.mrb[28].mxu0 }
 0x276   : > { %v2846_v0 = vpop.f32.mrb[29].mxu0 }
 0x277   : > { %v3733_v14 = vpop.f32.mrb[30].mxu0 }
 0x278   : > { %v2849_v37 = vpop.f32.mrb[31].mxu0 }
 0x27a   : > { %v3624_v51 = vpop.f32.mrb[16].mxu1 }
 0x27b   : > { %v1802_v23 = vpop.f32.mrb[17].mxu1  ;;  %v3851_v49 = vadd.f32 %v3720_v44, %v3624_v51 }
 0x27c   : > { %v3625_v30 = vpop.f32.mrb[18].mxu1  ;;  %v3857_v29 = vadd.f32 %v2798_v24, %v1802_v23 }
 0x27d   : > { %v1805_v57 = vpop.f32.mrb[19].mxu1  ;;  %2911 = vst [vmem:[%s6413_s3 + $0x90] sm:$0xff] %v3851_v49  ;;  %v3863_v52 = vadd.f32 %v3721_v20, %v3625_v30 }
 0x27e   : > { %2909 = vst [vmem:[%s6413_s3 + $0x80] sm:$0xff] %v3857_v29  ;;  %v3869_v16 = vadd.f32 %v2801_v56, %v1805_v57 }
 0x27f   : > { %2912 = vst [vmem:[%s6413_s3 + $0x98] sm:$0xff] %v3863_v52 }
 0x280   : > { %2910 = vst [vmem:[%s6413_s3 + $0x88] sm:$0xff] %v3869_v16 }
 0x282   : > { %v3628_v60 = vpop.f32.mrb[20].mxu1 }
 0x283   : > { %v1818_v31 = vpop.f32.mrb[21].mxu1  ;;  %v3875_v12 = vadd.f32 %v3724_v26, %v3628_v60 }
 0x284   : > { %v3629_v61 = vpop.f32.mrb[22].mxu1  ;;  %v3881_v27 = vadd.f32 %v2814_v50, %v1818_v31 }
 0x285   : > { %v1821_v47 = vpop.f32.mrb[23].mxu1  ;;  %2915 = vst [vmem:[%s6413_s3 + $0xb0] sm:$0xff] %v3875_v12  ;;  %v3887_v9 = vadd.f32 %v3725_v2, %v3629_v61 }
 0x286   : > { %2913 = vst [vmem:[%s6413_s3 + $0xa0] sm:$0xff] %v3881_v27  ;;  %v3893_v33 = vadd.f32 %v2817_v28, %v1821_v47 }
 0x287   : > { %2916 = vst [vmem:[%s6413_s3 + $0xb8] sm:$0xff] %v3887_v9 }
 0x288   : > { %2914 = vst [vmem:[%s6413_s3 + $0xa8] sm:$0xff] %v3893_v33 }
 0x28a   : > { %v3632_v13 = vpop.f32.mrb[24].mxu1 }
 0x28b   : > { %v1834_v40 = vpop.f32.mrb[25].mxu1  ;;  %v3899_v39 = vadd.f32 %v3728_v58, %v3632_v13 }
 0x28c   : > { %v3633_v63 = vpop.f32.mrb[26].mxu1  ;;  %v3905_v48 = vadd.f32 %v2830_v46, %v1834_v40 }
 0x28d   : > { %v1837_v38 = vpop.f32.mrb[27].mxu1  ;;  %2919 = vst [vmem:[%s6413_s3 + $0xd0] sm:$0xff] %v3899_v39  ;;  %v3911_v17 = vadd.f32 %v3729_v6, %v3633_v63 }
 0x28e   : > { %2917 = vst [vmem:[%s6413_s3 + $0xc0] sm:$0xff] %v3905_v48  ;;  %v3917_v55 = vadd.f32 %v2833_v34, %v1837_v38 }
 0x28f   : > { %2920 = vst [vmem:[%s6413_s3 + $0xd8] sm:$0xff] %v3911_v17 }
 0x290   : > { %2918 = vst [vmem:[%s6413_s3 + $0xc8] sm:$0xff] %v3917_v55 }
 0x292   : > { %v3636_v1 = vpop.f32.mrb[28].mxu1 }
 0x293   : > { %v1850_v4 = vpop.f32.mrb[29].mxu1  ;;  %v3923_v62 = vadd.f32 %v3732_v10, %v3636_v1 }
 0x294   : > { %v3637_v5 = vpop.f32.mrb[30].mxu1  ;;  %v3929_v8 = vadd.f32 %v2846_v0, %v1850_v4 }
 0x295   : > { %v1853_v53 = vpop.f32.mrb[31].mxu1  ;;  %2923 = vst [vmem:[%s6413_s3 + $0xf0] sm:$0xff] %v3923_v62  ;;  %v3935_v11 = vadd.f32 %v3733_v14, %v3637_v5 }
 0x296   : > { %2921 = vst [vmem:[%s6413_s3 + $0xe0] sm:$0xff] %v3929_v8  ;;  %v3941_v21 = vadd.f32 %v2849_v37, %v1853_v53 }
 0x297   : > { %2924 = vst [vmem:[%s6413_s3 + $0xf8] sm:$0xff] %v3935_v11 }
 0x298   : > { %2922 = vst [vmem:[%s6413_s3 + $0xe8] sm:$0xff] %v3941_v21 }
 0x299   : > { %4177 = shalt.err (!%p4174_p3)
}
 0x29a   : > { %s4178_s21 = scalar_lea.hbm %s6449_s7, 4096  ;;  %s4182_s24 = scalar_lea.hbm %s6501_s2, 8192 }
 0x29b   : > { %p4179_p4 = scmp.ne.s32.totalorder %s6449_s7, %s4178_s21  ;;  %p4183_p9 = scmp.lt.u32.totalorder %s6449_s7, %s6501_s2 }
 0x29c   : > { %p4184_p10 = scmp.lt.u32.totalorder %s4182_s24, %s4178_s21  ;;  %p4186_p12 = scmp.lt.u32.totalorder %s4178_s21, %s6449_s7 }
 0x29d   : > { %p4180_p7 = pnand %p4179_p4, %p4287_p5 }
 0x29e   : > { %p4185_p11 = por %p4184_p10, %p4183_p9 }
 0x29f   : > { %p4181_p8 = pneg %p4180_p7 }
 0x2a0   : > { %p4187_p13 = por %p4186_p12, %p4185_p11 }
 0x2a2   : > { %p4188_p0 = pnand %p4187_p13, %p4181_p8 }
 0x2a4   : > { %4191 = shalt.err (!%p4188_p0)
}
 0x2a5   : > { %s4232_s28 = smov 128   ;;  %s4233_s29 = smov 8  }
 0x2a6   : > { %4038 = dma.vmem_to_hbm [thread:$0]  (%p4287_p5), %s6451_s4, 4096, %s6449_s7, %s6458_s13, %s4232_s28, %s4232_s28, %s4233_s29  }
 0x2a7 PF: > { %p4044_p1 = scmp.ge.s32.totalorder %s4226_s12, 2  ;;  %s2954_s30 = sand.u32 1, %s4214_s9  }
 0x2a8   : > { %s2955_s3 = scalar_lea.sflag [#allocation3], %s2954_s30 }
 0x2a9   : > { %p4041_p2 = pnand %p4044_p1, %p4291_p6 }
 0x2ab   : > { %4209 = dma.done.wait (!%p4041_p2), %s2955_s3, 4096  }
 0x2ac   : > { %4211 = vsyncadd (!%p4041_p2), %s2955_s3, 4294963200  ;;  %p12_p3 = scmp.ge.s32.totalorder %s4274_s15, 4   ;;  %s6979_s9 = smov %s4218_s10 }
 0x2ad   : > { %s6980_s10 = smov %s4222_s11  ;;  %s6981_s11 = smov %s4285_s18 }
 0x2ae   : > { %s6982_s12 = smov %s4274_s15  ;;  %14 = sbr.rel (!%p12_p3) target bundleno = 3 (0x3), region = 63 }
 0x2b5   :  { %2960 = vsyncpa [#allocation3], 1 }
 0x2b6   :  { %2962 = vsyncpa [#allocation3 + $0x1], 1 }

</bundles_post_ra>
